<compile_context>
chip_gen: v5e
topology: v5e:2x2
jax: 0.10.0
libtpu: 0.0.40
codegen_flags: <defaults>
</compile_context>

<pallas_src>
import numpy as np
import jax
import jax.numpy as jnp
from jax.experimental import pallas as pl
from jax.experimental.pallas import tpu as pltpu

# ---- scaled-down but structurally identical dims (see SMNModel constants) ----
N_DICT   = 64      # n_dict (scaled down from 1_054_344)
DIM_EMB  = 32      # dim_embedding (scaled from 300)
DIM_GRU1 = 32      # dim_gru1      (scaled from 300)
DIM_GRU2 = 16      # dim_gru2      (scaled from 100)
DIM_SIM  = 16      # dim_sim_vec   (scaled from 50)
SENT_LEN = 8       # batch_sentence_len (scaled from 38); (SENT_LEN-3+1) % 3 == 0
MAGIC_3  = 3
N_FMAP   = 8       # n_feature_map
N_IN_CH  = 2       # n_in_channel
N_LABEL  = 2
CONV_OUT = SENT_LEN - MAGIC_3 + 1              # 6
POOL_OUT = CONV_OUT // MAGIC_3                 # 2
CNN_FEAT = N_FMAP * POOL_OUT * POOL_OUT        # 32 (cnn_linear in_features)
K_DIM    = N_IN_CH * MAGIC_3 * SENT_LEN        # 48: rows of the folded conv matrix
Q_DIM    = CONV_OUT * N_FMAP                   # 48: (out-col, out-channel) lanes

assert (SENT_LEN - MAGIC_3 + 1) % MAGIC_3 == 0


def _sigmoid(x):
    return 1.0 / (1.0 + jnp.exp(-x))


# --------------------------------------------------------------------------
# Single fused kernel.
#   x_tm : (L*N, E)  time-major word embeddings (row = t*N + n)
#   x_bm : (N, L, E) batch-major word embeddings (n < B: response, n >= B: hist)
#   GRU weights are gate-concatenated (r|z|n) along the lane axis.
#   conv_k: (K_DIM, Q_DIM) banded im2col-folded conv weight, conv_b48: (1, Q_DIM)
#   out  : (B, N_LABEL) logits
# --------------------------------------------------------------------------
def _make_smn_kernel(U, B, L):
    N = B + U * B            # GRU1 batch: rows [0:B] response, [B:N] histories
    UB = U * B
    H1, H2 = DIM_GRU1, DIM_GRU2

    def kernel(x_tm_ref, x_bm_ref,
               wih1_ref, whh1_ref, bih1_ref, bhh1_ref,
               A_ref, convk_ref, convb_ref,
               cnnw_ref, cnnb_ref,
               wih2_ref, whh2_ref, bih2_ref, bhh2_ref,
               glinw_ref, glinb_ref,
               out_ref, u_all_ref):
        # ---------------- GRU1 (response + all histories in one batch) --------
        # Hoisted, gate-fused input projection: one (N*L, E) @ (E, 3H1) matmul.
        xg_all = jnp.dot(x_tm_ref[...], wih1_ref[...],
                         preferred_element_type=jnp.float32) + bih1_ref[...]  # (L*N, 3H1)
        whh1 = whh1_ref[...]
        bhh1 = bhh1_ref[...]
        h = jnp.zeros((N, H1), jnp.float32)
        for t in range(L):                                    # static unroll (L = 8)
            xg = xg_all[t * N:(t + 1) * N, :]                 # (N, 3H1) time-major slab
            hg = jnp.dot(h, whh1, preferred_element_type=jnp.float32) + bhh1
            r = _sigmoid(xg[:, 0:H1] + hg[:, 0:H1])
            z = _sigmoid(xg[:, H1:2 * H1] + hg[:, H1:2 * H1])
            n = jnp.tanh(xg[:, 2 * H1:3 * H1] + r * hg[:, 2 * H1:3 * H1])
            h = (1.0 - z) * n + z * h
            u_all_ref[:, pl.ds(t, 1), :] = h[:, None, :]      # keep full GRU1 sequence

        # ---------------- matching for all U*B (history, response) pairs ------
        x_bm = x_bm_ref[...]                                  # (N, L, E)
        wr = x_bm[0:B]                                        # (B, L, E)  response words
        wh = x_bm[B:N]                                        # (UB, L, E) history words
        u_all = u_all_ref[...]                                # (N, L, H1)
        ur = u_all[0:B]                                       # (B, L, H1)
        uh = u_all[B:N]                                       # (UB, L, H1)

        wr_rep = jnp.concatenate([wr] * U, axis=0)            # (UB, L, E)  wr_rep[u*B+b]=wr[b]
        ur_rep = jnp.concatenate([ur] * U, axis=0)            # (UB, L, H1)

        # matrix1[n] = wh[n] @ wr[n % B]^T
        m1 = jnp.einsum('nle,nke->nlk', wh, wr_rep,
                        preferred_element_type=jnp.float32)   # (UB, L, L)
        # matrix2[n] = (uh[n] @ A) @ ur[n % B]^T
        t2 = jnp.dot(uh.reshape(UB * L, H1), A_ref[...],
                     preferred_element_type=jnp.float32).reshape(UB, L, H1)
        m2 = jnp.einsum('nlk,nmk->nlm', t2, ur_rep,
                        preferred_element_type=jnp.float32)   # (UB, L, L)

        # Conv2d(2 -> N_FMAP, 3x3, valid) as ONE batched MXU matmul:
        #   big_S[n, i, s*L + p]      = m_{ic}[n, i + ki, p]         (s = ic*3 + ki)
        #   conv_k[s*L + p, j*OC+oc]  = W[oc, ic, ki, p - j]  (0 <= p-j < 3, else 0)
        big_S = jnp.concatenate(
            [m1[:, ki:ki + CONV_OUT, :] for ki in range(MAGIC_3)]
            + [m2[:, ki:ki + CONV_OUT, :] for ki in range(MAGIC_3)],
            axis=-1)                                          # (UB, CONV_OUT, K_DIM)
        k_b = jnp.broadcast_to(convk_ref[...][None], (UB, K_DIM, Q_DIM))
        conv = jnp.einsum('nip,npq->niq', big_S, k_b,
                          preferred_element_type=jnp.float32) + convb_ref[...]
        conv = jnp.maximum(conv, 0.0)                         # ReLU, (UB, CONV_OUT, Q_DIM)

        # MaxPool(3, stride 3): rows via sublane-index maxes, cols/channels via
        # 8-wide lane-group maxes of the (j, oc)-packed minor dim.  Features are
        # assembled lane-dense in registers (no scratch, no masked 1-wide stores).
        feat_parts = []
        for pi in range(POOL_OUT):
            rowmax = jnp.maximum(jnp.maximum(conv[:, MAGIC_3 * pi, :],
                                             conv[:, MAGIC_3 * pi + 1, :]),
                                 conv[:, MAGIC_3 * pi + 2, :])           # (UB, Q_DIM)
            for pj in range(POOL_OUT):
                c0 = rowmax[:, (MAGIC_3 * pj + 0) * N_FMAP:(MAGIC_3 * pj + 1) * N_FMAP]
                c1 = rowmax[:, (MAGIC_3 * pj + 1) * N_FMAP:(MAGIC_3 * pj + 2) * N_FMAP]
                c2 = rowmax[:, (MAGIC_3 * pj + 2) * N_FMAP:(MAGIC_3 * pj + 3) * N_FMAP]
                feat_parts.append(jnp.maximum(jnp.maximum(c0, c1), c2))  # (UB, N_FMAP)
        feat = jnp.concatenate(feat_parts, axis=-1)           # (UB, CNN_FEAT), (pi,pj,oc)

        vec = jnp.tanh(jnp.dot(feat, cnnw_ref[...],
                               preferred_element_type=jnp.float32) + cnnb_ref[...])
        # vec: (UB, DIM_SIM), row n = u*B + b  -> utterance-major.

        # ---------------- GRU2 over the utterance axis + final linear ---------
        xg2_all = jnp.dot(vec, wih2_ref[...],
                          preferred_element_type=jnp.float32) + bih2_ref[...]   # (UB, 3H2)
        whh2 = whh2_ref[...]
        bhh2 = bhh2_ref[...]
        h2 = jnp.zeros((B, H2), jnp.float32)
        for t in range(U):                                    # static unroll (U = 3)
            xg = xg2_all[t * B:(t + 1) * B, :]                # (B, 3H2)
            hg = jnp.dot(h2, whh2, preferred_element_type=jnp.float32) + bhh2
            r = _sigmoid(xg[:, 0:H2] + hg[:, 0:H2])
            z = _sigmoid(xg[:, H2:2 * H2] + hg[:, H2:2 * H2])
            n = jnp.tanh(xg[:, 2 * H2:3 * H2] + r * hg[:, 2 * H2:3 * H2])
            h2 = (1.0 - z) * n + z * h2

        # torch.squeeze((1, B, H2)) -> (B, H2) for B > 1 (the reference usage);
        # B == 1 would also squeeze the batch dim in PyTorch.
        out_ref[...] = jnp.dot(h2, glinw_ref[...],
                               preferred_element_type=jnp.float32) + glinb_ref[...]

    return kernel


def _full_spec(shape):
    zeros = (0,) * len(shape)
    return pl.BlockSpec(shape, lambda i: zeros)


def smn_fused_call(x_tm2d, x_bm, kp, U, B):
    L = SENT_LEN
    N = B + U * B
    kernel = _make_smn_kernel(U, B, L)
    operands = (x_tm2d, x_bm,
                kp['wih1'], kp['whh1'], kp['bih1'], kp['bhh1'],
                kp['A'], kp['conv_k'], kp['conv_b48'],
                kp['cnn_w'], kp['cnn_b'],
                kp['wih2'], kp['whh2'], kp['bih2'], kp['bhh2'],
                kp['glin_w'], kp['glin_b'])
    return pl.pallas_call(
        kernel,
        out_shape=jax.ShapeDtypeStruct((B, N_LABEL), jnp.float32),
        grid=(1,),
        in_specs=[_full_spec(op.shape) for op in operands],
        out_specs=_full_spec((B, N_LABEL)),
        scratch_shapes=[pltpu.VMEM((N, L, DIM_GRU1), jnp.float32)],  # GRU1 outputs
        compiler_params=pltpu.CompilerParams(dimension_semantics=("arbitrary",)),
    )(*operands)


# --------------------------------------------------------------------------
# Parameter setup: PyTorch-native layouts, then a host-side pack into kernel
# layouts (gate-concatenated / transposed GRU weights, banded conv matrix,
# permuted cnn-linear weight matching the lane-dense (pi, pj, oc) feature order).
# --------------------------------------------------------------------------
def init_params(key):
    ks = jax.random.split(key, 16)
    s = 0.1
    p = {}
    p['embedding'] = s * jax.random.normal(ks[0], (N_DICT, DIM_EMB), jnp.float32)
    # GRU1, torch layout, gate order (r, z, n) stacked on dim 0
    p['gru1_w_ih'] = s * jax.random.normal(ks[1], (3 * DIM_GRU1, DIM_EMB), jnp.float32)
    p['gru1_w_hh'] = s * jax.random.normal(ks[2], (3 * DIM_GRU1, DIM_GRU1), jnp.float32)
    p['gru1_b_ih'] = s * jax.random.normal(ks[3], (3 * DIM_GRU1,), jnp.float32)
    p['gru1_b_hh'] = s * jax.random.normal(ks[4], (3 * DIM_GRU1,), jnp.float32)
    p['lin_transform'] = jnp.ones((DIM_GRU1, DIM_GRU1), jnp.float32)   # linear_transfom_op
    p['conv_w'] = s * jax.random.normal(ks[5], (N_FMAP, N_IN_CH, MAGIC_3, MAGIC_3),
                                        jnp.float32)
    p['conv_b'] = s * jax.random.normal(ks[6], (N_FMAP,), jnp.float32)
    p['cnn_lin_w'] = s * jax.random.normal(ks[7], (DIM_SIM, CNN_FEAT), jnp.float32)
    p['cnn_lin_b'] = s * jax.random.normal(ks[8], (DIM_SIM,), jnp.float32)
    p['gru2_w_ih'] = s * jax.random.normal(ks[9], (3 * DIM_GRU2, DIM_SIM), jnp.float32)
    p['gru2_w_hh'] = s * jax.random.normal(ks[10], (3 * DIM_GRU2, DIM_GRU2), jnp.float32)
    p['gru2_b_ih'] = s * jax.random.normal(ks[11], (3 * DIM_GRU2,), jnp.float32)
    p['gru2_b_hh'] = s * jax.random.normal(ks[12], (3 * DIM_GRU2,), jnp.float32)
    p['gru_lin_w'] = s * jax.random.normal(ks[13], (N_LABEL, DIM_GRU2), jnp.float32)
    p['gru_lin_b'] = s * jax.random.normal(ks[14], (N_LABEL,), jnp.float32)
    return p


def pack_params(p):
    kp = {}
    kp['embedding'] = p['embedding']
    # Gate-fused (r|z|n), transposed GRU weights for lane-wide matmuls.
    kp['wih1'] = jnp.transpose(p['gru1_w_ih'])                      # (E, 3H1)
    kp['whh1'] = jnp.transpose(p['gru1_w_hh'])                      # (H1, 3H1)
    kp['bih1'] = p['gru1_b_ih'].reshape(1, 3 * DIM_GRU1)
    kp['bhh1'] = p['gru1_b_hh'].reshape(1, 3 * DIM_GRU1)
    kp['A'] = p['lin_transform']
    # Banded conv matrix: conv_k[s*L + p, j*OC + oc] = W[oc, ic, ki, p - j],
    # with s = ic*3 + ki and 0 <= p - j < 3 (zero elsewhere).
    w = np.asarray(p['conv_w'])                                     # (OC, IC, 3, 3)
    big_k = np.zeros((N_IN_CH * MAGIC_3, SENT_LEN, CONV_OUT, N_FMAP), np.float32)
    for ic in range(N_IN_CH):
        for ki in range(MAGIC_3):
            s_idx = ic * MAGIC_3 + ki
            for kj in range(MAGIC_3):
                for j in range(CONV_OUT):
                    big_k[s_idx, j + kj, j, :] = w[:, ic, ki, kj]
    kp['conv_k'] = jnp.asarray(big_k.reshape(K_DIM, Q_DIM))
    kp['conv_b48'] = jnp.asarray(
        np.tile(np.asarray(p['conv_b']), CONV_OUT).reshape(1, Q_DIM))
    # cnn linear: transpose to (in, out) and permute rows from torch's (oc, pi, pj)
    # flatten order to the kernel's lane-dense (pi, pj, oc) feature order.
    perm = np.array([(oc * POOL_OUT + pi) * POOL_OUT + pj
                     for pi in range(POOL_OUT)
                     for pj in range(POOL_OUT)
                     for oc in range(N_FMAP)], np.int32)
    kp['cnn_w'] = jnp.transpose(p['cnn_lin_w'])[perm, :]            # (CNN_FEAT, DIM_SIM)
    kp['cnn_b'] = p['cnn_lin_b'].reshape(1, DIM_SIM)
    kp['wih2'] = jnp.transpose(p['gru2_w_ih'])                      # (DIM_SIM, 3H2)
    kp['whh2'] = jnp.transpose(p['gru2_w_hh'])                      # (H2, 3H2)
    kp['bih2'] = p['gru2_b_ih'].reshape(1, 3 * DIM_GRU2)
    kp['bhh2'] = p['gru2_b_hh'].reshape(1, 3 * DIM_GRU2)
    kp['glin_w'] = jnp.transpose(p['gru_lin_w'])                    # (H2, N_LABEL)
    kp['glin_b'] = p['gru_lin_b'].reshape(1, N_LABEL)
    return kp


# --------------------------------------------------------------------------
# Full forward pass (mirrors SMNModel.forward)
#   list_history: (U, B, L) int32 ids, response: (B, L) int32 ids
#   returns logits (B, N_LABEL)
# --------------------------------------------------------------------------
@jax.jit
def smn_forward(kp, list_history, response):
    emb = kp['embedding']
    U, B, L = list_history.shape
    # Embedding lookup (gather) stays in XLA; everything downstream is one fused
    # Pallas kernel kept fully VMEM-resident.
    vec_word_hist = jnp.take(emb, list_history, axis=0)             # (U, B, L, E)
    vec_word_resp = jnp.take(emb, response, axis=0)                 # (B, L, E)

    x_bm = jnp.concatenate(
        [vec_word_resp, vec_word_hist.reshape(U * B, L, DIM_EMB)], axis=0)      # (N, L, E)
    n_total = x_bm.shape[0]
    x_tm2d = jnp.transpose(x_bm, (1, 0, 2)).reshape(L * n_total, DIM_EMB)       # (L*N, E)

    return smn_fused_call(x_tm2d, x_bm, kp, U, B)


if __name__ == "__main__":
    key = jax.random.PRNGKey(0)
    pkey, hkey, rkey = jax.random.split(key, 3)
    params = init_params(pkey)
    kp = pack_params(params)

    U, B = 3, 2
    list_history = jax.random.randint(hkey, (U, B, SENT_LEN), 0, N_DICT, dtype=jnp.int32)
    response = jax.random.randint(rkey, (B, SENT_LEN), 0, N_DICT, dtype=jnp.int32)

    logits = smn_forward(kp, list_history, response)
    logits = jax.block_until_ready(logits)
    assert logits.shape == (B, N_LABEL), logits.shape
    assert bool(jnp.all(jnp.isfinite(logits)))
    print("KERNEL_OK")
</pallas_src>

<mosaic_0001>
module attributes {stable_mosaic.version = 11 : i64} {
  func.func @kernel(%arg0: i32, %arg1: memref<64x32xf32, #tpu.memory_space<vmem>>, %arg2: memref<8x8x32xf32, #tpu.memory_space<vmem>>, %arg3: memref<32x96xf32, #tpu.memory_space<vmem>>, %arg4: memref<32x96xf32, #tpu.memory_space<vmem>>, %arg5: memref<1x96xf32, #tpu.memory_space<vmem>>, %arg6: memref<1x96xf32, #tpu.memory_space<vmem>>, %arg7: memref<32x32xf32, #tpu.memory_space<vmem>>, %arg8: memref<48x48xf32, #tpu.memory_space<vmem>>, %arg9: memref<1x48xf32, #tpu.memory_space<vmem>>, %arg10: memref<32x16xf32, #tpu.memory_space<vmem>>, %arg11: memref<1x16xf32, #tpu.memory_space<vmem>>, %arg12: memref<16x48xf32, #tpu.memory_space<vmem>>, %arg13: memref<16x48xf32, #tpu.memory_space<vmem>>, %arg14: memref<1x48xf32, #tpu.memory_space<vmem>>, %arg15: memref<1x48xf32, #tpu.memory_space<vmem>>, %arg16: memref<16x2xf32, #tpu.memory_space<vmem>>, %arg17: memref<1x2xf32, #tpu.memory_space<vmem>>, %arg18: memref<2x2xf32, #tpu.memory_space<vmem>>, %arg19: memref<8x8x32xf32, #tpu.memory_space<vmem>>) attributes {dimension_semantics = [#tpu.dimension_semantics<arbitrary>], iteration_bounds = array<i64: 1>, scalar_prefetch = 0 : i64, scratch_operands = 1 : i64, tpu.core_type = #tpu.core_type<tc>, window_params = [{pipeline_mode = #tpu.pipeline_mode<synchronous>, transform_indices = @transform_0, window_bounds = array<i64: 64, 32>}, {pipeline_mode = #tpu.pipeline_mode<synchronous>, transform_indices = @transform_1, window_bounds = array<i64: 8, 8, 32>}, {pipeline_mode = #tpu.pipeline_mode<synchronous>, transform_indices = @transform_2, window_bounds = array<i64: 32, 96>}, {pipeline_mode = #tpu.pipeline_mode<synchronous>, transform_indices = @transform_3, window_bounds = array<i64: 32, 96>}, {pipeline_mode = #tpu.pipeline_mode<synchronous>, transform_indices = @transform_4, window_bounds = array<i64: 1, 96>}, {pipeline_mode = #tpu.pipeline_mode<synchronous>, transform_indices = @transform_5, window_bounds = array<i64: 1, 96>}, {pipeline_mode = #tpu.pipeline_mode<synchronous>, transform_indices = @transform_6, window_bounds = array<i64: 32, 32>}, {pipeline_mode = #tpu.pipeline_mode<synchronous>, transform_indices = @transform_7, window_bounds = array<i64: 48, 48>}, {pipeline_mode = #tpu.pipeline_mode<synchronous>, transform_indices = @transform_8, window_bounds = array<i64: 1, 48>}, {pipeline_mode = #tpu.pipeline_mode<synchronous>, transform_indices = @transform_9, window_bounds = array<i64: 32, 16>}, {pipeline_mode = #tpu.pipeline_mode<synchronous>, transform_indices = @transform_10, window_bounds = array<i64: 1, 16>}, {pipeline_mode = #tpu.pipeline_mode<synchronous>, transform_indices = @transform_11, window_bounds = array<i64: 16, 48>}, {pipeline_mode = #tpu.pipeline_mode<synchronous>, transform_indices = @transform_12, window_bounds = array<i64: 16, 48>}, {pipeline_mode = #tpu.pipeline_mode<synchronous>, transform_indices = @transform_13, window_bounds = array<i64: 1, 48>}, {pipeline_mode = #tpu.pipeline_mode<synchronous>, transform_indices = @transform_14, window_bounds = array<i64: 1, 48>}, {pipeline_mode = #tpu.pipeline_mode<synchronous>, transform_indices = @transform_15, window_bounds = array<i64: 16, 2>}, {pipeline_mode = #tpu.pipeline_mode<synchronous>, transform_indices = @transform_16, window_bounds = array<i64: 1, 2>}, {pipeline_mode = #tpu.pipeline_mode<synchronous>, transform_indices = @transform_17, window_bounds = array<i64: 2, 2>}]} {
    %c0 = arith.constant 0 : index
    %c0_0 = arith.constant 0 : index
    %0 = vector.load %arg1[%c0, %c0_0] : memref<64x32xf32, #tpu.memory_space<vmem>>, vector<64x32xf32>
    %c0_1 = arith.constant 0 : index
    %c0_2 = arith.constant 0 : index
    %1 = vector.load %arg3[%c0_1, %c0_2] : memref<32x96xf32, #tpu.memory_space<vmem>>, vector<32x96xf32>
    %cst = arith.constant dense<0.000000e+00> : vector<64x96xf32>
    %2 = tpu.matmul %0, %1, %cst {dimension_numbers = #tpu.dot_dimension_numbers<[1], [0], [0], [1], [0, 0, 1, 1], [], []>} : vector<64x32xf32>, vector<32x96xf32>, vector<64x96xf32> -> vector<64x96xf32>
    %c0_3 = arith.constant 0 : index
    %c0_4 = arith.constant 0 : index
    %3 = vector.load %arg5[%c0_3, %c0_4] : memref<1x96xf32, #tpu.memory_space<vmem>>, vector<1x96xf32>
    %4 = vector.broadcast %3 : vector<1x96xf32> to vector<64x96xf32>
    %5 = arith.addf %2, %4 : vector<64x96xf32>
    %c0_5 = arith.constant 0 : index
    %c0_6 = arith.constant 0 : index
    %6 = vector.load %arg4[%c0_5, %c0_6] : memref<32x96xf32, #tpu.memory_space<vmem>>, vector<32x96xf32>
    %c0_7 = arith.constant 0 : index
    %c0_8 = arith.constant 0 : index
    %7 = vector.load %arg6[%c0_7, %c0_8] : memref<1x96xf32, #tpu.memory_space<vmem>>, vector<1x96xf32>
    %cst_9 = arith.constant 0.000000e+00 : f32
    %8 = vector.broadcast %cst_9 : f32 to vector<8x32xf32>
    %9 = vector.extract_strided_slice %5 {offsets = [0, 0], sizes = [8, 96], strides = [1, 1]} : vector<64x96xf32> to vector<8x96xf32>
    %cst_10 = arith.constant dense<0.000000e+00> : vector<8x96xf32>
    %10 = tpu.matmul %8, %6, %cst_10 {dimension_numbers = #tpu.dot_dimension_numbers<[1], [0], [0], [1], [0, 0, 1, 1], [], []>} : vector<8x32xf32>, vector<32x96xf32>, vector<8x96xf32> -> vector<8x96xf32>
    %11 = vector.broadcast %7 : vector<1x96xf32> to vector<8x96xf32>
    %12 = arith.addf %10, %11 : vector<8x96xf32>
    %13 = vector.extract_strided_slice %9 {offsets = [0, 0], sizes = [8, 32], strides = [1, 1]} : vector<8x96xf32> to vector<8x32xf32>
    %14 = vector.extract_strided_slice %12 {offsets = [0, 0], sizes = [8, 32], strides = [1, 1]} : vector<8x96xf32> to vector<8x32xf32>
    %15 = arith.addf %13, %14 : vector<8x32xf32>
    %cst_11 = arith.constant 0.000000e+00 : f32
    %16 = vector.broadcast %cst_11 : f32 to vector<8x32xf32>
    %17 = arith.subf %16, %15 : vector<8x32xf32>
    %18 = math.exp %17 : vector<8x32xf32>
    %cst_12 = arith.constant 1.000000e+00 : f32
    %19 = vector.broadcast %cst_12 : f32 to vector<8x32xf32>
    %20 = arith.addf %19, %18 : vector<8x32xf32>
    %cst_13 = arith.constant 1.000000e+00 : f32
    %21 = vector.broadcast %cst_13 : f32 to vector<8x32xf32>
    %22 = arith.divf %21, %20 : vector<8x32xf32>
    %23 = vector.extract_strided_slice %9 {offsets = [0, 32], sizes = [8, 32], strides = [1, 1]} : vector<8x96xf32> to vector<8x32xf32>
    %24 = vector.extract_strided_slice %12 {offsets = [0, 32], sizes = [8, 32], strides = [1, 1]} : vector<8x96xf32> to vector<8x32xf32>
    %25 = arith.addf %23, %24 : vector<8x32xf32>
    %cst_14 = arith.constant 0.000000e+00 : f32
    %26 = vector.broadcast %cst_14 : f32 to vector<8x32xf32>
    %27 = arith.subf %26, %25 : vector<8x32xf32>
    %28 = math.exp %27 : vector<8x32xf32>
    %cst_15 = arith.constant 1.000000e+00 : f32
    %29 = vector.broadcast %cst_15 : f32 to vector<8x32xf32>
    %30 = arith.addf %29, %28 : vector<8x32xf32>
    %cst_16 = arith.constant 1.000000e+00 : f32
    %31 = vector.broadcast %cst_16 : f32 to vector<8x32xf32>
    %32 = arith.divf %31, %30 : vector<8x32xf32>
    %33 = vector.extract_strided_slice %9 {offsets = [0, 64], sizes = [8, 32], strides = [1, 1]} : vector<8x96xf32> to vector<8x32xf32>
    %34 = vector.extract_strided_slice %12 {offsets = [0, 64], sizes = [8, 32], strides = [1, 1]} : vector<8x96xf32> to vector<8x32xf32>
    %35 = arith.mulf %22, %34 : vector<8x32xf32>
    %36 = arith.addf %33, %35 : vector<8x32xf32>
    %37 = math.tanh %36 : vector<8x32xf32>
    %cst_17 = arith.constant 1.000000e+00 : f32
    %38 = vector.broadcast %cst_17 : f32 to vector<8x32xf32>
    %39 = arith.subf %38, %32 : vector<8x32xf32>
    %40 = arith.mulf %39, %37 : vector<8x32xf32>
    %41 = arith.mulf %32, %8 : vector<8x32xf32>
    %42 = arith.addf %40, %41 : vector<8x32xf32>
    %43 = vector.shape_cast %42 : vector<8x32xf32> to vector<8x1x32xf32>
    %c0_18 = arith.constant 0 : index
    %c0_19 = arith.constant 0 : index
    %c0_20 = arith.constant 0 : index
    %44 = vector.load %arg19[%c0_18, %c0_19, %c0_20] : memref<8x8x32xf32, #tpu.memory_space<vmem>>, vector<8x1x32xf32>
    tpu.vector_store %arg19[%c0_18, %c0_19, %c0_20], %43 {strides = array<i32>} : memref<8x8x32xf32, #tpu.memory_space<vmem>>, vector<8x1x32xf32>,
    %45 = vector.extract_strided_slice %5 {offsets = [8, 0], sizes = [8, 96], strides = [1, 1]} : vector<64x96xf32> to vector<8x96xf32>
    %cst_21 = arith.constant dense<0.000000e+00> : vector<8x96xf32>
    %46 = tpu.matmul %42, %6, %cst_21 {dimension_numbers = #tpu.dot_dimension_numbers<[1], [0], [0], [1], [0, 0, 1, 1], [], []>} : vector<8x32xf32>, vector<32x96xf32>, vector<8x96xf32> -> vector<8x96xf32>
    %47 = vector.broadcast %7 : vector<1x96xf32> to vector<8x96xf32>
    %48 = arith.addf %46, %47 : vector<8x96xf32>
    %49 = vector.extract_strided_slice %45 {offsets = [0, 0], sizes = [8, 32], strides = [1, 1]} : vector<8x96xf32> to vector<8x32xf32>
    %50 = vector.extract_strided_slice %48 {offsets = [0, 0], sizes = [8, 32], strides = [1, 1]} : vector<8x96xf32> to vector<8x32xf32>
    %51 = arith.addf %49, %50 : vector<8x32xf32>
    %cst_22 = arith.constant 0.000000e+00 : f32
    %52 = vector.broadcast %cst_22 : f32 to vector<8x32xf32>
    %53 = arith.subf %52, %51 : vector<8x32xf32>
    %54 = math.exp %53 : vector<8x32xf32>
    %cst_23 = arith.constant 1.000000e+00 : f32
    %55 = vector.broadcast %cst_23 : f32 to vector<8x32xf32>
    %56 = arith.addf %55, %54 : vector<8x32xf32>
    %cst_24 = arith.constant 1.000000e+00 : f32
    %57 = vector.broadcast %cst_24 : f32 to vector<8x32xf32>
    %58 = arith.divf %57, %56 : vector<8x32xf32>
    %59 = vector.extract_strided_slice %45 {offsets = [0, 32], sizes = [8, 32], strides = [1, 1]} : vector<8x96xf32> to vector<8x32xf32>
    %60 = vector.extract_strided_slice %48 {offsets = [0, 32], sizes = [8, 32], strides = [1, 1]} : vector<8x96xf32> to vector<8x32xf32>
    %61 = arith.addf %59, %60 : vector<8x32xf32>
    %cst_25 = arith.constant 0.000000e+00 : f32
    %62 = vector.broadcast %cst_25 : f32 to vector<8x32xf32>
    %63 = arith.subf %62, %61 : vector<8x32xf32>
    %64 = math.exp %63 : vector<8x32xf32>
    %cst_26 = arith.constant 1.000000e+00 : f32
    %65 = vector.broadcast %cst_26 : f32 to vector<8x32xf32>
    %66 = arith.addf %65, %64 : vector<8x32xf32>
    %cst_27 = arith.constant 1.000000e+00 : f32
    %67 = vector.broadcast %cst_27 : f32 to vector<8x32xf32>
    %68 = arith.divf %67, %66 : vector<8x32xf32>
    %69 = vector.extract_strided_slice %45 {offsets = [0, 64], sizes = [8, 32], strides = [1, 1]} : vector<8x96xf32> to vector<8x32xf32>
    %70 = vector.extract_strided_slice %48 {offsets = [0, 64], sizes = [8, 32], strides = [1, 1]} : vector<8x96xf32> to vector<8x32xf32>
    %71 = arith.mulf %58, %70 : vector<8x32xf32>
    %72 = arith.addf %69, %71 : vector<8x32xf32>
    %73 = math.tanh %72 : vector<8x32xf32>
    %cst_28 = arith.constant 1.000000e+00 : f32
    %74 = vector.broadcast %cst_28 : f32 to vector<8x32xf32>
    %75 = arith.subf %74, %68 : vector<8x32xf32>
    %76 = arith.mulf %75, %73 : vector<8x32xf32>
    %77 = arith.mulf %68, %42 : vector<8x32xf32>
    %78 = arith.addf %76, %77 : vector<8x32xf32>
    %79 = vector.shape_cast %78 : vector<8x32xf32> to vector<8x1x32xf32>
    %c0_29 = arith.constant 0 : index
    %c1 = arith.constant 1 : index
    %c0_30 = arith.constant 0 : index
    %80 = vector.load %arg19[%c0_29, %c1, %c0_30] : memref<8x8x32xf32, #tpu.memory_space<vmem>>, vector<8x1x32xf32>
    tpu.vector_store %arg19[%c0_29, %c1, %c0_30], %79 {strides = array<i32>} : memref<8x8x32xf32, #tpu.memory_space<vmem>>, vector<8x1x32xf32>,
    %81 = vector.extract_strided_slice %5 {offsets = [16, 0], sizes = [8, 96], strides = [1, 1]} : vector<64x96xf32> to vector<8x96xf32>
    %cst_31 = arith.constant dense<0.000000e+00> : vector<8x96xf32>
    %82 = tpu.matmul %78, %6, %cst_31 {dimension_numbers = #tpu.dot_dimension_numbers<[1], [0], [0], [1], [0, 0, 1, 1], [], []>} : vector<8x32xf32>, vector<32x96xf32>, vector<8x96xf32> -> vector<8x96xf32>
    %83 = vector.broadcast %7 : vector<1x96xf32> to vector<8x96xf32>
    %84 = arith.addf %82, %83 : vector<8x96xf32>
    %85 = vector.extract_strided_slice %81 {offsets = [0, 0], sizes = [8, 32], strides = [1, 1]} : vector<8x96xf32> to vector<8x32xf32>
    %86 = vector.extract_strided_slice %84 {offsets = [0, 0], sizes = [8, 32], strides = [1, 1]} : vector<8x96xf32> to vector<8x32xf32>
    %87 = arith.addf %85, %86 : vector<8x32xf32>
    %cst_32 = arith.constant 0.000000e+00 : f32
    %88 = vector.broadcast %cst_32 : f32 to vector<8x32xf32>
    %89 = arith.subf %88, %87 : vector<8x32xf32>
    %90 = math.exp %89 : vector<8x32xf32>
    %cst_33 = arith.constant 1.000000e+00 : f32
    %91 = vector.broadcast %cst_33 : f32 to vector<8x32xf32>
    %92 = arith.addf %91, %90 : vector<8x32xf32>
    %cst_34 = arith.constant 1.000000e+00 : f32
    %93 = vector.broadcast %cst_34 : f32 to vector<8x32xf32>
    %94 = arith.divf %93, %92 : vector<8x32xf32>
    %95 = vector.extract_strided_slice %81 {offsets = [0, 32], sizes = [8, 32], strides = [1, 1]} : vector<8x96xf32> to vector<8x32xf32>
    %96 = vector.extract_strided_slice %84 {offsets = [0, 32], sizes = [8, 32], strides = [1, 1]} : vector<8x96xf32> to vector<8x32xf32>
    %97 = arith.addf %95, %96 : vector<8x32xf32>
    %cst_35 = arith.constant 0.000000e+00 : f32
    %98 = vector.broadcast %cst_35 : f32 to vector<8x32xf32>
    %99 = arith.subf %98, %97 : vector<8x32xf32>
    %100 = math.exp %99 : vector<8x32xf32>
    %cst_36 = arith.constant 1.000000e+00 : f32
    %101 = vector.broadcast %cst_36 : f32 to vector<8x32xf32>
    %102 = arith.addf %101, %100 : vector<8x32xf32>
    %cst_37 = arith.constant 1.000000e+00 : f32
    %103 = vector.broadcast %cst_37 : f32 to vector<8x32xf32>
    %104 = arith.divf %103, %102 : vector<8x32xf32>
    %105 = vector.extract_strided_slice %81 {offsets = [0, 64], sizes = [8, 32], strides = [1, 1]} : vector<8x96xf32> to vector<8x32xf32>
    %106 = vector.extract_strided_slice %84 {offsets = [0, 64], sizes = [8, 32], strides = [1, 1]} : vector<8x96xf32> to vector<8x32xf32>
    %107 = arith.mulf %94, %106 : vector<8x32xf32>
    %108 = arith.addf %105, %107 : vector<8x32xf32>
    %109 = math.tanh %108 : vector<8x32xf32>
    %cst_38 = arith.constant 1.000000e+00 : f32
    %110 = vector.broadcast %cst_38 : f32 to vector<8x32xf32>
    %111 = arith.subf %110, %104 : vector<8x32xf32>
    %112 = arith.mulf %111, %109 : vector<8x32xf32>
    %113 = arith.mulf %104, %78 : vector<8x32xf32>
    %114 = arith.addf %112, %113 : vector<8x32xf32>
    %115 = vector.shape_cast %114 : vector<8x32xf32> to vector<8x1x32xf32>
    %c0_39 = arith.constant 0 : index
    %c2 = arith.constant 2 : index
    %c0_40 = arith.constant 0 : index
    %116 = vector.load %arg19[%c0_39, %c2, %c0_40] : memref<8x8x32xf32, #tpu.memory_space<vmem>>, vector<8x1x32xf32>
    tpu.vector_store %arg19[%c0_39, %c2, %c0_40], %115 {strides = array<i32>} : memref<8x8x32xf32, #tpu.memory_space<vmem>>, vector<8x1x32xf32>,
    %117 = vector.extract_strided_slice %5 {offsets = [24, 0], sizes = [8, 96], strides = [1, 1]} : vector<64x96xf32> to vector<8x96xf32>
    %cst_41 = arith.constant dense<0.000000e+00> : vector<8x96xf32>
    %118 = tpu.matmul %114, %6, %cst_41 {dimension_numbers = #tpu.dot_dimension_numbers<[1], [0], [0], [1], [0, 0, 1, 1], [], []>} : vector<8x32xf32>, vector<32x96xf32>, vector<8x96xf32> -> vector<8x96xf32>
    %119 = vector.broadcast %7 : vector<1x96xf32> to vector<8x96xf32>
    %120 = arith.addf %118, %119 : vector<8x96xf32>
    %121 = vector.extract_strided_slice %117 {offsets = [0, 0], sizes = [8, 32], strides = [1, 1]} : vector<8x96xf32> to vector<8x32xf32>
    %122 = vector.extract_strided_slice %120 {offsets = [0, 0], sizes = [8, 32], strides = [1, 1]} : vector<8x96xf32> to vector<8x32xf32>
    %123 = arith.addf %121, %122 : vector<8x32xf32>
    %cst_42 = arith.constant 0.000000e+00 : f32
    %124 = vector.broadcast %cst_42 : f32 to vector<8x32xf32>
    %125 = arith.subf %124, %123 : vector<8x32xf32>
    %126 = math.exp %125 : vector<8x32xf32>
    %cst_43 = arith.constant 1.000000e+00 : f32
    %127 = vector.broadcast %cst_43 : f32 to vector<8x32xf32>
    %128 = arith.addf %127, %126 : vector<8x32xf32>
    %cst_44 = arith.constant 1.000000e+00 : f32
    %129 = vector.broadcast %cst_44 : f32 to vector<8x32xf32>
    %130 = arith.divf %129, %128 : vector<8x32xf32>
    %131 = vector.extract_strided_slice %117 {offsets = [0, 32], sizes = [8, 32], strides = [1, 1]} : vector<8x96xf32> to vector<8x32xf32>
    %132 = vector.extract_strided_slice %120 {offsets = [0, 32], sizes = [8, 32], strides = [1, 1]} : vector<8x96xf32> to vector<8x32xf32>
    %133 = arith.addf %131, %132 : vector<8x32xf32>
    %cst_45 = arith.constant 0.000000e+00 : f32
    %134 = vector.broadcast %cst_45 : f32 to vector<8x32xf32>
    %135 = arith.subf %134, %133 : vector<8x32xf32>
    %136 = math.exp %135 : vector<8x32xf32>
    %cst_46 = arith.constant 1.000000e+00 : f32
    %137 = vector.broadcast %cst_46 : f32 to vector<8x32xf32>
    %138 = arith.addf %137, %136 : vector<8x32xf32>
    %cst_47 = arith.constant 1.000000e+00 : f32
    %139 = vector.broadcast %cst_47 : f32 to vector<8x32xf32>
    %140 = arith.divf %139, %138 : vector<8x32xf32>
    %141 = vector.extract_strided_slice %117 {offsets = [0, 64], sizes = [8, 32], strides = [1, 1]} : vector<8x96xf32> to vector<8x32xf32>
    %142 = vector.extract_strided_slice %120 {offsets = [0, 64], sizes = [8, 32], strides = [1, 1]} : vector<8x96xf32> to vector<8x32xf32>
    %143 = arith.mulf %130, %142 : vector<8x32xf32>
    %144 = arith.addf %141, %143 : vector<8x32xf32>
    %145 = math.tanh %144 : vector<8x32xf32>
    %cst_48 = arith.constant 1.000000e+00 : f32
    %146 = vector.broadcast %cst_48 : f32 to vector<8x32xf32>
    %147 = arith.subf %146, %140 : vector<8x32xf32>
    %148 = arith.mulf %147, %145 : vector<8x32xf32>
    %149 = arith.mulf %140, %114 : vector<8x32xf32>
    %150 = arith.addf %148, %149 : vector<8x32xf32>
    %151 = vector.shape_cast %150 : vector<8x32xf32> to vector<8x1x32xf32>
    %c0_49 = arith.constant 0 : index
    %c3 = arith.constant 3 : index
    %c0_50 = arith.constant 0 : index
    %152 = vector.load %arg19[%c0_49, %c3, %c0_50] : memref<8x8x32xf32, #tpu.memory_space<vmem>>, vector<8x1x32xf32>
    tpu.vector_store %arg19[%c0_49, %c3, %c0_50], %151 {strides = array<i32>} : memref<8x8x32xf32, #tpu.memory_space<vmem>>, vector<8x1x32xf32>,
    %153 = vector.extract_strided_slice %5 {offsets = [32, 0], sizes = [8, 96], strides = [1, 1]} : vector<64x96xf32> to vector<8x96xf32>
    %cst_51 = arith.constant dense<0.000000e+00> : vector<8x96xf32>
    %154 = tpu.matmul %150, %6, %cst_51 {dimension_numbers = #tpu.dot_dimension_numbers<[1], [0], [0], [1], [0, 0, 1, 1], [], []>} : vector<8x32xf32>, vector<32x96xf32>, vector<8x96xf32> -> vector<8x96xf32>
    %155 = vector.broadcast %7 : vector<1x96xf32> to vector<8x96xf32>
    %156 = arith.addf %154, %155 : vector<8x96xf32>
    %157 = vector.extract_strided_slice %153 {offsets = [0, 0], sizes = [8, 32], strides = [1, 1]} : vector<8x96xf32> to vector<8x32xf32>
    %158 = vector.extract_strided_slice %156 {offsets = [0, 0], sizes = [8, 32], strides = [1, 1]} : vector<8x96xf32> to vector<8x32xf32>
    %159 = arith.addf %157, %158 : vector<8x32xf32>
    %cst_52 = arith.constant 0.000000e+00 : f32
    %160 = vector.broadcast %cst_52 : f32 to vector<8x32xf32>
    %161 = arith.subf %160, %159 : vector<8x32xf32>
    %162 = math.exp %161 : vector<8x32xf32>
    %cst_53 = arith.constant 1.000000e+00 : f32
    %163 = vector.broadcast %cst_53 : f32 to vector<8x32xf32>
    %164 = arith.addf %163, %162 : vector<8x32xf32>
    %cst_54 = arith.constant 1.000000e+00 : f32
    %165 = vector.broadcast %cst_54 : f32 to vector<8x32xf32>
    %166 = arith.divf %165, %164 : vector<8x32xf32>
    %167 = vector.extract_strided_slice %153 {offsets = [0, 32], sizes = [8, 32], strides = [1, 1]} : vector<8x96xf32> to vector<8x32xf32>
    %168 = vector.extract_strided_slice %156 {offsets = [0, 32], sizes = [8, 32], strides = [1, 1]} : vector<8x96xf32> to vector<8x32xf32>
    %169 = arith.addf %167, %168 : vector<8x32xf32>
    %cst_55 = arith.constant 0.000000e+00 : f32
    %170 = vector.broadcast %cst_55 : f32 to vector<8x32xf32>
    %171 = arith.subf %170, %169 : vector<8x32xf32>
    %172 = math.exp %171 : vector<8x32xf32>
    %cst_56 = arith.constant 1.000000e+00 : f32
    %173 = vector.broadcast %cst_56 : f32 to vector<8x32xf32>
    %174 = arith.addf %173, %172 : vector<8x32xf32>
    %cst_57 = arith.constant 1.000000e+00 : f32
    %175 = vector.broadcast %cst_57 : f32 to vector<8x32xf32>
    %176 = arith.divf %175, %174 : vector<8x32xf32>
    %177 = vector.extract_strided_slice %153 {offsets = [0, 64], sizes = [8, 32], strides = [1, 1]} : vector<8x96xf32> to vector<8x32xf32>
    %178 = vector.extract_strided_slice %156 {offsets = [0, 64], sizes = [8, 32], strides = [1, 1]} : vector<8x96xf32> to vector<8x32xf32>
    %179 = arith.mulf %166, %178 : vector<8x32xf32>
    %180 = arith.addf %177, %179 : vector<8x32xf32>
    %181 = math.tanh %180 : vector<8x32xf32>
    %cst_58 = arith.constant 1.000000e+00 : f32
    %182 = vector.broadcast %cst_58 : f32 to vector<8x32xf32>
    %183 = arith.subf %182, %176 : vector<8x32xf32>
    %184 = arith.mulf %183, %181 : vector<8x32xf32>
    %185 = arith.mulf %176, %150 : vector<8x32xf32>
    %186 = arith.addf %184, %185 : vector<8x32xf32>
    %187 = vector.shape_cast %186 : vector<8x32xf32> to vector<8x1x32xf32>
    %c0_59 = arith.constant 0 : index
    %c4 = arith.constant 4 : index
    %c0_60 = arith.constant 0 : index
    %188 = vector.load %arg19[%c0_59, %c4, %c0_60] : memref<8x8x32xf32, #tpu.memory_space<vmem>>, vector<8x1x32xf32>
    tpu.vector_store %arg19[%c0_59, %c4, %c0_60], %187 {strides = array<i32>} : memref<8x8x32xf32, #tpu.memory_space<vmem>>, vector<8x1x32xf32>,
    %189 = vector.extract_strided_slice %5 {offsets = [40, 0], sizes = [8, 96], strides = [1, 1]} : vector<64x96xf32> to vector<8x96xf32>
    %cst_61 = arith.constant dense<0.000000e+00> : vector<8x96xf32>
    %190 = tpu.matmul %186, %6, %cst_61 {dimension_numbers = #tpu.dot_dimension_numbers<[1], [0], [0], [1], [0, 0, 1, 1], [], []>} : vector<8x32xf32>, vector<32x96xf32>, vector<8x96xf32> -> vector<8x96xf32>
    %191 = vector.broadcast %7 : vector<1x96xf32> to vector<8x96xf32>
    %192 = arith.addf %190, %191 : vector<8x96xf32>
    %193 = vector.extract_strided_slice %189 {offsets = [0, 0], sizes = [8, 32], strides = [1, 1]} : vector<8x96xf32> to vector<8x32xf32>
    %194 = vector.extract_strided_slice %192 {offsets = [0, 0], sizes = [8, 32], strides = [1, 1]} : vector<8x96xf32> to vector<8x32xf32>
    %195 = arith.addf %193, %194 : vector<8x32xf32>
    %cst_62 = arith.constant 0.000000e+00 : f32
    %196 = vector.broadcast %cst_62 : f32 to vector<8x32xf32>
    %197 = arith.subf %196, %195 : vector<8x32xf32>
    %198 = math.exp %197 : vector<8x32xf32>
    %cst_63 = arith.constant 1.000000e+00 : f32
    %199 = vector.broadcast %cst_63 : f32 to vector<8x32xf32>
    %200 = arith.addf %199, %198 : vector<8x32xf32>
    %cst_64 = arith.constant 1.000000e+00 : f32
    %201 = vector.broadcast %cst_64 : f32 to vector<8x32xf32>
    %202 = arith.divf %201, %200 : vector<8x32xf32>
    %203 = vector.extract_strided_slice %189 {offsets = [0, 32], sizes = [8, 32], strides = [1, 1]} : vector<8x96xf32> to vector<8x32xf32>
    %204 = vector.extract_strided_slice %192 {offsets = [0, 32], sizes = [8, 32], strides = [1, 1]} : vector<8x96xf32> to vector<8x32xf32>
    %205 = arith.addf %203, %204 : vector<8x32xf32>
    %cst_65 = arith.constant 0.000000e+00 : f32
    %206 = vector.broadcast %cst_65 : f32 to vector<8x32xf32>
    %207 = arith.subf %206, %205 : vector<8x32xf32>
    %208 = math.exp %207 : vector<8x32xf32>
    %cst_66 = arith.constant 1.000000e+00 : f32
    %209 = vector.broadcast %cst_66 : f32 to vector<8x32xf32>
    %210 = arith.addf %209, %208 : vector<8x32xf32>
    %cst_67 = arith.constant 1.000000e+00 : f32
    %211 = vector.broadcast %cst_67 : f32 to vector<8x32xf32>
    %212 = arith.divf %211, %210 : vector<8x32xf32>
    %213 = vector.extract_strided_slice %189 {offsets = [0, 64], sizes = [8, 32], strides = [1, 1]} : vector<8x96xf32> to vector<8x32xf32>
    %214 = vector.extract_strided_slice %192 {offsets = [0, 64], sizes = [8, 32], strides = [1, 1]} : vector<8x96xf32> to vector<8x32xf32>
    %215 = arith.mulf %202, %214 : vector<8x32xf32>
    %216 = arith.addf %213, %215 : vector<8x32xf32>
    %217 = math.tanh %216 : vector<8x32xf32>
    %cst_68 = arith.constant 1.000000e+00 : f32
    %218 = vector.broadcast %cst_68 : f32 to vector<8x32xf32>
    %219 = arith.subf %218, %212 : vector<8x32xf32>
    %220 = arith.mulf %219, %217 : vector<8x32xf32>
    %221 = arith.mulf %212, %186 : vector<8x32xf32>
    %222 = arith.addf %220, %221 : vector<8x32xf32>
    %223 = vector.shape_cast %222 : vector<8x32xf32> to vector<8x1x32xf32>
    %c0_69 = arith.constant 0 : index
    %c5 = arith.constant 5 : index
    %c0_70 = arith.constant 0 : index
    %224 = vector.load %arg19[%c0_69, %c5, %c0_70] : memref<8x8x32xf32, #tpu.memory_space<vmem>>, vector<8x1x32xf32>
    tpu.vector_store %arg19[%c0_69, %c5, %c0_70], %223 {strides = array<i32>} : memref<8x8x32xf32, #tpu.memory_space<vmem>>, vector<8x1x32xf32>,
    %225 = vector.extract_strided_slice %5 {offsets = [48, 0], sizes = [8, 96], strides = [1, 1]} : vector<64x96xf32> to vector<8x96xf32>
    %cst_71 = arith.constant dense<0.000000e+00> : vector<8x96xf32>
    %226 = tpu.matmul %222, %6, %cst_71 {dimension_numbers = #tpu.dot_dimension_numbers<[1], [0], [0], [1], [0, 0, 1, 1], [], []>} : vector<8x32xf32>, vector<32x96xf32>, vector<8x96xf32> -> vector<8x96xf32>
    %227 = vector.broadcast %7 : vector<1x96xf32> to vector<8x96xf32>
    %228 = arith.addf %226, %227 : vector<8x96xf32>
    %229 = vector.extract_strided_slice %225 {offsets = [0, 0], sizes = [8, 32], strides = [1, 1]} : vector<8x96xf32> to vector<8x32xf32>
    %230 = vector.extract_strided_slice %228 {offsets = [0, 0], sizes = [8, 32], strides = [1, 1]} : vector<8x96xf32> to vector<8x32xf32>
    %231 = arith.addf %229, %230 : vector<8x32xf32>
    %cst_72 = arith.constant 0.000000e+00 : f32
    %232 = vector.broadcast %cst_72 : f32 to vector<8x32xf32>
    %233 = arith.subf %232, %231 : vector<8x32xf32>
    %234 = math.exp %233 : vector<8x32xf32>
    %cst_73 = arith.constant 1.000000e+00 : f32
    %235 = vector.broadcast %cst_73 : f32 to vector<8x32xf32>
    %236 = arith.addf %235, %234 : vector<8x32xf32>
    %cst_74 = arith.constant 1.000000e+00 : f32
    %237 = vector.broadcast %cst_74 : f32 to vector<8x32xf32>
    %238 = arith.divf %237, %236 : vector<8x32xf32>
    %239 = vector.extract_strided_slice %225 {offsets = [0, 32], sizes = [8, 32], strides = [1, 1]} : vector<8x96xf32> to vector<8x32xf32>
    %240 = vector.extract_strided_slice %228 {offsets = [0, 32], sizes = [8, 32], strides = [1, 1]} : vector<8x96xf32> to vector<8x32xf32>
    %241 = arith.addf %239, %240 : vector<8x32xf32>
    %cst_75 = arith.constant 0.000000e+00 : f32
    %242 = vector.broadcast %cst_75 : f32 to vector<8x32xf32>
    %243 = arith.subf %242, %241 : vector<8x32xf32>
    %244 = math.exp %243 : vector<8x32xf32>
    %cst_76 = arith.constant 1.000000e+00 : f32
    %245 = vector.broadcast %cst_76 : f32 to vector<8x32xf32>
    %246 = arith.addf %245, %244 : vector<8x32xf32>
    %cst_77 = arith.constant 1.000000e+00 : f32
    %247 = vector.broadcast %cst_77 : f32 to vector<8x32xf32>
    %248 = arith.divf %247, %246 : vector<8x32xf32>
    %249 = vector.extract_strided_slice %225 {offsets = [0, 64], sizes = [8, 32], strides = [1, 1]} : vector<8x96xf32> to vector<8x32xf32>
    %250 = vector.extract_strided_slice %228 {offsets = [0, 64], sizes = [8, 32], strides = [1, 1]} : vector<8x96xf32> to vector<8x32xf32>
    %251 = arith.mulf %238, %250 : vector<8x32xf32>
    %252 = arith.addf %249, %251 : vector<8x32xf32>
    %253 = math.tanh %252 : vector<8x32xf32>
    %cst_78 = arith.constant 1.000000e+00 : f32
    %254 = vector.broadcast %cst_78 : f32 to vector<8x32xf32>
    %255 = arith.subf %254, %248 : vector<8x32xf32>
    %256 = arith.mulf %255, %253 : vector<8x32xf32>
    %257 = arith.mulf %248, %222 : vector<8x32xf32>
    %258 = arith.addf %256, %257 : vector<8x32xf32>
    %259 = vector.shape_cast %258 : vector<8x32xf32> to vector<8x1x32xf32>
    %c0_79 = arith.constant 0 : index
    %c6 = arith.constant 6 : index
    %c0_80 = arith.constant 0 : index
    %260 = vector.load %arg19[%c0_79, %c6, %c0_80] : memref<8x8x32xf32, #tpu.memory_space<vmem>>, vector<8x1x32xf32>
    tpu.vector_store %arg19[%c0_79, %c6, %c0_80], %259 {strides = array<i32>} : memref<8x8x32xf32, #tpu.memory_space<vmem>>, vector<8x1x32xf32>,
    %261 = vector.extract_strided_slice %5 {offsets = [56, 0], sizes = [8, 96], strides = [1, 1]} : vector<64x96xf32> to vector<8x96xf32>
    %cst_81 = arith.constant dense<0.000000e+00> : vector<8x96xf32>
    %262 = tpu.matmul %258, %6, %cst_81 {dimension_numbers = #tpu.dot_dimension_numbers<[1], [0], [0], [1], [0, 0, 1, 1], [], []>} : vector<8x32xf32>, vector<32x96xf32>, vector<8x96xf32> -> vector<8x96xf32>
    %263 = vector.broadcast %7 : vector<1x96xf32> to vector<8x96xf32>
    %264 = arith.addf %262, %263 : vector<8x96xf32>
    %265 = vector.extract_strided_slice %261 {offsets = [0, 0], sizes = [8, 32], strides = [1, 1]} : vector<8x96xf32> to vector<8x32xf32>
    %266 = vector.extract_strided_slice %264 {offsets = [0, 0], sizes = [8, 32], strides = [1, 1]} : vector<8x96xf32> to vector<8x32xf32>
    %267 = arith.addf %265, %266 : vector<8x32xf32>
    %cst_82 = arith.constant 0.000000e+00 : f32
    %268 = vector.broadcast %cst_82 : f32 to vector<8x32xf32>
    %269 = arith.subf %268, %267 : vector<8x32xf32>
    %270 = math.exp %269 : vector<8x32xf32>
    %cst_83 = arith.constant 1.000000e+00 : f32
    %271 = vector.broadcast %cst_83 : f32 to vector<8x32xf32>
    %272 = arith.addf %271, %270 : vector<8x32xf32>
    %cst_84 = arith.constant 1.000000e+00 : f32
    %273 = vector.broadcast %cst_84 : f32 to vector<8x32xf32>
    %274 = arith.divf %273, %272 : vector<8x32xf32>
    %275 = vector.extract_strided_slice %261 {offsets = [0, 32], sizes = [8, 32], strides = [1, 1]} : vector<8x96xf32> to vector<8x32xf32>
    %276 = vector.extract_strided_slice %264 {offsets = [0, 32], sizes = [8, 32], strides = [1, 1]} : vector<8x96xf32> to vector<8x32xf32>
    %277 = arith.addf %275, %276 : vector<8x32xf32>
    %cst_85 = arith.constant 0.000000e+00 : f32
    %278 = vector.broadcast %cst_85 : f32 to vector<8x32xf32>
    %279 = arith.subf %278, %277 : vector<8x32xf32>
    %280 = math.exp %279 : vector<8x32xf32>
    %cst_86 = arith.constant 1.000000e+00 : f32
    %281 = vector.broadcast %cst_86 : f32 to vector<8x32xf32>
    %282 = arith.addf %281, %280 : vector<8x32xf32>
    %cst_87 = arith.constant 1.000000e+00 : f32
    %283 = vector.broadcast %cst_87 : f32 to vector<8x32xf32>
    %284 = arith.divf %283, %282 : vector<8x32xf32>
    %285 = vector.extract_strided_slice %261 {offsets = [0, 64], sizes = [8, 32], strides = [1, 1]} : vector<8x96xf32> to vector<8x32xf32>
    %286 = vector.extract_strided_slice %264 {offsets = [0, 64], sizes = [8, 32], strides = [1, 1]} : vector<8x96xf32> to vector<8x32xf32>
    %287 = arith.mulf %274, %286 : vector<8x32xf32>
    %288 = arith.addf %285, %287 : vector<8x32xf32>
    %289 = math.tanh %288 : vector<8x32xf32>
    %cst_88 = arith.constant 1.000000e+00 : f32
    %290 = vector.broadcast %cst_88 : f32 to vector<8x32xf32>
    %291 = arith.subf %290, %284 : vector<8x32xf32>
    %292 = arith.mulf %291, %289 : vector<8x32xf32>
    %293 = arith.mulf %284, %258 : vector<8x32xf32>
    %294 = arith.addf %292, %293 : vector<8x32xf32>
    %295 = vector.shape_cast %294 : vector<8x32xf32> to vector<8x1x32xf32>
    %c0_89 = arith.constant 0 : index
    %c7 = arith.constant 7 : index
    %c0_90 = arith.constant 0 : index
    %296 = vector.load %arg19[%c0_89, %c7, %c0_90] : memref<8x8x32xf32, #tpu.memory_space<vmem>>, vector<8x1x32xf32>
    tpu.vector_store %arg19[%c0_89, %c7, %c0_90], %295 {strides = array<i32>} : memref<8x8x32xf32, #tpu.memory_space<vmem>>, vector<8x1x32xf32>,
    %c0_91 = arith.constant 0 : index
    %c0_92 = arith.constant 0 : index
    %c0_93 = arith.constant 0 : index
    %297 = vector.load %arg2[%c0_91, %c0_92, %c0_93] : memref<8x8x32xf32, #tpu.memory_space<vmem>>, vector<8x8x32xf32>
    %298 = vector.extract_strided_slice %297 {offsets = [0, 0, 0], sizes = [2, 8, 32], strides = [1, 1, 1]} : vector<8x8x32xf32> to vector<2x8x32xf32>
    %299 = vector.extract_strided_slice %297 {offsets = [2, 0, 0], sizes = [6, 8, 32], strides = [1, 1, 1]} : vector<8x8x32xf32> to vector<6x8x32xf32>
    %c0_94 = arith.constant 0 : index
    %c0_95 = arith.constant 0 : index
    %c0_96 = arith.constant 0 : index
    %300 = vector.load %arg19[%c0_94, %c0_95, %c0_96] : memref<8x8x32xf32, #tpu.memory_space<vmem>>, vector<8x8x32xf32>
    %301 = vector.extract_strided_slice %300 {offsets = [0, 0, 0], sizes = [2, 8, 32], strides = [1, 1, 1]} : vector<8x8x32xf32> to vector<2x8x32xf32>
    %302 = vector.extract_strided_slice %300 {offsets = [2, 0, 0], sizes = [6, 8, 32], strides = [1, 1, 1]} : vector<8x8x32xf32> to vector<6x8x32xf32>
    %303 = tpu.concatenate %298, %298, %298 in 0 : vector<2x8x32xf32>, vector<2x8x32xf32>, vector<2x8x32xf32> -> vector<6x8x32xf32>
    %304 = tpu.concatenate %301, %301, %301 in 0 : vector<2x8x32xf32>, vector<2x8x32xf32>, vector<2x8x32xf32> -> vector<6x8x32xf32>
    "tpu.trace_start"() <{level = 10 : i32, message = "nle,nke->nlk"}> : () -> ()
    %cst_97 = arith.constant dense<0.000000e+00> : vector<6x8x8xf32>
    %305 = tpu.matmul %299, %303, %cst_97 {dimension_numbers = #tpu.dot_dimension_numbers<[2], [2], [1], [1], [0, 0, 0, 1, 1, 1], [0], [0]>} : vector<6x8x32xf32>, vector<6x8x32xf32>, vector<6x8x8xf32> -> vector<6x8x8xf32>
    "tpu.trace_stop"() : () -> ()
    %306 = vector.shape_cast %302 : vector<6x8x32xf32> to vector<48x32xf32>
    %c0_98 = arith.constant 0 : index
    %c0_99 = arith.constant 0 : index
    %307 = vector.load %arg7[%c0_98, %c0_99] : memref<32x32xf32, #tpu.memory_space<vmem>>, vector<32x32xf32>
    %cst_100 = arith.constant dense<0.000000e+00> : vector<48x32xf32>
    %308 = tpu.matmul %306, %307, %cst_100 {dimension_numbers = #tpu.dot_dimension_numbers<[1], [0], [0], [1], [0, 0, 1, 1], [], []>} : vector<48x32xf32>, vector<32x32xf32>, vector<48x32xf32> -> vector<48x32xf32>
    %309 = vector.shape_cast %308 : vector<48x32xf32> to vector<6x8x32xf32>
    "tpu.trace_start"() <{level = 10 : i32, message = "nlk,nmk->nlm"}> : () -> ()
    %cst_101 = arith.constant dense<0.000000e+00> : vector<6x8x8xf32>
    %310 = tpu.matmul %309, %304, %cst_101 {dimension_numbers = #tpu.dot_dimension_numbers<[2], [2], [1], [1], [0, 0, 0, 1, 1, 1], [0], [0]>} : vector<6x8x32xf32>, vector<6x8x32xf32>, vector<6x8x8xf32> -> vector<6x8x8xf32>
    "tpu.trace_stop"() : () -> ()
    %311 = vector.extract_strided_slice %305 {offsets = [0, 0, 0], sizes = [6, 6, 8], strides = [1, 1, 1]} : vector<6x8x8xf32> to vector<6x6x8xf32>
    %312 = vector.extract_strided_slice %305 {offsets = [0, 1, 0], sizes = [6, 6, 8], strides = [1, 1, 1]} : vector<6x8x8xf32> to vector<6x6x8xf32>
    %313 = vector.extract_strided_slice %305 {offsets = [0, 2, 0], sizes = [6, 6, 8], strides = [1, 1, 1]} : vector<6x8x8xf32> to vector<6x6x8xf32>
    %314 = vector.extract_strided_slice %310 {offsets = [0, 0, 0], sizes = [6, 6, 8], strides = [1, 1, 1]} : vector<6x8x8xf32> to vector<6x6x8xf32>
    %315 = vector.extract_strided_slice %310 {offsets = [0, 1, 0], sizes = [6, 6, 8], strides = [1, 1, 1]} : vector<6x8x8xf32> to vector<6x6x8xf32>
    %316 = vector.extract_strided_slice %310 {offsets = [0, 2, 0], sizes = [6, 6, 8], strides = [1, 1, 1]} : vector<6x8x8xf32> to vector<6x6x8xf32>
    %317 = tpu.concatenate %311, %312, %313, %314, %315, %316 in 2 : vector<6x6x8xf32>, vector<6x6x8xf32>, vector<6x6x8xf32>, vector<6x6x8xf32>, vector<6x6x8xf32>, vector<6x6x8xf32> -> vector<6x6x48xf32>
    %c0_102 = arith.constant 0 : index
    %c0_103 = arith.constant 0 : index
    %318 = vector.load %arg8[%c0_102, %c0_103] : memref<48x48xf32, #tpu.memory_space<vmem>>, vector<48x48xf32>
    %319 = vector.shape_cast %318 : vector<48x48xf32> to vector<1x48x48xf32>
    %320 = vector.shape_cast %319 : vector<1x48x48xf32> to vector<1x48x48xf32>
    %321 = vector.broadcast %320 : vector<1x48x48xf32> to vector<6x48x48xf32>
    "tpu.trace_start"() <{level = 10 : i32, message = "nip,npq->niq"}> : () -> ()
    %cst_104 = arith.constant dense<0.000000e+00> : vector<6x6x48xf32>
    %322 = tpu.matmul %317, %321, %cst_104 {dimension_numbers = #tpu.dot_dimension_numbers<[2], [1], [1], [2], [0, 0, 0, 1, 1, 2], [0], [0]>} : vector<6x6x48xf32>, vector<6x48x48xf32>, vector<6x6x48xf32> -> vector<6x6x48xf32>
    "tpu.trace_stop"() : () -> ()
    %c0_105 = arith.constant 0 : index
    %c0_106 = arith.constant 0 : index
    %323 = vector.load %arg9[%c0_105, %c0_106] : memref<1x48xf32, #tpu.memory_space<vmem>>, vector<1x48xf32>
    %324 = vector.shape_cast %323 : vector<1x48xf32> to vector<1x1x48xf32>
    %325 = vector.broadcast %324 : vector<1x1x48xf32> to vector<6x6x48xf32>
    %326 = arith.addf %322, %325 : vector<6x6x48xf32>
    %cst_107 = arith.constant 0.000000e+00 : f32
    %327 = vector.broadcast %cst_107 : f32 to vector<6x6x48xf32>
    %328 = arith.maximumf %326, %327 : vector<6x6x48xf32>
    %329 = vector.extract_strided_slice %328 {offsets = [0, 0, 0], sizes = [6, 1, 48], strides = [1, 1, 1]} : vector<6x6x48xf32> to vector<6x1x48xf32>
    %330 = vector.shape_cast %329 : vector<6x1x48xf32> to vector<6x48xf32>
    %331 = vector.extract_strided_slice %328 {offsets = [0, 1, 0], sizes = [6, 1, 48], strides = [1, 1, 1]} : vector<6x6x48xf32> to vector<6x1x48xf32>
    %332 = vector.shape_cast %331 : vector<6x1x48xf32> to vector<6x48xf32>
    %333 = arith.maximumf %330, %332 : vector<6x48xf32>
    %334 = vector.extract_strided_slice %328 {offsets = [0, 2, 0], sizes = [6, 1, 48], strides = [1, 1, 1]} : vector<6x6x48xf32> to vector<6x1x48xf32>
    %335 = vector.shape_cast %334 : vector<6x1x48xf32> to vector<6x48xf32>
    %336 = arith.maximumf %333, %335 : vector<6x48xf32>
    %337 = vector.extract_strided_slice %336 {offsets = [0, 0], sizes = [6, 8], strides = [1, 1]} : vector<6x48xf32> to vector<6x8xf32>
    %338 = vector.extract_strided_slice %336 {offsets = [0, 8], sizes = [6, 8], strides = [1, 1]} : vector<6x48xf32> to vector<6x8xf32>
    %339 = vector.extract_strided_slice %336 {offsets = [0, 16], sizes = [6, 8], strides = [1, 1]} : vector<6x48xf32> to vector<6x8xf32>
    %340 = arith.maximumf %337, %338 : vector<6x8xf32>
    %341 = arith.maximumf %340, %339 : vector<6x8xf32>
    %342 = vector.extract_strided_slice %336 {offsets = [0, 24], sizes = [6, 8], strides = [1, 1]} : vector<6x48xf32> to vector<6x8xf32>
    %343 = vector.extract_strided_slice %336 {offsets = [0, 32], sizes = [6, 8], strides = [1, 1]} : vector<6x48xf32> to vector<6x8xf32>
    %344 = vector.extract_strided_slice %336 {offsets = [0, 40], sizes = [6, 8], strides = [1, 1]} : vector<6x48xf32> to vector<6x8xf32>
    %345 = arith.maximumf %342, %343 : vector<6x8xf32>
    %346 = arith.maximumf %345, %344 : vector<6x8xf32>
    %347 = vector.extract_strided_slice %328 {offsets = [0, 3, 0], sizes = [6, 1, 48], strides = [1, 1, 1]} : vector<6x6x48xf32> to vector<6x1x48xf32>
    %348 = vector.shape_cast %347 : vector<6x1x48xf32> to vector<6x48xf32>
    %349 = vector.extract_strided_slice %328 {offsets = [0, 4, 0], sizes = [6, 1, 48], strides = [1, 1, 1]} : vector<6x6x48xf32> to vector<6x1x48xf32>
    %350 = vector.shape_cast %349 : vector<6x1x48xf32> to vector<6x48xf32>
    %351 = arith.maximumf %348, %350 : vector<6x48xf32>
    %352 = vector.extract_strided_slice %328 {offsets = [0, 5, 0], sizes = [6, 1, 48], strides = [1, 1, 1]} : vector<6x6x48xf32> to vector<6x1x48xf32>
    %353 = vector.shape_cast %352 : vector<6x1x48xf32> to vector<6x48xf32>
    %354 = arith.maximumf %351, %353 : vector<6x48xf32>
    %355 = vector.extract_strided_slice %354 {offsets = [0, 0], sizes = [6, 8], strides = [1, 1]} : vector<6x48xf32> to vector<6x8xf32>
    %356 = vector.extract_strided_slice %354 {offsets = [0, 8], sizes = [6, 8], strides = [1, 1]} : vector<6x48xf32> to vector<6x8xf32>
    %357 = vector.extract_strided_slice %354 {offsets = [0, 16], sizes = [6, 8], strides = [1, 1]} : vector<6x48xf32> to vector<6x8xf32>
    %358 = arith.maximumf %355, %356 : vector<6x8xf32>
    %359 = arith.maximumf %358, %357 : vector<6x8xf32>
    %360 = vector.extract_strided_slice %354 {offsets = [0, 24], sizes = [6, 8], strides = [1, 1]} : vector<6x48xf32> to vector<6x8xf32>
    %361 = vector.extract_strided_slice %354 {offsets = [0, 32], sizes = [6, 8], strides = [1, 1]} : vector<6x48xf32> to vector<6x8xf32>
    %362 = vector.extract_strided_slice %354 {offsets = [0, 40], sizes = [6, 8], strides = [1, 1]} : vector<6x48xf32> to vector<6x8xf32>
    %363 = arith.maximumf %360, %361 : vector<6x8xf32>
    %364 = arith.maximumf %363, %362 : vector<6x8xf32>
    %365 = tpu.concatenate %341, %346, %359, %364 in 1 : vector<6x8xf32>, vector<6x8xf32>, vector<6x8xf32>, vector<6x8xf32> -> vector<6x32xf32>
    %c0_108 = arith.constant 0 : index
    %c0_109 = arith.constant 0 : index
    %366 = vector.load %arg10[%c0_108, %c0_109] : memref<32x16xf32, #tpu.memory_space<vmem>>, vector<32x16xf32>
    %cst_110 = arith.constant dense<0.000000e+00> : vector<6x16xf32>
    %367 = tpu.matmul %365, %366, %cst_110 {dimension_numbers = #tpu.dot_dimension_numbers<[1], [0], [0], [1], [0, 0, 1, 1], [], []>} : vector<6x32xf32>, vector<32x16xf32>, vector<6x16xf32> -> vector<6x16xf32>
    %c0_111 = arith.constant 0 : index
    %c0_112 = arith.constant 0 : index
    %368 = vector.load %arg11[%c0_111, %c0_112] : memref<1x16xf32, #tpu.memory_space<vmem>>, vector<1x16xf32>
    %369 = vector.broadcast %368 : vector<1x16xf32> to vector<6x16xf32>
    %370 = arith.addf %367, %369 : vector<6x16xf32>
    %371 = math.tanh %370 : vector<6x16xf32>
    %c0_113 = arith.constant 0 : index
    %c0_114 = arith.constant 0 : index
    %372 = vector.load %arg12[%c0_113, %c0_114] : memref<16x48xf32, #tpu.memory_space<vmem>>, vector<16x48xf32>
    %cst_115 = arith.constant dense<0.000000e+00> : vector<6x48xf32>
    %373 = tpu.matmul %371, %372, %cst_115 {dimension_numbers = #tpu.dot_dimension_numbers<[1], [0], [0], [1], [0, 0, 1, 1], [], []>} : vector<6x16xf32>, vector<16x48xf32>, vector<6x48xf32> -> vector<6x48xf32>
    %c0_116 = arith.constant 0 : index
    %c0_117 = arith.constant 0 : index
    %374 = vector.load %arg14[%c0_116, %c0_117] : memref<1x48xf32, #tpu.memory_space<vmem>>, vector<1x48xf32>
    %375 = vector.broadcast %374 : vector<1x48xf32> to vector<6x48xf32>
    %376 = arith.addf %373, %375 : vector<6x48xf32>
    %c0_118 = arith.constant 0 : index
    %c0_119 = arith.constant 0 : index
    %377 = vector.load %arg13[%c0_118, %c0_119] : memref<16x48xf32, #tpu.memory_space<vmem>>, vector<16x48xf32>
    %c0_120 = arith.constant 0 : index
    %c0_121 = arith.constant 0 : index
    %378 = vector.load %arg15[%c0_120, %c0_121] : memref<1x48xf32, #tpu.memory_space<vmem>>, vector<1x48xf32>
    %cst_122 = arith.constant 0.000000e+00 : f32
    %379 = vector.broadcast %cst_122 : f32 to vector<2x16xf32>
    %380 = vector.extract_strided_slice %376 {offsets = [0, 0], sizes = [2, 48], strides = [1, 1]} : vector<6x48xf32> to vector<2x48xf32>
    %cst_123 = arith.constant dense<0.000000e+00> : vector<2x48xf32>
    %381 = tpu.matmul %379, %377, %cst_123 {dimension_numbers = #tpu.dot_dimension_numbers<[1], [0], [0], [1], [0, 0, 1, 1], [], []>} : vector<2x16xf32>, vector<16x48xf32>, vector<2x48xf32> -> vector<2x48xf32>
    %382 = vector.broadcast %378 : vector<1x48xf32> to vector<2x48xf32>
    %383 = arith.addf %381, %382 : vector<2x48xf32>
    %384 = vector.extract_strided_slice %380 {offsets = [0, 0], sizes = [2, 16], strides = [1, 1]} : vector<2x48xf32> to vector<2x16xf32>
    %385 = vector.extract_strided_slice %383 {offsets = [0, 0], sizes = [2, 16], strides = [1, 1]} : vector<2x48xf32> to vector<2x16xf32>
    %386 = arith.addf %384, %385 : vector<2x16xf32>
    %cst_124 = arith.constant 0.000000e+00 : f32
    %387 = vector.broadcast %cst_124 : f32 to vector<2x16xf32>
    %388 = arith.subf %387, %386 : vector<2x16xf32>
    %389 = math.exp %388 : vector<2x16xf32>
    %cst_125 = arith.constant 1.000000e+00 : f32
    %390 = vector.broadcast %cst_125 : f32 to vector<2x16xf32>
    %391 = arith.addf %390, %389 : vector<2x16xf32>
    %cst_126 = arith.constant 1.000000e+00 : f32
    %392 = vector.broadcast %cst_126 : f32 to vector<2x16xf32>
    %393 = arith.divf %392, %391 : vector<2x16xf32>
    %394 = vector.extract_strided_slice %380 {offsets = [0, 16], sizes = [2, 16], strides = [1, 1]} : vector<2x48xf32> to vector<2x16xf32>
    %395 = vector.extract_strided_slice %383 {offsets = [0, 16], sizes = [2, 16], strides = [1, 1]} : vector<2x48xf32> to vector<2x16xf32>
    %396 = arith.addf %394, %395 : vector<2x16xf32>
    %cst_127 = arith.constant 0.000000e+00 : f32
    %397 = vector.broadcast %cst_127 : f32 to vector<2x16xf32>
    %398 = arith.subf %397, %396 : vector<2x16xf32>
    %399 = math.exp %398 : vector<2x16xf32>
    %cst_128 = arith.constant 1.000000e+00 : f32
    %400 = vector.broadcast %cst_128 : f32 to vector<2x16xf32>
    %401 = arith.addf %400, %399 : vector<2x16xf32>
    %cst_129 = arith.constant 1.000000e+00 : f32
    %402 = vector.broadcast %cst_129 : f32 to vector<2x16xf32>
    %403 = arith.divf %402, %401 : vector<2x16xf32>
    %404 = vector.extract_strided_slice %380 {offsets = [0, 32], sizes = [2, 16], strides = [1, 1]} : vector<2x48xf32> to vector<2x16xf32>
    %405 = vector.extract_strided_slice %383 {offsets = [0, 32], sizes = [2, 16], strides = [1, 1]} : vector<2x48xf32> to vector<2x16xf32>
    %406 = arith.mulf %393, %405 : vector<2x16xf32>
    %407 = arith.addf %404, %406 : vector<2x16xf32>
    %408 = math.tanh %407 : vector<2x16xf32>
    %cst_130 = arith.constant 1.000000e+00 : f32
    %409 = vector.broadcast %cst_130 : f32 to vector<2x16xf32>
    %410 = arith.subf %409, %403 : vector<2x16xf32>
    %411 = arith.mulf %410, %408 : vector<2x16xf32>
    %412 = arith.mulf %403, %379 : vector<2x16xf32>
    %413 = arith.addf %411, %412 : vector<2x16xf32>
    %414 = vector.extract_strided_slice %376 {offsets = [2, 0], sizes = [2, 48], strides = [1, 1]} : vector<6x48xf32> to vector<2x48xf32>
    %cst_131 = arith.constant dense<0.000000e+00> : vector<2x48xf32>
    %415 = tpu.matmul %413, %377, %cst_131 {dimension_numbers = #tpu.dot_dimension_numbers<[1], [0], [0], [1], [0, 0, 1, 1], [], []>} : vector<2x16xf32>, vector<16x48xf32>, vector<2x48xf32> -> vector<2x48xf32>
    %416 = vector.broadcast %378 : vector<1x48xf32> to vector<2x48xf32>
    %417 = arith.addf %415, %416 : vector<2x48xf32>
    %418 = vector.extract_strided_slice %414 {offsets = [0, 0], sizes = [2, 16], strides = [1, 1]} : vector<2x48xf32> to vector<2x16xf32>
    %419 = vector.extract_strided_slice %417 {offsets = [0, 0], sizes = [2, 16], strides = [1, 1]} : vector<2x48xf32> to vector<2x16xf32>
    %420 = arith.addf %418, %419 : vector<2x16xf32>
    %cst_132 = arith.constant 0.000000e+00 : f32
    %421 = vector.broadcast %cst_132 : f32 to vector<2x16xf32>
    %422 = arith.subf %421, %420 : vector<2x16xf32>
    %423 = math.exp %422 : vector<2x16xf32>
    %cst_133 = arith.constant 1.000000e+00 : f32
    %424 = vector.broadcast %cst_133 : f32 to vector<2x16xf32>
    %425 = arith.addf %424, %423 : vector<2x16xf32>
    %cst_134 = arith.constant 1.000000e+00 : f32
    %426 = vector.broadcast %cst_134 : f32 to vector<2x16xf32>
    %427 = arith.divf %426, %425 : vector<2x16xf32>
    %428 = vector.extract_strided_slice %414 {offsets = [0, 16], sizes = [2, 16], strides = [1, 1]} : vector<2x48xf32> to vector<2x16xf32>
    %429 = vector.extract_strided_slice %417 {offsets = [0, 16], sizes = [2, 16], strides = [1, 1]} : vector<2x48xf32> to vector<2x16xf32>
    %430 = arith.addf %428, %429 : vector<2x16xf32>
    %cst_135 = arith.constant 0.000000e+00 : f32
    %431 = vector.broadcast %cst_135 : f32 to vector<2x16xf32>
    %432 = arith.subf %431, %430 : vector<2x16xf32>
    %433 = math.exp %432 : vector<2x16xf32>
    %cst_136 = arith.constant 1.000000e+00 : f32
    %434 = vector.broadcast %cst_136 : f32 to vector<2x16xf32>
    %435 = arith.addf %434, %433 : vector<2x16xf32>
    %cst_137 = arith.constant 1.000000e+00 : f32
    %436 = vector.broadcast %cst_137 : f32 to vector<2x16xf32>
    %437 = arith.divf %436, %435 : vector<2x16xf32>
    %438 = vector.extract_strided_slice %414 {offsets = [0, 32], sizes = [2, 16], strides = [1, 1]} : vector<2x48xf32> to vector<2x16xf32>
    %439 = vector.extract_strided_slice %417 {offsets = [0, 32], sizes = [2, 16], strides = [1, 1]} : vector<2x48xf32> to vector<2x16xf32>
    %440 = arith.mulf %427, %439 : vector<2x16xf32>
    %441 = arith.addf %438, %440 : vector<2x16xf32>
    %442 = math.tanh %441 : vector<2x16xf32>
    %cst_138 = arith.constant 1.000000e+00 : f32
    %443 = vector.broadcast %cst_138 : f32 to vector<2x16xf32>
    %444 = arith.subf %443, %437 : vector<2x16xf32>
    %445 = arith.mulf %444, %442 : vector<2x16xf32>
    %446 = arith.mulf %437, %413 : vector<2x16xf32>
    %447 = arith.addf %445, %446 : vector<2x16xf32>
    %448 = vector.extract_strided_slice %376 {offsets = [4, 0], sizes = [2, 48], strides = [1, 1]} : vector<6x48xf32> to vector<2x48xf32>
    %cst_139 = arith.constant dense<0.000000e+00> : vector<2x48xf32>
    %449 = tpu.matmul %447, %377, %cst_139 {dimension_numbers = #tpu.dot_dimension_numbers<[1], [0], [0], [1], [0, 0, 1, 1], [], []>} : vector<2x16xf32>, vector<16x48xf32>, vector<2x48xf32> -> vector<2x48xf32>
    %450 = vector.broadcast %378 : vector<1x48xf32> to vector<2x48xf32>
    %451 = arith.addf %449, %450 : vector<2x48xf32>
    %452 = vector.extract_strided_slice %448 {offsets = [0, 0], sizes = [2, 16], strides = [1, 1]} : vector<2x48xf32> to vector<2x16xf32>
    %453 = vector.extract_strided_slice %451 {offsets = [0, 0], sizes = [2, 16], strides = [1, 1]} : vector<2x48xf32> to vector<2x16xf32>
    %454 = arith.addf %452, %453 : vector<2x16xf32>
    %cst_140 = arith.constant 0.000000e+00 : f32
    %455 = vector.broadcast %cst_140 : f32 to vector<2x16xf32>
    %456 = arith.subf %455, %454 : vector<2x16xf32>
    %457 = math.exp %456 : vector<2x16xf32>
    %cst_141 = arith.constant 1.000000e+00 : f32
    %458 = vector.broadcast %cst_141 : f32 to vector<2x16xf32>
    %459 = arith.addf %458, %457 : vector<2x16xf32>
    %cst_142 = arith.constant 1.000000e+00 : f32
    %460 = vector.broadcast %cst_142 : f32 to vector<2x16xf32>
    %461 = arith.divf %460, %459 : vector<2x16xf32>
    %462 = vector.extract_strided_slice %448 {offsets = [0, 16], sizes = [2, 16], strides = [1, 1]} : vector<2x48xf32> to vector<2x16xf32>
    %463 = vector.extract_strided_slice %451 {offsets = [0, 16], sizes = [2, 16], strides = [1, 1]} : vector<2x48xf32> to vector<2x16xf32>
    %464 = arith.addf %462, %463 : vector<2x16xf32>
    %cst_143 = arith.constant 0.000000e+00 : f32
    %465 = vector.broadcast %cst_143 : f32 to vector<2x16xf32>
    %466 = arith.subf %465, %464 : vector<2x16xf32>
    %467 = math.exp %466 : vector<2x16xf32>
    %cst_144 = arith.constant 1.000000e+00 : f32
    %468 = vector.broadcast %cst_144 : f32 to vector<2x16xf32>
    %469 = arith.addf %468, %467 : vector<2x16xf32>
    %cst_145 = arith.constant 1.000000e+00 : f32
    %470 = vector.broadcast %cst_145 : f32 to vector<2x16xf32>
    %471 = arith.divf %470, %469 : vector<2x16xf32>
    %472 = vector.extract_strided_slice %448 {offsets = [0, 32], sizes = [2, 16], strides = [1, 1]} : vector<2x48xf32> to vector<2x16xf32>
    %473 = vector.extract_strided_slice %451 {offsets = [0, 32], sizes = [2, 16], strides = [1, 1]} : vector<2x48xf32> to vector<2x16xf32>
    %474 = arith.mulf %461, %473 : vector<2x16xf32>
    %475 = arith.addf %472, %474 : vector<2x16xf32>
    %476 = math.tanh %475 : vector<2x16xf32>
    %cst_146 = arith.constant 1.000000e+00 : f32
    %477 = vector.broadcast %cst_146 : f32 to vector<2x16xf32>
    %478 = arith.subf %477, %471 : vector<2x16xf32>
    %479 = arith.mulf %478, %476 : vector<2x16xf32>
    %480 = arith.mulf %471, %447 : vector<2x16xf32>
    %481 = arith.addf %479, %480 : vector<2x16xf32>
    %c0_147 = arith.constant 0 : index
    %c0_148 = arith.constant 0 : index
    %482 = vector.load %arg16[%c0_147, %c0_148] : memref<16x2xf32, #tpu.memory_space<vmem>>, vector<16x2xf32>
    %cst_149 = arith.constant dense<0.000000e+00> : vector<2x2xf32>
    %483 = tpu.matmul %481, %482, %cst_149 {dimension_numbers = #tpu.dot_dimension_numbers<[1], [0], [0], [1], [0, 0, 1, 1], [], []>} : vector<2x16xf32>, vector<16x2xf32>, vector<2x2xf32> -> vector<2x2xf32>
    %c0_150 = arith.constant 0 : index
    %c0_151 = arith.constant 0 : index
    %484 = vector.load %arg17[%c0_150, %c0_151] : memref<1x2xf32, #tpu.memory_space<vmem>>, vector<1x2xf32>
    %485 = vector.broadcast %484 : vector<1x2xf32> to vector<2x2xf32>
    %486 = arith.addf %483, %485 : vector<2x2xf32>
    %c0_152 = arith.constant 0 : index
    %c0_153 = arith.constant 0 : index
    %487 = vector.load %arg18[%c0_152, %c0_153] : memref<2x2xf32, #tpu.memory_space<vmem>>, vector<2x2xf32>
    tpu.vector_store %arg18[%c0_152, %c0_153], %486 {strides = array<i32>} : memref<2x2xf32, #tpu.memory_space<vmem>>, vector<2x2xf32>,
    return
  }
  func.func @transform_0(%arg0: i32) -> (i32, i32) {
    %c0_i32 = arith.constant 0 : i32
    %c0_i32_0 = arith.constant 0 : i32
    %c0_i32_1 = arith.constant 0 : i32
    return %c0_i32, %c0_i32_0 : i32, i32
  }
  func.func @transform_1(%arg0: i32) -> (i32, i32, i32) {
    %c0_i32 = arith.constant 0 : i32
    %c0_i32_0 = arith.constant 0 : i32
    %c0_i32_1 = arith.constant 0 : i32
    %c0_i32_2 = arith.constant 0 : i32
    return %c0_i32, %c0_i32_0, %c0_i32_1 : i32, i32, i32
  }
  func.func @transform_2(%arg0: i32) -> (i32, i32) {
    %c0_i32 = arith.constant 0 : i32
    %c0_i32_0 = arith.constant 0 : i32
    %c0_i32_1 = arith.constant 0 : i32
    return %c0_i32, %c0_i32_0 : i32, i32
  }
  func.func @transform_3(%arg0: i32) -> (i32, i32) {
    %c0_i32 = arith.constant 0 : i32
    %c0_i32_0 = arith.constant 0 : i32
    %c0_i32_1 = arith.constant 0 : i32
    return %c0_i32, %c0_i32_0 : i32, i32
  }
  func.func @transform_4(%arg0: i32) -> (i32, i32) {
    %c0_i32 = arith.constant 0 : i32
    %c0_i32_0 = arith.constant 0 : i32
    %c0_i32_1 = arith.constant 0 : i32
    return %c0_i32, %c0_i32_0 : i32, i32
  }
  func.func @transform_5(%arg0: i32) -> (i32, i32) {
    %c0_i32 = arith.constant 0 : i32
    %c0_i32_0 = arith.constant 0 : i32
    %c0_i32_1 = arith.constant 0 : i32
    return %c0_i32, %c0_i32_0 : i32, i32
  }
  func.func @transform_6(%arg0: i32) -> (i32, i32) {
    %c0_i32 = arith.constant 0 : i32
    %c0_i32_0 = arith.constant 0 : i32
    %c0_i32_1 = arith.constant 0 : i32
    return %c0_i32, %c0_i32_0 : i32, i32
  }
  func.func @transform_7(%arg0: i32) -> (i32, i32) {
    %c0_i32 = arith.constant 0 : i32
    %c0_i32_0 = arith.constant 0 : i32
    %c0_i32_1 = arith.constant 0 : i32
    return %c0_i32, %c0_i32_0 : i32, i32
  }
  func.func @transform_8(%arg0: i32) -> (i32, i32) {
    %c0_i32 = arith.constant 0 : i32
    %c0_i32_0 = arith.constant 0 : i32
    %c0_i32_1 = arith.constant 0 : i32
    return %c0_i32, %c0_i32_0 : i32, i32
  }
  func.func @transform_9(%arg0: i32) -> (i32, i32) {
    %c0_i32 = arith.constant 0 : i32
    %c0_i32_0 = arith.constant 0 : i32
    %c0_i32_1 = arith.constant 0 : i32
    return %c0_i32, %c0_i32_0 : i32, i32
  }
  func.func @transform_10(%arg0: i32) -> (i32, i32) {
    %c0_i32 = arith.constant 0 : i32
    %c0_i32_0 = arith.constant 0 : i32
    %c0_i32_1 = arith.constant 0 : i32
    return %c0_i32, %c0_i32_0 : i32, i32
  }
  func.func @transform_11(%arg0: i32) -> (i32, i32) {
    %c0_i32 = arith.constant 0 : i32
    %c0_i32_0 = arith.constant 0 : i32
    %c0_i32_1 = arith.constant 0 : i32
    return %c0_i32, %c0_i32_0 : i32, i32
  }
  func.func @transform_12(%arg0: i32) -> (i32, i32) {
    %c0_i32 = arith.constant 0 : i32
    %c0_i32_0 = arith.constant 0 : i32
    %c0_i32_1 = arith.constant 0 : i32
    return %c0_i32, %c0_i32_0 : i32, i32
  }
  func.func @transform_13(%arg0: i32) -> (i32, i32) {
    %c0_i32 = arith.constant 0 : i32
    %c0_i32_0 = arith.constant 0 : i32
    %c0_i32_1 = arith.constant 0 : i32
    return %c0_i32, %c0_i32_0 : i32, i32
  }
  func.func @transform_14(%arg0: i32) -> (i32, i32) {
    %c0_i32 = arith.constant 0 : i32
    %c0_i32_0 = arith.constant 0 : i32
    %c0_i32_1 = arith.constant 0 : i32
    return %c0_i32, %c0_i32_0 : i32, i32
  }
  func.func @transform_15(%arg0: i32) -> (i32, i32) {
    %c0_i32 = arith.constant 0 : i32
    %c0_i32_0 = arith.constant 0 : i32
    %c0_i32_1 = arith.constant 0 : i32
    return %c0_i32, %c0_i32_0 : i32, i32
  }
  func.func @transform_16(%arg0: i32) -> (i32, i32) {
    %c0_i32 = arith.constant 0 : i32
    %c0_i32_0 = arith.constant 0 : i32
    %c0_i32_1 = arith.constant 0 : i32
    return %c0_i32, %c0_i32_0 : i32, i32
  }
  func.func @transform_17(%arg0: i32) -> (i32, i32) {
    %c0_i32 = arith.constant 0 : i32
    %c0_i32_0 = arith.constant 0 : i32
    %c0_i32_1 = arith.constant 0 : i32
    return %c0_i32, %c0_i32_0 : i32, i32
  }
}

</mosaic_0001>

<bundles_post_ra>
// kernel: smn_forward.1
= control target key start
LH: loop header
LB: loop body
LE: loop exit
PB: predicated region body
PF: predicated region fallthrough
CT: control target
= control target key end

     0   :  { %s3110_s0 = inlined_call_operand.vmem [shape: f32[64,32], index: 0, kind: input, shape index: {}]   ;;  %s3111_s1 = inlined_call_operand.vmem [shape: f32[8,8,32], index: 1, kind: input, shape index: {}]   ;;  %s3112_s2 = inlined_call_operand.vmem [shape: f32[32,96], index: 2, kind: input, shape index: {}]   ;;  %s3113_s3 = inlined_call_operand.vmem [shape: f32[32,96], index: 3, kind: input, shape index: {}]   ;;  %s3114_s4 = inlined_call_operand.vmem [shape: f32[1,96], index: 4, kind: input, shape index: {}]   ;;  %s3115_s5 = inlined_call_operand.vmem [shape: f32[1,96], index: 5, kind: input, shape index: {}]   ;;  %s3116_s6 = inlined_call_operand.vmem [shape: f32[32,32], index: 6, kind: input, shape index: {}]   ;;  %s3117_s7 = inlined_call_operand.vmem [shape: f32[48,48], index: 7, kind: input, shape index: {}]   ;;  %s3118_s8 = inlined_call_operand.vmem [shape: f32[1,48], index: 8, kind: input, shape index: {}]   ;;  %s3119_s9 = inlined_call_operand.vmem [shape: f32[32,16], index: 9, kind: input, shape index: {}]   ;;  %s3120_s10 = inlined_call_operand.vmem [shape: f32[1,16], index: 10, kind: input, shape index: {}]   ;;  %s3121_s11 = inlined_call_operand.vmem [shape: f32[16,48], index: 11, kind: input, shape index: {}]   ;;  %s3122_s12 = inlined_call_operand.vmem [shape: f32[16,48], index: 12, kind: input, shape index: {}]   ;;  %s3123_s13 = inlined_call_operand.vmem [shape: f32[1,48], index: 13, kind: input, shape index: {}]   ;;  %s3124_s14 = inlined_call_operand.vmem [shape: f32[1,48], index: 14, kind: input, shape index: {}]   ;;  %s3125_s15 = inlined_call_operand.vmem [shape: f32[16,2], index: 15, kind: input, shape index: {}]   ;;  %s3126_s16 = inlined_call_operand.vmem [shape: f32[1,2], index: 16, kind: input, shape index: {}]   ;;  %s3127_s17 = inlined_call_operand.hbm [shape: f32[2,2], index: 17, kind: output, shape index: {}]  }
   0x1   :  { %3130 = sst [smem:[#allocation6_spill]] %s3110_s0 }
   0x2   :  { %3131 = sst [smem:[#allocation7_spill]] %s3111_s1 }
   0x3   :  { %v68_v0 = vld [vmem:[%s3112_s2 + $0x18] sm:$0xff]  ;;  %v67_v2 = vld [vmem:[%s3112_s2 + $0x10] sm:$0xff]  ;;  %v66_v4 = vld [vmem:[%s3112_s2 + $0x8] sm:$0xff]  ;;  %vm73_vm0 = vcmask 261120   ;;  %s3132_s27 = sld [smem:[#allocation6_spill]] }
   0x4   :  { %v2439_v1 = vld [vmem:[%s3113_s3 + $0x18] sm:$0xff]  ;;  %110 = vmatpush.msra.mxu0 %v68_v0  ;;  %v2448_v3 = vld [vmem:[%s3113_s3 + $0x10] sm:$0xff]  ;;  %v2456_v5 = vld [vmem:[%s3113_s3 + $0x8] sm:$0xff] }
   0x5   :  { %162 = vmatpush.msra.mxu1 %v2439_v1  ;;  %v65_v6 = vld [vmem:[%s3112_s2] sm:$0xff]  ;;  %274 = vmatpush.msra.mxu2 %v2439_v1 }
   0x6   :  { %v2464_v7 = vld [vmem:[%s3113_s3] sm:$0xff]  ;;  %385 = vmatpush.msra.mxu3 %v2439_v1  ;;  %111 = vmatpush.msra.mxu0 %v67_v2 }
   0x7   :  { %163 = vmatpush.msra.mxu1 %v2448_v3  ;;  %275 = vmatpush.msra.mxu2 %v2448_v3 }
   0x8   :  { %386 = vmatpush.msra.mxu3 %v2448_v3  ;;  %112 = vmatpush.msra.mxu0 %v66_v4 }
   0x9   :  { %v57_v8 = vld [vmem:[%s3132_s27] sm:$0xff]  ;;  %164 = vmatpush.msra.mxu1 %v2456_v5 }
   0xa   :  { %22 = vsyncpa [#allocation4], 0  ;;  %276 = vmatpush.msra.mxu2 %v2456_v5  ;;  %387 = vmatpush.msra.mxu3 %v2456_v5  ;;  %v2332_v9 = vmov 0.0   ;;  %v2501_v10 = vld [vmem:[%s3115_s5] ss:$0 sm:$0xff]  ;;  %s2333_s28 = smov 64  }
   0xb   :  { %113 = vmatpush.msra.mxu0 %v65_v6  ;;  %165 = vmatpush.msra.mxu1 %v2464_v7  ;;  %v2508_v13 = vld [vmem:[%s3114_s4] ss:$0 sm:$0xff]  ;;  %s2334_s4 = smov 96   ;;  %v58_v41 = vld [vmem:[%s3132_s27 + $0x8] sm:$0xff]  ;;  %s3133_s29 = sld [smem:[#allocation7_spill]] }
   0xc   :  { %2164 = vmatmul.msk.f32.vlgmr.msra.gmra.mxu0 %vm73_vm0, %v57_v8  ;;  %166 = vmatmul.f32.vlgmr.msra.gmra.mxu1 %v2332_v9  ;;  %v59_v8 = vld [vmem:[%s3132_s27 + $0x10] sm:$0xff]  ;;  %s2338_s20 = smov 32   ;;  %s2339_s21 = smov 40  }
   0xd   :  { %277 = vmatpush.msra.mxu2 %v2464_v7  ;;  %388 = vmatpush.msra.mxu3 %v2464_v7  ;;  %s2340_s19 = smov 112   ;;  %s2341_s1 = smov 120  }
   0xe   :  { %496 = vmatpush.msrb.mxu1 %v2439_v1  ;;  %s2155_s23 = sshll.u32 %s3127_s17, 4  ;;  %s2156_s23 = int_to_ptr.hbm [resolvable:$true] %s2155_s23 }
   0xf   :  { %607 = vmatpush.msrb.mxu2 %v2439_v1  ;;  %718 = vmatpush.msrb.mxu3 %v2439_v1 }
  0x10   :  { %497 = vmatpush.msrb.mxu1 %v2448_v3 }
  0x11   :  { %608 = vmatpush.msrb.mxu2 %v2448_v3  ;;  %719 = vmatpush.msrb.mxu3 %v2448_v3 }
  0x12   :  { %498 = vmatpush.msrb.mxu1 %v2456_v5 }
  0x13   :  { %609 = vmatpush.msrb.mxu2 %v2456_v5  ;;  %720 = vmatpush.msrb.mxu3 %v2456_v5 }
  0x14   :  { %499 = vmatpush.msrb.mxu1 %v2464_v7  ;;  %2165 = vmatmul.msk.f32.gmra.mxu0 %vm73_vm0, %v58_v41 }
  0x15   :  { %610 = vmatpush.msrb.mxu2 %v2464_v7  ;;  %721 = vmatpush.msrb.mxu3 %v2464_v7 }
  0x16   :  { %829 = vmatpush.msra.mxu1 %v2439_v1 }
  0x18   :  { %830 = vmatpush.msra.mxu1 %v2448_v3 }
  0x1a   :  { %831 = vmatpush.msra.mxu1 %v2456_v5 }
  0x1c   :  { %832 = vmatpush.msra.mxu1 %v2464_v7  ;;  %2166 = vmatmul.msk.f32.gmra.mxu0 %vm73_vm0, %v59_v8 }
  0x89   :  { %v167_v11 = vpop.f32.mrf.mxu1  ;;  %v115_v14 = vpop.f32.mrf.mxu0 }
  0x8a   :  { %v168_v12 = vadd.f32 %v2501_v10, %v167_v11  ;;  %v116_v15 = vadd.f32 %v2508_v13, %v115_v14 }
  0x8c   :  { %191 = vrot.lane.b32.xlu0 %v168_v12, %s2333_s28  ;;  %v170_v16 = vadd.f32 %v168_v12, %v116_v15 }
  0x8e   :  { %v171_v17 = vsub.f32 0.0, %v170_v16 }
  0x90   :  { %v172_v18 = vmul.f32 1.442695, %v171_v17 }
  0x91   :  { %v118_v45 = vpop.f32.mrf.mxu0 }
  0x92   :  { %2238 = vpow2.f32 %v172_v18  ;;  %v119_v46 = vadd.f32 %v2508_v13, %v118_v45 }
  0x98   :  { %v2239_v19 = vpop.eup %2238 }
  0x99   :  { %v174_v20 = vadd.f32 1.0, %v2239_v19 }
  0x9b   :  { %2240 = vrcp.f32 %v174_v20  ;;  %v186_v26 = vand.u32 2147483648, %v174_v20  ;;  %vm180_vm2 = vweird.f32 %v174_v20  ;;  %v184_v27 = vand.u32 2147483647, %v174_v20 }
  0x9d   :  { %v187_v29 = vor.u32 1.1754944e-38, %v186_v26  ;;  %vm185_vm4 = vcmp.eq.f32.partialorder %v184_v27, 8.507059e+37 }
  0xa1   :  { %v2241_v21 = vpop.eup %2240 }
  0xa2   :  { %v176_v22 = vmul.f32 %v2241_v21, %v174_v20  ;;  %vm181_vm1 = vweird.f32 %v2241_v21 }
  0xa3   :  { %vm182_vm3 = vmor %vm180_vm2, %vm181_vm1 }
  0xa4   :  { %v177_v23 = vsub.f32 1.0, %v176_v22 }
  0xa6   :  { %v178_v24 = vmul.f32 %v2241_v21, %v177_v23 }
  0xa8   :  { %v179_v25 = vadd.f32 %v2241_v21, %v178_v24 }
  0xaa   :  { %v183_v28 = vsel %vm182_vm3, %v2241_v21, %v179_v25 }
  0xab   :  { %v188_v31 = vsel %vm185_vm4, %v187_v29, %v183_v28 }
  0xac   :  { %v201_v36 = vsub.f32 1.0, %v188_v31  ;;  %v207_v38 = vmul.f32 0.0, %v188_v31 }
  0xfe   :  { %v192_v30 = vpop.permute.xlu0 %191 }
  0xff   :  { %v194_v32 = vmul.f32 %v192_v30, %v188_v31 }
 0x101   :  { %196 = vrot.lane.b32.xlu0 %v194_v32, %s2333_s28 }
 0x173   :  { %v197_v33 = vpop.permute.xlu0 %196 }
 0x174   :  { %v199_v34 = vadd.f32 %v197_v33, %v116_v15  ;;  %v121_v15 = vpop.f32.mrf.mxu0 }
 0x175   :  { %v122_v16 = vadd.f32 %v2508_v13, %v121_v15 }
 0x176   :  { %2242 = vtanh.f32 %v199_v34 }
 0x17c   :  { %v2243_v35 = vpop.eup %2242 }
 0x17d   :  { %203 = vrot.lane.b32.xlu1 %v2243_v35, %s2334_s4 }
 0x1ef   :  { %v204_v37 = vpop.permute.xlu1 %203 }
 0x1f0   :  { %v206_v39 = vmul.f32 %v204_v37, %v201_v36 }
 0x1f2   :  { %v2513_v40 = vadd.f32 %v207_v38, %v206_v39 }
 0x1f4   :  { %258 = vrot.lane.b32.xlu1 %v2513_v40, %s2334_s4 }
 0x266   :  { %v259_v42 = vpop.permute.xlu1 %258 }
 0x267   :  { %2172 = vmatmul.msk.f32.vlgmr.msra.gmra.mxu2 %vm73_vm0, %v259_v42 }
 0x268   :  { %940 = vmatpush.msra.mxu2 %v2439_v1 }
 0x26a   :  { %941 = vmatpush.msra.mxu2 %v2448_v3 }
 0x26c   :  { %942 = vmatpush.msra.mxu2 %v2456_v5 }
 0x26e   :  { %943 = vmatpush.msra.mxu2 %v2464_v7 }
 0x2ea   :  { %v279_v43 = vpop.f32.mrf.mxu2 }
 0x2eb   :  { %v280_v44 = vadd.f32 %v2501_v10, %v279_v43  ;;  %v60_v43 = vld [vmem:[%s3132_s27 + $0x18] sm:$0xff] }
 0x2ec   :  { %2167 = vmatmul.msk.f32.gmra.mxu0 %vm73_vm0, %v60_v43 }
 0x2ed   :  { %303 = vrot.lane.b32.xlu2 %v280_v44, %s2333_s28  ;;  %v282_v47 = vadd.f32 %v280_v44, %v119_v46 }
 0x2ef   :  { %v283_v48 = vsub.f32 0.0, %v282_v47 }
 0x2f1   :  { %v284_v49 = vmul.f32 1.442695, %v283_v48 }
 0x2f3   :  { %2244 = vpow2.f32 %v284_v49 }
 0x2f9   :  { %v2245_v50 = vpop.eup %2244 }
 0x2fa   :  { %v286_v51 = vadd.f32 1.0, %v2245_v50 }
 0x2fc   :  { %2246 = vrcp.f32 %v286_v51  ;;  %v298_v57 = vand.u32 2147483648, %v286_v51  ;;  %vm292_vm6 = vweird.f32 %v286_v51  ;;  %v296_v58 = vand.u32 2147483647, %v286_v51 }
 0x2fe   :  { %v299_v60 = vor.u32 1.1754944e-38, %v298_v57  ;;  %vm297_vm8 = vcmp.eq.f32.partialorder %v296_v58, 8.507059e+37 }
 0x302   :  { %v2247_v52 = vpop.eup %2246 }
 0x303   :  { %v288_v53 = vmul.f32 %v2247_v52, %v286_v51  ;;  %vm293_vm5 = vweird.f32 %v2247_v52 }
 0x304   :  { %vm294_vm7 = vmor %vm292_vm6, %vm293_vm5 }
 0x305   :  { %v289_v54 = vsub.f32 1.0, %v288_v53 }
 0x307   :  { %v290_v55 = vmul.f32 %v2247_v52, %v289_v54 }
 0x309   :  { %v291_v56 = vadd.f32 %v2247_v52, %v290_v55 }
 0x30b   :  { %v295_v59 = vsel %vm294_vm7, %v2247_v52, %v291_v56 }
 0x30c   :  { %v300_v62 = vsel %vm297_vm8, %v299_v60, %v295_v59 }
 0x30d   :  { %v313_v3 = vsub.f32 1.0, %v300_v62  ;;  %v319_v5 = vmul.f32 %v300_v62, %v2513_v40 }
 0x347   :  { %v304_v61 = vpop.permute.xlu2 %303 }
 0x348   :  { %v306_v63 = vmul.f32 %v304_v61, %v300_v62 }
 0x34a   :  { %308 = vrot.lane.b32.xlu2 %v306_v63, %s2333_s28 }
 0x369   :  { %v124_v47 = vpop.f32.mrf.mxu0 }
 0x36a   :  { %v125_v48 = vadd.f32 %v2508_v13, %v124_v47  ;;  %v62_v47 = vld [vmem:[%s3132_s27 + $0x28] sm:$0xff] }
 0x3a4   :  { %v309_v0 = vpop.permute.xlu2 %308 }
 0x3a5   :  { %v311_v1 = vadd.f32 %v309_v0, %v119_v46 }
 0x3a7   :  { %2248 = vtanh.f32 %v311_v1 }
 0x3ad   :  { %v2249_v2 = vpop.eup %2248 }
 0x3ae   :  { %315 = vrot.lane.b32.xlu0 %v2249_v2, %s2334_s4 }
 0x420   :  { %v316_v4 = vpop.permute.xlu0 %315 }
 0x421   :  { %v318_v6 = vmul.f32 %v316_v4, %v313_v3 }
 0x423   :  { %v2532_v7 = vadd.f32 %v319_v5, %v318_v6 }
 0x425   :  { %369 = vrot.lane.b32.xlu1 %v2532_v7, %s2334_s4 }
 0x497   :  { %v370_v11 = vpop.permute.xlu1 %369 }
 0x498   :  { %2173 = vmatmul.msk.f32.vlgmr.msra.gmra.mxu3 %vm73_vm0, %v370_v11 }
 0x51b   :  { %v390_v12 = vpop.f32.mrf.mxu3 }
 0x51c   :  { %v391_v14 = vadd.f32 %v2501_v10, %v390_v12 }
 0x51e   :  { %414 = vrot.lane.b32.xlu2 %v391_v14, %s2333_s28  ;;  %v393_v17 = vadd.f32 %v391_v14, %v122_v16  ;;  %v61_v14 = vld [vmem:[%s3132_s27 + $0x20] sm:$0xff] }
 0x51f   :  { %2168 = vmatmul.msk.f32.gmra.mxu0 %vm73_vm0, %v61_v14 }
 0x520   :  { %v394_v18 = vsub.f32 0.0, %v393_v17 }
 0x522   :  { %v395_v19 = vmul.f32 1.442695, %v394_v18 }
 0x524   :  { %2250 = vpow2.f32 %v395_v19 }
 0x527   :  { %2169 = vmatmul.msk.f32.gmra.mxu0 %vm73_vm0, %v62_v47 }
 0x52a   :  { %v2251_v20 = vpop.eup %2250 }
 0x52b   :  { %v397_v21 = vadd.f32 1.0, %v2251_v20 }
 0x52d   :  { %2252 = vrcp.f32 %v397_v21  ;;  %v409_v27 = vand.u32 2147483648, %v397_v21  ;;  %vm403_vm10 = vweird.f32 %v397_v21  ;;  %v407_v28 = vand.u32 2147483647, %v397_v21 }
 0x52f   :  { %v410_v30 = vor.u32 1.1754944e-38, %v409_v27  ;;  %vm408_vm12 = vcmp.eq.f32.partialorder %v407_v28, 8.507059e+37 }
 0x533   :  { %v2253_v22 = vpop.eup %2252 }
 0x534   :  { %v399_v23 = vmul.f32 %v2253_v22, %v397_v21  ;;  %vm404_vm9 = vweird.f32 %v2253_v22 }
 0x535   :  { %vm405_vm11 = vmor %vm403_vm10, %vm404_vm9 }
 0x536   :  { %v400_v24 = vsub.f32 1.0, %v399_v23 }
 0x538   :  { %v401_v25 = vmul.f32 %v2253_v22, %v400_v24 }
 0x53a   :  { %v402_v26 = vadd.f32 %v2253_v22, %v401_v25 }
 0x53c   :  { %v406_v29 = vsel %vm405_vm11, %v2253_v22, %v402_v26 }
 0x53d   :  { %v411_v32 = vsel %vm408_vm12, %v410_v30, %v406_v29 }
 0x53e   :  { %v424_v37 = vsub.f32 1.0, %v411_v32  ;;  %v430_v39 = vmul.f32 %v411_v32, %v2532_v7 }
 0x578   :  { %v415_v31 = vpop.permute.xlu2 %414 }
 0x579   :  { %v417_v33 = vmul.f32 %v415_v31, %v411_v32 }
 0x57b   :  { %419 = vrot.lane.b32.xlu0 %v417_v33, %s2333_s28 }
 0x59c   :  { %v127_v18 = vpop.f32.mrf.mxu0 }
 0x59d   :  { %v128_v19 = vadd.f32 %v2508_v13, %v127_v18 }
 0x5ed   :  { %v420_v34 = vpop.permute.xlu0 %419 }
 0x5ee   :  { %v422_v35 = vadd.f32 %v420_v34, %v122_v16 }
 0x5f0   :  { %2254 = vtanh.f32 %v422_v35 }
 0x5f6   :  { %v2255_v36 = vpop.eup %2254 }
 0x5f7   :  { %426 = vrot.lane.b32.xlu1 %v2255_v36, %s2334_s4 }
 0x669   :  { %v427_v38 = vpop.permute.xlu1 %426 }
 0x66a   :  { %v429_v41 = vmul.f32 %v427_v38, %v424_v37 }
 0x66c   :  { %v2547_v42 = vadd.f32 %v430_v39, %v429_v41 }
 0x66e   :  { %480 = vrot.lane.b32.xlu2 %v2547_v42, %s2334_s4 }
 0x6c8   :  { %v481_v44 = vpop.permute.xlu2 %480 }
 0x6c9   :  { %2174 = vmatmul.msk.f32.vlgmr.msrb.gmra.mxu1 %vm73_vm0, %v481_v44 }
 0x746   :  { %v501_v45 = vpop.f32.mrf.mxu1 }
 0x747   :  { %v502_v46 = vadd.f32 %v2501_v10, %v501_v45 }
 0x749   :  { %525 = vrot.lane.b32.xlu0 %v502_v46, %s2333_s28  ;;  %v504_v49 = vadd.f32 %v502_v46, %v125_v48 }
 0x74b   :  { %v505_v50 = vsub.f32 0.0, %v504_v49 }
 0x74d   :  { %v506_v51 = vmul.f32 1.442695, %v505_v50 }
 0x74f   :  { %2256 = vpow2.f32 %v506_v51  ;;  %v130_v51 = vpop.f32.mrf.mxu0 }
 0x755   :  { %v2257_v52 = vpop.eup %2256 }
 0x756   :  { %v508_v53 = vadd.f32 1.0, %v2257_v52  ;;  %v131_v52 = vadd.f32 %v2508_v13, %v130_v51 }
 0x758   :  { %2258 = vrcp.f32 %v508_v53  ;;  %v520_v59 = vand.u32 2147483648, %v508_v53  ;;  %vm514_vm14 = vweird.f32 %v508_v53  ;;  %v518_v60 = vand.u32 2147483647, %v508_v53 }
 0x75a   :  { %v521_v62 = vor.u32 1.1754944e-38, %v520_v59  ;;  %vm519_vm1 = vcmp.eq.f32.partialorder %v518_v60, 8.507059e+37 }
 0x75e   :  { %v2259_v54 = vpop.eup %2258 }
 0x75f   :  { %v510_v55 = vmul.f32 %v2259_v54, %v508_v53  ;;  %vm515_vm13 = vweird.f32 %v2259_v54 }
 0x760   :  { %vm516_vm15 = vmor %vm514_vm14, %vm515_vm13  ;;  %vm249_vm14 = vcmask 253952  }
 0x761   :  { %v511_v56 = vsub.f32 1.0, %v510_v55 }
 0x763   :  { %v512_v57 = vmul.f32 %v2259_v54, %v511_v56 }
 0x765   :  { %v513_v58 = vadd.f32 %v2259_v54, %v512_v57 }
 0x767   :  { %v517_v61 = vsel %vm516_vm15, %v2259_v54, %v513_v58 }
 0x768   :  { %v522_v0 = vsel %vm519_vm1, %v521_v62, %v517_v61 }
 0x769   :  { %v535_v5 = vsub.f32 1.0, %v522_v0  ;;  %v541_v8 = vmul.f32 %v522_v0, %v2547_v42 }
 0x7bb   :  { %v526_v63 = vpop.permute.xlu0 %525 }
 0x7bc   :  { %v528_v1 = vmul.f32 %v526_v63, %v522_v0 }
 0x7be   :  { %530 = vrot.lane.b32.xlu1 %v528_v1, %s2333_s28 }
 0x830   :  { %v531_v2 = vpop.permute.xlu1 %530 }
 0x831   :  { %v533_v3 = vadd.f32 %v531_v2, %v125_v48 }
 0x833   :  { %2260 = vtanh.f32 %v533_v3 }
 0x839   :  { %v2261_v4 = vpop.eup %2260 }
 0x83a   :  { %537 = vrot.lane.b32.xlu2 %v2261_v4, %s2334_s4 }
 0x894   :  { %v538_v6 = vpop.permute.xlu2 %537 }
 0x895   :  { %v540_v11 = vmul.f32 %v538_v6, %v535_v5 }
 0x897   :  { %v2562_v12 = vadd.f32 %v541_v8, %v540_v11 }
 0x899   :  { %591 = vrot.lane.b32.xlu0 %v2562_v12, %s2334_s4 }
 0x90b   :  { %v592_v15 = vpop.permute.xlu0 %591 }
 0x90c   :  { %2175 = vmatmul.msk.f32.vlgmr.msrb.gmra.mxu2 %vm73_vm0, %v592_v15 }
 0x98f   :  { %v612_v16 = vpop.f32.mrf.mxu2 }
 0x990   :  { %v613_v17 = vadd.f32 %v2501_v10, %v612_v16 }
 0x992   :  { %636 = vrot.lane.b32.xlu1 %v613_v17, %s2333_s28  ;;  %v615_v20 = vadd.f32 %v613_v17, %v128_v19 }
 0x994   :  { %v616_v21 = vsub.f32 0.0, %v615_v20 }
 0x996   :  { %v617_v22 = vmul.f32 1.442695, %v616_v21 }
 0x998   :  { %2262 = vpow2.f32 %v617_v22 }
 0x99e   :  { %v2263_v23 = vpop.eup %2262 }
 0x99f   :  { %v619_v24 = vadd.f32 1.0, %v2263_v23 }
 0x9a1   :  { %2264 = vrcp.f32 %v619_v24  ;;  %v631_v30 = vand.u32 2147483648, %v619_v24  ;;  %vm625_vm3 = vweird.f32 %v619_v24  ;;  %v629_v31 = vand.u32 2147483647, %v619_v24 }
 0x9a3   :  { %v632_v33 = vor.u32 1.1754944e-38, %v631_v30  ;;  %vm630_vm5 = vcmp.eq.f32.partialorder %v629_v31, 8.507059e+37 }
 0x9a7   :  { %v2265_v25 = vpop.eup %2264 }
 0x9a8   :  { %v621_v26 = vmul.f32 %v2265_v25, %v619_v24  ;;  %vm626_vm2 = vweird.f32 %v2265_v25 }
 0x9a9   :  { %vm627_vm4 = vmor %vm625_vm3, %vm626_vm2 }
 0x9aa   :  { %v622_v27 = vsub.f32 1.0, %v621_v26 }
 0x9ac   :  { %v623_v28 = vmul.f32 %v2265_v25, %v622_v27 }
 0x9ae   :  { %v624_v29 = vadd.f32 %v2265_v25, %v623_v28 }
 0x9b0   :  { %v628_v32 = vsel %vm627_vm4, %v2265_v25, %v624_v29  ;;  %vm1522_vm4 = vcmask 64512  }
 0x9b1   :  { %v633_v35 = vsel %vm630_vm5, %v632_v33, %v628_v32  ;;  %vm1529_vm5 = vcmask 130048  }
 0x9b2   :  { %v646_v41 = vsub.f32 1.0, %v633_v35  ;;  %v652_v44 = vmul.f32 %v633_v35, %v2562_v12 }
 0xa04   :  { %v637_v34 = vpop.permute.xlu1 %636 }
 0xa05   :  { %v639_v36 = vmul.f32 %v637_v34, %v633_v35 }
 0xa07   :  { %641 = vrot.lane.b32.xlu2 %v639_v36, %s2333_s28 }
 0xa61   :  { %v642_v37 = vpop.permute.xlu2 %641 }
 0xa62   :  { %v644_v38 = vadd.f32 %v642_v37, %v128_v19  ;;  %v63_v19 = vld [vmem:[%s3132_s27 + $0x30] sm:$0xff] }
 0xa63   :  { %2170 = vmatmul.msk.f32.gmra.mxu0 %vm73_vm0, %v63_v19 }
 0xa64   :  { %2266 = vtanh.f32 %v644_v38 }
 0xa6a   :  { %v2267_v39 = vpop.eup %2266 }
 0xa6b   :  { %648 = vrot.lane.b32.xlu0 %v2267_v39, %s2334_s4 }
 0xadd   :  { %v649_v43 = vpop.permute.xlu0 %648 }
 0xade   :  { %v651_v45 = vmul.f32 %v649_v43, %v646_v41 }
 0xae0   :  { %v2577_v46 = vadd.f32 %v652_v44, %v651_v45  ;;  %v133_v23 = vpop.f32.mrf.mxu0 }
 0xae1   :  { %v134_v24 = vadd.f32 %v2508_v13, %v133_v23  ;;  %v436_v23 = vrot.slane %v2547_v42, 4 }
 0xae2   :  { %702 = vrot.lane.b32.xlu1 %v2577_v46, %s2334_s4 }
 0xb54   :  { %v703_v48 = vpop.permute.xlu1 %702 }
 0xb55   :  { %2176 = vmatmul.msk.f32.vlgmr.msrb.gmra.mxu3 %vm73_vm0, %v703_v48 }
 0xbd8   :  { %v723_v49 = vpop.f32.mrf.mxu3 }
 0xbd9   :  { %v724_v50 = vadd.f32 %v2501_v10, %v723_v49 }
 0xbdb   :  { %747 = vrot.lane.b32.xlu2 %v724_v50, %s2333_s28  ;;  %v726_v53 = vadd.f32 %v724_v50, %v131_v52 }
 0xbdd   :  { %v727_v54 = vsub.f32 0.0, %v726_v53  ;;  %v434_v53 = vrot.slane %v2547_v42, 2 }
 0xbdf   :  { %v728_v55 = vmul.f32 1.442695, %v727_v54  ;;  %v442_v54 = vperm.slane %v434_v53, 0 }
 0xbe1   :  { %2268 = vpow2.f32 %v728_v55 }
 0xbe7   :  { %v2269_v56 = vpop.eup %2268 }
 0xbe8   :  { %v730_v57 = vadd.f32 1.0, %v2269_v56 }
 0xbea   :  { %2270 = vrcp.f32 %v730_v57  ;;  %v742_v63 = vand.u32 2147483648, %v730_v57  ;;  %vm736_vm7 = vweird.f32 %v730_v57  ;;  %v740_v0 = vand.u32 2147483647, %v730_v57 }
 0xbec   :  { %v743_v2 = vor.u32 1.1754944e-38, %v742_v63  ;;  %vm741_vm9 = vcmp.eq.f32.partialorder %v740_v0, 8.507059e+37  ;;  %v64_v63 = vld [vmem:[%s3132_s27 + $0x38] sm:$0xff] }
 0xbed   :  { %2171 = vmatmul.msk.f32.gmra.mxu0 %vm73_vm0, %v64_v63  ;;  %v435_v63 = vrot.slane %v2547_v42, 3 }
 0xbf0   :  { %v2271_v58 = vpop.eup %2270 }
 0xbf1   :  { %v732_v59 = vmul.f32 %v2271_v58, %v730_v57  ;;  %vm737_vm6 = vweird.f32 %v2271_v58  ;;  %v212_v57 = vrot.slane %v2513_v40, 3 }
 0xbf2   :  { %vm738_vm8 = vmor %vm736_vm7, %vm737_vm6  ;;  %vm1536_vm6 = vcmask 195584   ;;  %vm1549_vm7 = vcmask 326656  }
 0xbf3   :  { %v733_v60 = vsub.f32 1.0, %v732_v59  ;;  %v546_v59 = vrot.slane %v2562_v12, 3 }
 0xbf5   :  { %v734_v61 = vmul.f32 %v2271_v58, %v733_v60  ;;  %v554_v60 = vperm.slane %v546_v59, 0 }
 0xbf7   :  { %v735_v62 = vadd.f32 %v2271_v58, %v734_v61 }
 0xbf9   :  { %v739_v1 = vsel %vm738_vm8, %v2271_v58, %v735_v62  ;;  %v220_v58 = vperm.slane %v212_v57, 0  ;;  %v323_v57 = vrot.slane %v2532_v7, 2  ;;  %vm1566_vm8 = vcmask 392192  }
 0xbfa   :  { %v744_v4 = vsel %vm741_vm9, %v743_v2, %v739_v1  ;;  %vm1814_vm9 = vcmask 1041409  }
 0xbfb   :  { %v757_v14 = vsub.f32 1.0, %v744_v4  ;;  %v763_v16 = vmul.f32 %v744_v4, %v2577_v46  ;;  %v331_v59 = vperm.slane %v323_v57, 0 }
 0xc35   :  { %v748_v3 = vpop.permute.xlu2 %747 }
 0xc36   :  { %v750_v5 = vmul.f32 %v748_v3, %v744_v4 }
 0xc38   :  { %752 = vrot.lane.b32.xlu0 %v750_v5, %s2333_s28 }
 0xcaa   :  { %v753_v6 = vpop.permute.xlu0 %752 }
 0xcab   :  { %v755_v8 = vadd.f32 %v753_v6, %v131_v52 }
 0xcad   :  { %2272 = vtanh.f32 %v755_v8 }
 0xcb3   :  { %v2273_v11 = vpop.eup %2272 }
 0xcb4   :  { %759 = vrot.lane.b32.xlu1 %v2273_v11, %s2334_s4  ;;  %v211_v11 = vrot.slane %v2513_v40, 2 }
 0xd26   :  { %v760_v15 = vpop.permute.xlu1 %759 }
 0xd27   :  { %v762_v17 = vmul.f32 %v760_v15, %v757_v14  ;;  %v219_v14 = vperm.slane %v211_v11, 0  ;;  %v545_v15 = vrot.slane %v2562_v12, 2  ;;  %v547_v11 = vrot.slane %v2562_v12, 4 }
 0xd29   :  { %v2592_v18 = vadd.f32 %v763_v16, %v762_v17  ;;  %v553_v16 = vperm.slane %v545_v15, 0  ;;  %v555_v15 = vperm.slane %v547_v11, 0 }
 0xd2b   :  { %813 = vrot.lane.b32.xlu2 %v2592_v18, %s2334_s4  ;;  %v767_v55 = vrot.slane %v2592_v18, 2 }
 0xd2d   :  { %v775_v56 = vperm.slane %v767_v55, 0 }
 0xd85   :  { %v814_v20 = vpop.permute.xlu2 %813 }
 0xd86   :  { %2177 = vmatmul.msk.f32.vlgmr.msra.gmra.mxu1 %vm73_vm0, %v814_v20  ;;  %v324_v20 = vrot.slane %v2532_v7, 3 }
 0xe03   :  { %v834_v21 = vpop.f32.mrf.mxu1 }
 0xe04   :  { %v835_v22 = vadd.f32 %v2501_v10, %v834_v21  ;;  %v657_v21 = vrot.slane %v2577_v46, 3 }
 0xe06   :  { %858 = vrot.lane.b32.xlu0 %v835_v22, %s2333_s28  ;;  %v837_v25 = vadd.f32 %v835_v22, %v134_v24  ;;  %v665_v22 = vperm.slane %v657_v21, 0 }
 0xe08   :  { %v838_v26 = vsub.f32 0.0, %v837_v25  ;;  %v769_v25 = vrot.slane %v2592_v18, 4 }
 0xe0a   :  { %v839_v27 = vmul.f32 1.442695, %v838_v26  ;;  %v136_v26 = vpop.f32.mrf.mxu0 }
 0xe0c   :  { %2274 = vpow2.f32 %v839_v27  ;;  %v777_v27 = vperm.slane %v769_v25, 0  ;;  %v438_v25 = vrot.slane %v2547_v42, 6 }
 0xe12   :  { %v2275_v28 = vpop.eup %2274 }
 0xe13   :  { %v841_v29 = vadd.f32 1.0, %v2275_v28  ;;  %v2648_v28 = vadd.f32 %v2508_v13, %v136_v26 }
 0xe15   :  { %2276 = vrcp.f32 %v841_v29  ;;  %v853_v35 = vand.u32 2147483648, %v841_v29  ;;  %vm847_vm11 = vweird.f32 %v841_v29  ;;  %v851_v36 = vand.u32 2147483647, %v841_v29 }
 0xe17   :  { %v854_v38 = vor.u32 1.1754944e-38, %v853_v35  ;;  %vm852_vm13 = vcmp.eq.f32.partialorder %v851_v36, 8.507059e+37 }
 0xe1b   :  { %v2277_v30 = vpop.eup %2276 }
 0xe1c   :  { %v843_v31 = vmul.f32 %v2277_v30, %v841_v29  ;;  %vm848_vm10 = vweird.f32 %v2277_v30  ;;  %v214_v29 = vrot.slane %v2513_v40, 5 }
 0xe1d   :  { %vm849_vm12 = vmor %vm847_vm11, %vm848_vm10  ;;  %vm1817_vm10 = vcmask 1042434   ;;  %vm1820_vm11 = vcmask 1043459  }
 0xe1e   :  { %v844_v32 = vsub.f32 1.0, %v843_v31  ;;  %v222_v31 = vperm.slane %v214_v29, 0 }
 0xe20   :  { %v845_v33 = vmul.f32 %v2277_v30, %v844_v32 }
 0xe22   :  { %v846_v34 = vadd.f32 %v2277_v30, %v845_v33  ;;  %v548_v33 = vrot.slane %v2562_v12, 5 }
 0xe24   :  { %v850_v37 = vsel %vm849_vm12, %v2277_v30, %v846_v34  ;;  %v556_v35 = vperm.slane %v548_v33, 0  ;;  %vm1823_vm12 = vcmask 1044484  }
 0xe25   :  { %v855_v41 = vsel %vm852_vm13, %v854_v38, %v850_v37  ;;  %vm1826_vm13 = vcmask 1045509  }
 0xe26   :  { %v868_v48 = vsub.f32 1.0, %v855_v41  ;;  %v874_v50 = vmul.f32 %v855_v41, %v2592_v18 }
 0xe78   :  { %v859_v39 = vpop.permute.xlu0 %858 }
 0xe79   :  { %v861_v43 = vmul.f32 %v859_v39, %v855_v41  ;;  %v327_v39 = vrot.slane %v2532_v7, 6 }
 0xe7b   :  { %863 = vrot.lane.b32.xlu1 %v861_v43, %s2333_s28  ;;  %v335_v41 = vperm.slane %v327_v39, 0 }
 0xeed   :  { %v864_v44 = vpop.permute.xlu1 %863 }
 0xeee   :  { %v866_v45 = vadd.f32 %v864_v44, %v134_v24  ;;  %v444_v24 = vperm.slane %v436_v23, 0 }
 0xef0   :  { %2278 = vtanh.f32 %v866_v45 }
 0xef6   :  { %v2279_v47 = vpop.eup %2278 }
 0xef7   :  { %870 = vrot.lane.b32.xlu2 %v2279_v47, %s2334_s4 }
 0xf51   :  { %v871_v49 = vpop.permute.xlu2 %870 }
 0xf52   :  { %v873_v51 = vmul.f32 %v871_v49, %v868_v48 }
 0xf54   :  { %v2607_v52 = vadd.f32 %v874_v50, %v873_v51 }
 0xf56   :  { %924 = vrot.lane.b32.xlu0 %v2607_v52, %s2334_s4  ;;  %v879_v61 = vrot.slane %v2607_v52, 3  ;;  %v878_v17 = vrot.slane %v2607_v52, 2  ;;  %v881_v36 = vrot.slane %v2607_v52, 5 }
 0xf58   :  { %v887_v62 = vperm.slane %v879_v61, 0  ;;  %v886_v19 = vperm.slane %v878_v17, 0  ;;  %v889_v37 = vperm.slane %v881_v36, 0 }
 0xf5e   :  { %452 = vrot.lane.b32.xlu0 %v442_v54, %s2334_s4 }
 0xf66   :  { %785 = vrot.lane.b32.xlu0 %v775_v56, %s2334_s4 }
 0xf6e   :  { %231 = vrot.lane.b32.xlu0 %v220_v58, %s2334_s4 }
 0xf76   :  { %565 = vrot.lane.b32.xlu0 %v554_v60, %s2334_s4  ;;  %v656_v60 = vrot.slane %v2577_v46, 2 }
 0xf7e   :  { %898 = vrot.lane.b32.xlu0 %v887_v62, %s2334_s4  ;;  %v664_v62 = vperm.slane %v656_v60, 0  ;;  %v882_v60 = vrot.slane %v2607_v52, 6 }
 0xfc8   :  { %v925_v0 = vpop.permute.xlu0 %924 }
 0xfc9   :  { %2178 = vmatmul.msk.f32.vlgmr.msra.gmra.mxu2 %vm73_vm0, %v925_v0 }
 0xfd0   :  { %v453_v1 = vpop.permute.xlu0 %452 }
 0xfd1   :  { %474 = vst.msk [vmem:[#allocation2 + $0x12] sm:$0x1] %vm249_vm14, %v453_v1  ;;  %v443_v1 = vperm.slane %v435_v63, 0 }
 0xfd8   :  { %v786_v2 = vpop.permute.xlu0 %785 }
 0xfd9   :  { %807 = vst.msk [vmem:[#allocation2 + $0x15] sm:$0x1] %vm249_vm14, %v786_v2  ;;  %v768_v2 = vrot.slane %v2592_v18, 3 }
 0xfe0   :  { %v232_v3 = vpop.permute.xlu0 %231 }
 0xfe1   :  { %253 = vst.msk [vmem:[#allocation2 + $0x18] sm:$0x1] %vm249_vm14, %v232_v3 }
 0xfe8   :  { %v566_v4 = vpop.permute.xlu0 %565 }
 0xfe9   :  { %586 = vst.msk [vmem:[#allocation2 + $0x1b] sm:$0x1] %vm249_vm14, %v566_v4  ;;  %v776_v4 = vperm.slane %v768_v2, 0 }
 0xff0   :  { %v899_v5 = vpop.permute.xlu0 %898 }
 0xff1   :  { %919 = vst.msk [vmem:[#allocation2 + $0x1e] sm:$0x1] %vm249_vm14, %v899_v5  ;;  %v213_v5 = vrot.slane %v2513_v40, 4 }
0x104c   :  { %v945_v6 = vpop.f32.mrf.mxu2 }
0x104d   :  { %v946_v8 = vadd.f32 %v2501_v10, %v945_v6  ;;  %v332_v10 = vperm.slane %v324_v20, 0  ;;  %v326_v20 = vrot.slane %v2532_v7, 5 }
0x104f   :  { %969 = vrot.lane.b32.xlu1 %v946_v8, %s2333_s28  ;;  %v948_v30 = vadd.f32 %v946_v8, %v2648_v28  ;;  %v221_v8 = vperm.slane %v213_v5, 0  ;;  %v334_v21 = vperm.slane %v326_v20, 0  ;;  %v660_v20 = vrot.slane %v2577_v46, 6 }
0x1051   :  { %v949_v32 = vsub.f32 0.0, %v948_v30 }
0x1053   :  { %v950_v34 = vmul.f32 1.442695, %v949_v32 }
0x1055   :  { %2280 = vpow2.f32 %v950_v34  ;;  %v325_v34 = vrot.slane %v2532_v7, 4 }
0x1057   :  { %229 = vrot.lane.b32.xlu1 %v219_v14, %s2334_s4  ;;  %v333_v36 = vperm.slane %v325_v34, 0 }
0x105b   :  { %v2281_v13 = vpop.eup %2280 }
0x105c   :  { %v952_v38 = vadd.f32 1.0, %v2281_v13 }
0x105e   :  { %2282 = vrcp.f32 %v952_v38  ;;  %v964_v49 = vand.u32 2147483648, %v952_v38  ;;  %vm958_vm1 = vweird.f32 %v952_v38  ;;  %v962_v50 = vand.u32 2147483647, %v952_v38 }
0x105f   :  { %563 = vrot.lane.b32.xlu1 %v553_v16, %s2334_s4  ;;  %v880_v16 = vrot.slane %v2607_v52, 4 }
0x1060   :  { %v965_v53 = vor.u32 1.1754944e-38, %v964_v49  ;;  %vm963_vm3 = vcmp.eq.f32.partialorder %v962_v50, 8.507059e+37  ;;  %v1035_v50 = vld [vmem:[%s3133_s29] sm:$0xff] }
0x1061   :  { %2183 = vmatpush.xpose.msk.msrb.mxu2 %vm73_vm0, %v1035_v50  ;;  %2179 = vmatpush.xpose.msk.msra.mxu3 %vm73_vm0, %v1035_v50 }
0x1064   :  { %v2283_v43 = vpop.eup %2282 }
0x1065   :  { %v954_v44 = vmul.f32 %v2283_v43, %v952_v38  ;;  %vm959_vm15 = vweird.f32 %v2283_v43 }
0x1066   :  { %vm960_vm2 = vmor %vm958_vm1, %vm959_vm15 }
0x1067   :  { %896 = vrot.lane.b32.xlu1 %v886_v19, %s2334_s4  ;;  %v955_v45 = vsub.f32 1.0, %v954_v44  ;;  %v888_v19 = vperm.slane %v880_v16, 0 }
0x1069   :  { %v956_v47 = vmul.f32 %v2283_v43, %v955_v45 }
0x106b   :  { %v957_v48 = vadd.f32 %v2283_v43, %v956_v47  ;;  %v215_v47 = vrot.slane %v2513_v40, 6 }
0x106d   :  { %v961_v51 = vsel %vm960_vm2, %v2283_v43, %v957_v48  ;;  %v770_v43 = vrot.slane %v2592_v18, 5  ;;  %v223_v49 = vperm.slane %v215_v47, 0  ;;  %v766_v47 = vrot.slane %v2592_v18, 1 }
0x106e   :  { %v2659_v55 = vsel %vm963_vm3, %v965_v53, %v961_v51  ;;  %v1039_v51 = vld [vmem:[%s3133_s29 + $0x20] sm:$0xff]  ;;  %v1036_v53 = vld [vmem:[%s3133_s29 + $0x8] sm:$0xff] }
0x106f   :  { %343 = vrot.lane.b32.xlu1 %v332_v10, %s2334_s4  ;;  %v778_v45 = vperm.slane %v770_v43, 0  ;;  %2181 = vmatpush.xpose.msk.msrb.mxu1 %vm73_vm0, %v1036_v53 }
0x1070   :  { %2185 = vmatpush.xpose.msk.msrb.mxu3 %vm73_vm0, %v1036_v53  ;;  %2184 = vmatmul.msk.f32.vlgmr.msrb.gmra.mxu2 %vm73_vm0, %v1039_v51 }
0x1071   :  { %2189 = vmatpush.xpose.msk.msra.mxu2 %vm73_vm0, %v1036_v53 }
0x1073   :  { %2187 = vmatpush.xpose.msk.msra.mxu1 %vm73_vm0, %v1035_v50  ;;  %v774_v50 = vperm.slane %v766_v47, 0 }
0x1077   :  { %676 = vrot.lane.b32.xlu1 %v665_v22, %s2334_s4  ;;  %v659_v22 = vrot.slane %v2577_v46, 5 }
0x107f   :  { %456 = vrot.lane.b32.xlu1 %v444_v24, %s2334_s4  ;;  %v667_v24 = vperm.slane %v659_v22, 0 }
0x1087   :  { %789 = vrot.lane.b32.xlu1 %v777_v27, %s2334_s4  ;;  %v446_v27 = vperm.slane %v438_v25, 0  ;;  %v216_v25 = vrot.slane %v2513_v40, 7 }
0x108f   :  { %235 = vrot.lane.b32.xlu1 %v222_v31, %s2334_s4 }
0x1097   :  { %569 = vrot.lane.b32.xlu1 %v556_v35, %s2334_s4 }
0x109f   :  { %902 = vrot.lane.b32.xlu1 %v889_v37, %s2334_s4  ;;  %v658_v37 = vrot.slane %v2577_v46, 4 }
0x10a1   :  { %v666_v38 = vperm.slane %v658_v37, 0 }
0x10a7   :  { %349 = vrot.lane.b32.xlu1 %v335_v41, %s2334_s4 }
0x10c1   :  { %v970_v54 = vpop.permute.xlu1 %969 }
0x10c2   :  { %v972_v56 = vmul.f32 %v970_v54, %v2659_v55  ;;  %v1037_v54 = vld [vmem:[%s3133_s29 + $0x10] sm:$0xff] }
0x10c3   :  { %2180 = vmatmul.msk.f32.vlgmr.msra.gmra.mxu3 %vm73_vm0, %v1037_v54 }
0x10c4   :  { %974 = vrot.lane.b32.xlu2 %v972_v56, %s2333_s28  ;;  %v549_v56 = vrot.slane %v2562_v12, 6  ;;  %s2335_s28 = smov 16  }
0x10c9   :  { %v230_v58 = vpop.permute.xlu1 %229 }
0x10ca   :  { %252 = vst.msk [vmem:[#allocation2 + $0x10] sm:$0x1] %vm249_vm14, %v230_v58  ;;  %v557_v58 = vperm.slane %v549_v56, 0  ;;  %v322_v56 = vrot.slane %v2532_v7, 1 }
0x10cc   :  { %341 = vrot.lane.b32.xlu2 %v331_v59, %s2334_s4  ;;  %v1040_v59 = vld [vmem:[%s3133_s29 + $0x28] sm:$0xff] }
0x10cd   :  { %2186 = vmatmul.msk.f32.vlgmr.msrb.gmra.mxu3 %vm73_vm0, %v1040_v59  ;;  %v330_v59 = vperm.slane %v322_v56, 0 }
0x10d1   :  { %v564_v61 = vpop.permute.xlu1 %563 }
0x10d2   :  { %585 = vst.msk [vmem:[#allocation2 + $0x13] sm:$0x1] %vm249_vm14, %v564_v61 }
0x10d4   :  { %674 = vrot.lane.b32.xlu2 %v664_v62, %s2334_s4  ;;  %v890_v62 = vperm.slane %v882_v60, 0 }
0x10d9   :  { %v897_v0 = vpop.permute.xlu1 %896 }
0x10da   :  { %918 = vst.msk [vmem:[#allocation2 + $0x16] sm:$0x1] %vm249_vm14, %v897_v0 }
0x10dc   :  { %454 = vrot.lane.b32.xlu2 %v443_v1, %s2334_s4  ;;  %v979_v1 = vsub.f32 1.0, %v2659_v55 }
0x10e1   :  { %v344_v3 = vpop.permute.xlu1 %343 }
0x10e2   :  { %364 = vst.msk [vmem:[#allocation2 + $0x19] sm:$0x1] %vm249_vm14, %v344_v3  ;;  %v985_v3 = vmul.f32 %v2659_v55, %v2607_v52  ;;  %v328_v55 = vrot.slane %v2532_v7, 7 }
0x10e4   :  { %787 = vrot.lane.b32.xlu2 %v776_v4, %s2334_s4 }
0x10e9   :  { %v677_v6 = vpop.permute.xlu1 %676 }
0x10ea   :  { %697 = vst.msk [vmem:[#allocation2 + $0x1c] sm:$0x1] %vm249_vm14, %v677_v6 }
0x10ec   :  { %233 = vrot.lane.b32.xlu2 %v221_v8, %s2334_s4 }
0x10f1   :  { %v457_v14 = vpop.permute.xlu1 %456 }
0x10f2   :  { %476 = vst.msk [vmem:[#allocation2 + $0x22] sm:$0x1] %vm249_vm14, %v457_v14 }
0x10f4   :  { %567 = vrot.lane.b32.xlu2 %v555_v15, %s2334_s4 }
0x10f9   :  { %v790_v17 = vpop.permute.xlu1 %789 }
0x10fa   :  { %809 = vst.msk [vmem:[#allocation2 + $0x25] sm:$0x1] %vm249_vm14, %v790_v17 }
0x10fc   :  { %900 = vrot.lane.b32.xlu2 %v888_v19, %s2334_s4  ;;  %v771_v19 = vrot.slane %v2592_v18, 6 }
0x1101   :  { %v236_v10 = vpop.permute.xlu1 %235 }
0x1102   :  { %255 = vst.msk [vmem:[#allocation2 + $0x28] sm:$0x1] %vm249_vm14, %v236_v10  ;;  %v336_v10 = vperm.slane %v328_v55, 0  ;;  %v773_v55 = vperm.slane %v2592_v18, 0 }
0x1104   :  { %347 = vrot.lane.b32.xlu2 %v334_v21, %s2334_s4  ;;  %v779_v21 = vperm.slane %v771_v19, 0 }
0x1109   :  { %v570_v23 = vpop.permute.xlu1 %569 }
0x110a   :  { %588 = vst.msk [vmem:[#allocation2 + $0x2b] sm:$0x1] %vm249_vm14, %v570_v23  ;;  %v668_v23 = vperm.slane %v660_v20, 0 }
0x110c   :  { %680 = vrot.lane.b32.xlu2 %v667_v24, %s2334_s4  ;;  %v661_v24 = vrot.slane %v2577_v46, 7 }
0x1111   :  { %v903_v26 = vpop.permute.xlu1 %902 }
0x1112   :  { %921 = vst.msk [vmem:[#allocation2 + $0x2e] sm:$0x1] %vm249_vm14, %v903_v26  ;;  %v439_v26 = vrot.slane %v2547_v42, 7 }
0x1114   :  { %460 = vrot.lane.b32.xlu2 %v446_v27, %s2334_s4  ;;  %v669_v27 = vperm.slane %v661_v24, 0 }
0x1119   :  { %v350_v29 = vpop.permute.xlu1 %349 }
0x111a   :  { %367 = vst.msk [vmem:[#allocation2 + $0x31] sm:$0x1] %vm249_vm14, %v350_v29  ;;  %v224_v29 = vperm.slane %v216_v25, 0 }
0x111e   :  { %v975_v30 = vpop.permute.xlu2 %974 }
0x111f   :  { %v977_v31 = vadd.f32 %v975_v30, %v2648_v28  ;;  %v437_v28 = vrot.slane %v2547_v42, 5 }
0x1121   :  { %2284 = vtanh.f32 %v977_v31  ;;  %v445_v41 = vperm.slane %v437_v28, 0  ;;  %v447_v31 = vperm.slane %v439_v26, 0  ;;  %v550_v28 = vrot.slane %v2562_v12, 7 }
0x1123   :  { %v558_v43 = vperm.slane %v550_v28, 0 }
0x1126   :  { %v342_v32 = vpop.permute.xlu2 %341 }
0x1127   :  { %v2285_v33 = vpop.eup %2284  ;;  %363 = vst.msk [vmem:[#allocation2 + $0x11] sm:$0x1] %vm249_vm14, %v342_v32 }
0x1128   :  { %981 = vrot.lane.b32.xlu0 %v2285_v33, %s2334_s4 }
0x112e   :  { %v675_v35 = vpop.permute.xlu2 %674 }
0x112f   :  { %696 = vst.msk [vmem:[#allocation2 + $0x14] sm:$0x1] %vm249_vm14, %v675_v35 }
0x1130   :  { %345 = vrot.lane.b32.xlu0 %v333_v36, %s2334_s4 }
0x1136   :  { %v455_v13 = vpop.permute.xlu2 %454 }
0x1137   :  { %475 = vst.msk [vmem:[#allocation2 + $0x1a] sm:$0x1] %vm249_vm14, %v455_v13 }
0x1138   :  { %678 = vrot.lane.b32.xlu0 %v666_v38, %s2334_s4  ;;  %v433_v38 = vrot.slane %v2547_v42, 1 }
0x113e   :  { %v788_v39 = vpop.permute.xlu2 %787 }
0x113f   :  { %808 = vst.msk [vmem:[#allocation2 + $0x1d] sm:$0x1] %vm249_vm14, %v788_v39  ;;  %v772_v39 = vrot.slane %v2592_v18, 7 }
0x1140   :  { %458 = vrot.lane.b32.xlu0 %v445_v41, %s2334_s4  ;;  %v441_v41 = vperm.slane %v433_v38, 0 }
0x1146   :  { %v234_v44 = vpop.permute.xlu2 %233 }
0x1147   :  { %254 = vst.msk [vmem:[#allocation2 + $0x20] sm:$0x1] %vm249_vm14, %v234_v44 }
0x1148   :  { %791 = vrot.lane.b32.xlu0 %v778_v45, %s2334_s4  ;;  %v780_v45 = vperm.slane %v772_v39, 0 }
0x114e   :  { %v568_v48 = vpop.permute.xlu2 %567 }
0x114f   :  { %587 = vst.msk [vmem:[#allocation2 + $0x23] sm:$0x1] %vm249_vm14, %v568_v48  ;;  %v883_v48 = vrot.slane %v2607_v52, 7 }
0x1150   :  { %237 = vrot.lane.b32.xlu0 %v223_v49, %s2334_s4  ;;  %v210_v49 = vrot.slane %v2513_v40, 1 }
0x1151   :  { %v891_v51 = vperm.slane %v883_v48, 0 }
0x1152   :  { %v218_v54 = vperm.slane %v210_v49, 0 }
0x1156   :  { %v901_v57 = vpop.permute.xlu2 %900 }
0x1157   :  { %920 = vst.msk [vmem:[#allocation2 + $0x26] sm:$0x1] %vm249_vm14, %v901_v57  ;;  %v544_v57 = vrot.slane %v2562_v12, 1 }
0x1158   :  { %571 = vrot.lane.b32.xlu0 %v557_v58, %s2334_s4  ;;  %v217_v58 = vperm.slane %v2513_v40, 0  ;;  %v1198_v40 = vld [vmem:[%s3116_s6 + $0x18] sm:$0xff] }
0x1159   :  { %1229 = vmatpush.msra.mxu3 %v1198_v40 }
0x115e   :  { %v348_v61 = vpop.permute.xlu2 %347 }
0x115f   :  { %366 = vst.msk [vmem:[#allocation2 + $0x29] sm:$0x1] %vm249_vm14, %v348_v61  ;;  %v552_v61 = vperm.slane %v544_v57, 0 }
0x1160   :  { %904 = vrot.lane.b32.xlu0 %v890_v62, %s2334_s4  ;;  %v655_v62 = vrot.slane %v2577_v46, 1 }
0x1166   :  { %v681_v63 = vpop.permute.xlu2 %680 }
0x1167   :  { %699 = vst.msk [vmem:[#allocation2 + $0x2c] sm:$0x1] %vm249_vm14, %v681_v63  ;;  %v877_v63 = vrot.slane %v2607_v52, 1 }
0x116e   :  { %v461_v0 = vpop.permute.xlu2 %460 }
0x116f   :  { %478 = vst.msk [vmem:[#allocation2 + $0x32] sm:$0x1] %vm249_vm14, %v461_v0  ;;  %v551_v0 = vperm.slane %v2562_v12, 0  ;;  %v440_v12 = vperm.slane %v2547_v42, 0 }
0x119a   :  { %v982_v2 = vpop.permute.xlu0 %981 }
0x119b   :  { %v984_v4 = vmul.f32 %v982_v2, %v979_v1  ;;  %v663_v1 = vperm.slane %v655_v62, 0  ;;  %v885_v2 = vperm.slane %v877_v63, 0 }
0x119d   :  { %v2747_v5 = vadd.f32 %v985_v3, %v984_v4  ;;  %v1197_v3 = vld [vmem:[%s3116_s6 + $0x10] sm:$0xff]  ;;  %v884_v4 = vperm.slane %v2607_v52, 0  ;;  %v2822_v52 = vpop.f32.mrf.mxu2 }
0x119e   :  { %1230 = vmatpush.msra.mxu3 %v1197_v3 }
0x119f   :  { %v991_v6 = vrot.slane %v2747_v5, 4  ;;  %v989_v8 = vrot.slane %v2747_v5, 2  ;;  %v990_v11 = vrot.slane %v2747_v5, 3  ;;  %v994_v32 = vrot.slane %v2747_v5, 7 }
0x11a0   :  { %v992_v33 = vrot.slane %v2747_v5, 5  ;;  %v993_v34 = vrot.slane %v2747_v5, 6  ;;  %v988_v42 = vrot.slane %v2747_v5, 1  ;;  %v995_v19 = vperm.slane %v2747_v5, 0 }
0x11a1   :  { %v999_v14 = vperm.slane %v991_v6, 0  ;;  %v997_v15 = vperm.slane %v989_v8, 0  ;;  %v998_v16 = vperm.slane %v990_v11, 0  ;;  %v1002_v35 = vperm.slane %v994_v32, 0  ;;  %v1196_v6 = vld [vmem:[%s3116_s6 + $0x8] sm:$0xff]  ;;  %v1195_v11 = vld [vmem:[%s3116_s6] sm:$0xff] }
0x11a2   :  { %v346_v17 = vpop.permute.xlu0 %345  ;;  %v1000_v36 = vperm.slane %v992_v33, 0  ;;  %v1001_v13 = vperm.slane %v993_v34, 0  ;;  %v329_v8 = vperm.slane %v2532_v7, 0  ;;  %1231 = vmatpush.msra.mxu3 %v1196_v6  ;;  %v662_v7 = vperm.slane %v2577_v46, 0  ;;  %s2336_s6 = smov 8  }
0x11a3   :  { %365 = vst.msk [vmem:[#allocation2 + $0x21] sm:$0x1] %vm249_vm14, %v346_v17  ;;  %1011 = vrot.lane.b32.xlu0 %v999_v14, %s2334_s4  ;;  %1007 = vrot.lane.b32.xlu2 %v997_v15, %s2334_s4  ;;  %v1428_v14 = vrot.slane %v2822_v52, 2  ;;  %v996_v15 = vperm.slane %v988_v42, 0  ;;  %v1404_v46 = vrot.slane %v2822_v52, 1 }
0x11a4   :  { %1009 = vrot.lane.b32.xlu1 %v998_v16, %s2334_s4  ;;  %1232 = vmatpush.msra.mxu3 %v1195_v11  ;;  %v2830_v16 = vpop.f32.mrf.mxu3 }
0x11a5   :  { %v1402_v17 = vrot.slane %v2830_v16, 1  ;;  %v1426_v20 = vrot.slane %v2830_v16, 2 }
0x11aa   :  { %v679_v22 = vpop.permute.xlu0 %678 }
0x11ab   :  { %698 = vst.msk [vmem:[#allocation2 + $0x24] sm:$0x1] %vm249_vm14, %v679_v22  ;;  %351 = vrot.lane.b32.xlu0 %v336_v10, %s2334_s4  ;;  %793 = vrot.lane.b32.xlu2 %v779_v21, %s2334_s4  ;;  %v1038_v10 = vld [vmem:[%s3133_s29 + $0x18] sm:$0xff]  ;;  %v1041_v22 = vld [vmem:[%s3133_s29 + $0x30] sm:$0xff] }
0x11ac   :  { %682 = vrot.lane.b32.xlu1 %v668_v23, %s2334_s4  ;;  %2182 = vmatmul.msk.f32.vlgmr.msrb.gmra.mxu1 %vm73_vm0, %v1038_v10  ;;  %v2846_v18 = vpop.f32.mrf.mxu3  ;;  %v1042_v23 = vld [vmem:[%s3133_s29 + $0x38] sm:$0xff]  ;;  %s2337_s29 = smov 24  }
0x11ad   :  { %v1405_v21 = vrot.slane %v2846_v18, 1  ;;  %2190 = vmatmul.msk.f32.vlgmr.msra.gmra.mxu2 %vm73_vm0, %v1042_v23  ;;  %v1429_v26 = vrot.slane %v2846_v18, 2 }
0x11b2   :  { %v459_v30 = vpop.permute.xlu0 %458 }
0x11b3   :  { %477 = vst.msk [vmem:[#allocation2 + $0x2a] sm:$0x1] %vm249_vm14, %v459_v30  ;;  %684 = vrot.lane.b32.xlu0 %v669_v27, %s2334_s4  ;;  %239 = vrot.lane.b32.xlu2 %v224_v29, %s2334_s4 }
0x11b4   :  { %462 = vrot.lane.b32.xlu1 %v447_v31, %s2334_s4  ;;  %2188 = vmatmul.msk.f32.vlgmr.msra.gmra.mxu1 %vm73_vm0, %v1041_v22 }
0x11ba   :  { %v792_v37 = vpop.permute.xlu0 %791 }
0x11bb   :  { %810 = vst.msk [vmem:[#allocation2 + $0x2d] sm:$0x1] %vm249_vm14, %v792_v37  ;;  %1017 = vrot.lane.b32.xlu0 %v1002_v35, %s2334_s4  ;;  %1013 = vrot.lane.b32.xlu2 %v1000_v36, %s2334_s4 }
0x11bc   :  { %1015 = vrot.lane.b32.xlu1 %v1001_v13, %s2334_s4 }
0x11c2   :  { %v238_v44 = vpop.permute.xlu0 %237 }
0x11c3   :  { %256 = vst.msk [vmem:[#allocation2 + $0x30] sm:$0x1] %vm249_vm14, %v238_v44  ;;  %450 = vrot.lane.b32.xlu0 %v441_v41, %s2334_s4  ;;  %573 = vrot.lane.b32.xlu2 %v558_v43, %s2334_s4 }
0x11c4   :  { %795 = vrot.lane.b32.xlu1 %v780_v45, %s2334_s4 }
0x11ca   :  { %v572_v53 = vpop.permute.xlu0 %571 }
0x11cb   :  { %589 = vst.msk [vmem:[#allocation2 + $0x33] sm:$0x1] %vm249_vm14, %v572_v53  ;;  %783 = vrot.lane.b32.xlu0 %v774_v50, %s2334_s4  ;;  %906 = vrot.lane.b32.xlu2 %v891_v51, %s2334_s4 }
0x11cc   :  { %227 = vrot.lane.b32.xlu1 %v218_v54, %s2334_s4 }
0x11d2   :  { %v905_v60 = vpop.permute.xlu0 %904 }
0x11d3   :  { %922 = vst.msk [vmem:[#allocation2 + $0x36] sm:$0x1] %vm249_vm14, %v905_v60  ;;  %225 = vrot.lane.b32.xlu0 %v217_v58, %s2334_s4  ;;  %339 = vrot.lane.b32.xlu2 %v330_v59, %s2334_s4 }
0x11d4   :  { %561 = vrot.lane.b32.xlu1 %v552_v61, %s2334_s4 }
0x11db   :  { %559 = vrot.lane.b32.xlu0 %v551_v0, %s2334_s4  ;;  %672 = vrot.lane.b32.xlu2 %v663_v1, %s2334_s4 }
0x11dc   :  { %894 = vrot.lane.b32.xlu1 %v885_v2, %s2334_s4 }
0x11e3   :  { %892 = vrot.lane.b32.xlu0 %v884_v4, %s2334_s4  ;;  %448 = vrot.lane.b32.xlu2 %v440_v12, %s2334_s4 }
0x11e4   :  { %337 = vrot.lane.b32.xlu1 %v329_v8, %s2334_s4 }
0x11eb   :  { %1005 = vrot.lane.b32.xlu2 %v996_v15, %s2334_s4  ;;  %1436 = vrot.lane.b32.xlu0 %v1428_v14, %s2335_s28 }
0x11ec   :  { %670 = vrot.lane.b32.xlu1 %v662_v7, %s2334_s4 }
0x11f3   :  { %781 = vrot.lane.b32.xlu2 %v773_v55, %s2334_s4  ;;  %1408 = vrot.lane.b32.xlu0 %v1402_v17, %s2336_s6 }
0x11f4   :  { %1003 = vrot.lane.b32.xlu1 %v995_v19, %s2334_s4 }
0x11fb   :  { %1432 = vrot.lane.b32.xlu0 %v1426_v20, %s2335_s28  ;;  %1412 = vrot.lane.b32.xlu2 %v1404_v46, %s2336_s6 }
0x11fd   :  { %v1008_v5 = vpop.permute.xlu2 %1007 }
0x11fe   :  { %1029 = vst.msk [vmem:[#allocation2 + $0x17] sm:$0x1] %vm249_vm14, %v1008_v5 }
0x1203   :  { %1414 = vrot.lane.b32.xlu0 %v1405_v21, %s2336_s6 }
0x1205   :  { %v794_v24 = vpop.permute.xlu2 %793  ;;  %v1045_v25 = vld [vmem:[#allocation2 + $0x10] sm:$0xff] }
0x1206   :  { %811 = vst.msk [vmem:[#allocation2 + $0x35] sm:$0x1] %vm249_vm14, %v794_v24  ;;  %2191 = vmatmul.msk.f32.vlgmr.msra.gmra.mxu3 %vm73_vm0, %v1045_v25 }
0x120b   :  { %1438 = vrot.lane.b32.xlu0 %v1429_v26, %s2335_s28 }
0x120d   :  { %v240_v27 = vpop.permute.xlu2 %239 }
0x120e   :  { %257 = vst.msk [vmem:[#allocation2 + $0x38] sm:$0x1] %vm249_vm14, %v240_v27 }
0x1215   :  { %v1014_v29 = vpop.permute.xlu2 %1013  ;;  %v1012_v30 = vpop.permute.xlu0 %1011 }
0x1216   :  { %1032 = vst.msk [vmem:[#allocation2 + $0x2f] sm:$0x1] %vm249_vm14, %v1014_v29  ;;  %v1010_v31 = vpop.permute.xlu1 %1009 }
0x1217   :  { %1031 = vst.msk [vmem:[#allocation2 + $0x27] sm:$0x1] %vm249_vm14, %v1012_v30 }
0x1218   :  { %1030 = vst.msk [vmem:[#allocation2 + $0x1f] sm:$0x1] %vm249_vm14, %v1010_v31 }
0x121d   :  { %v574_v32 = vpop.permute.xlu2 %573  ;;  %v352_v33 = vpop.permute.xlu0 %351  ;;  %v1048_v43 = vld [vmem:[#allocation2 + $0x28] sm:$0xff] }
0x121e   :  { %590 = vst.msk [vmem:[#allocation2 + $0x3b] sm:$0x1] %vm249_vm14, %v574_v32  ;;  %v683_v34 = vpop.permute.xlu1 %682  ;;  %v1047_v38 = vld [vmem:[#allocation2 + $0x20] sm:$0xff] }
0x121f   :  { %368 = vst.msk [vmem:[#allocation2 + $0x39] sm:$0x1] %vm249_vm14, %v352_v33  ;;  %v1046_v35 = vld [vmem:[#allocation2 + $0x18] sm:$0xff] }
0x1220   :  { %700 = vst.msk [vmem:[#allocation2 + $0x34] sm:$0x1] %vm249_vm14, %v683_v34  ;;  %2192 = vmatmul.msk.f32.gmra.mxu3 %vm73_vm0, %v1046_v35 }
0x1225   :  { %v907_v36 = vpop.permute.xlu2 %906  ;;  %v685_v37 = vpop.permute.xlu0 %684 }
0x1226   :  { %923 = vst.msk [vmem:[#allocation2 + $0x3e] sm:$0x1] %vm249_vm14, %v907_v36  ;;  %v463_v13 = vpop.permute.xlu1 %462 }
0x1227   :  { %701 = vst.msk [vmem:[#allocation2 + $0x3c] sm:$0x1] %vm249_vm14, %v685_v37  ;;  %v1561_v37 = vld [vmem:[%s3117_s7 + $0x28] sm:$0xff] }
0x1228   :  { %479 = vst.msk [vmem:[#allocation2 + $0x3a] sm:$0x1] %vm249_vm14, %v463_v13  ;;  %2193 = vmatmul.msk.f32.gmra.mxu3 %vm73_vm0, %v1047_v38  ;;  %1580 = vmatpush.msrb.mxu0 %v1561_v37 }
0x1229   :  { %v2901_v40 = vpop.f32.mrf.mxu1 }
0x122a   :  { %v1403_v3 = vrot.slane %v2901_v40, 1  ;;  %v1427_v4 = vrot.slane %v2901_v40, 2 }
0x122c   :  { %1434 = vrot.lane.b32.xlu1 %v1427_v4, %s2335_s28  ;;  %1410 = vrot.lane.b32.xlu2 %v1403_v3, %s2336_s6 }
0x122d   :  { %v340_v28 = vpop.permute.xlu2 %339  ;;  %v1018_v39 = vpop.permute.xlu0 %1017 }
0x122e   :  { %362 = vst.msk [vmem:[#allocation2 + $0x9] sm:$0x1] %vm249_vm14, %v340_v28  ;;  %v1016_v41 = vpop.permute.xlu1 %1015 }
0x122f   :  { %1034 = vst.msk [vmem:[#allocation2 + $0x3f] sm:$0x1] %vm249_vm14, %v1018_v39 }
0x1230   :  { %1033 = vst.msk [vmem:[#allocation2 + $0x37] sm:$0x1] %vm249_vm14, %v1016_v41  ;;  %2194 = vmatmul.msk.f32.gmra.mxu3 %vm73_vm0, %v1048_v43  ;;  %v1192_v8 = vpop.f32.mrf.mxu2 }
0x1231   :  { %v2907_v12 = vpop.f32.mrf.mxu1  ;;  %v1407_v11 = vrot.slane %v1192_v8, 1  ;;  %v1431_v14 = vrot.slane %v1192_v8, 2 }
0x1232   :  { %v1430_v6 = vrot.slane %v2907_v12, 2  ;;  %v1406_v15 = vrot.slane %v2907_v12, 1 }
0x1234   :  { %1440 = vrot.lane.b32.xlu1 %v1430_v6, %s2335_s28  ;;  %1418 = vrot.lane.b32.xlu2 %v1407_v11, %s2336_s6 }
0x1235   :  { %v673_v44 = vpop.permute.xlu2 %672  ;;  %v451_v45 = vpop.permute.xlu0 %450 }
0x1236   :  { %695 = vst.msk [vmem:[#allocation2 + $0xc] sm:$0x1] %vm249_vm14, %v673_v44  ;;  %v796_v47 = vpop.permute.xlu1 %795  ;;  %v1560_v44 = vld [vmem:[%s3117_s7 + $0x20] sm:$0xff] }
0x1237   :  { %473 = vst.msk [vmem:[#allocation2 + $0xa] sm:$0x1] %vm249_vm14, %v451_v45  ;;  %v1049_v48 = vld [vmem:[#allocation2 + $0x30] sm:$0xff]  ;;  %v1559_v45 = vld [vmem:[%s3117_s7 + $0x18] sm:$0xff]  ;;  %1581 = vmatpush.msrb.mxu0 %v1560_v44 }
0x1238   :  { %812 = vst.msk [vmem:[#allocation2 + $0x3d] sm:$0x1] %vm249_vm14, %v796_v47  ;;  %2195 = vmatmul.msk.f32.gmra.mxu3 %vm73_vm0, %v1049_v48  ;;  %v1558_v47 = vld [vmem:[%s3117_s7 + $0x10] sm:$0xff]  ;;  %v1557_v48 = vld [vmem:[%s3117_s7 + $0x8] sm:$0xff] }
0x1239   :  { %1582 = vmatpush.msrb.mxu0 %v1559_v45 }
0x123b   :  { %1583 = vmatpush.msrb.mxu0 %v1558_v47 }
0x123c   :  { %1442 = vrot.lane.b32.xlu2 %v1431_v14, %s2335_s28 }
0x123d   :  { %v449_v49 = vpop.permute.xlu2 %448  ;;  %v784_v50 = vpop.permute.xlu0 %783  ;;  %1584 = vmatpush.msrb.mxu0 %v1557_v48 }
0x123e   :  { %472 = vst.msk [vmem:[#allocation2 + $0x2] sm:$0x1] %vm249_vm14, %v449_v49  ;;  %v228_v51 = vpop.permute.xlu1 %227  ;;  %v1556_v49 = vld [vmem:[%s3117_s7] sm:$0xff] }
0x123f   :  { %806 = vst.msk [vmem:[#allocation2 + $0xd] sm:$0x1] %vm249_vm14, %v784_v50  ;;  %v1050_v53 = vld [vmem:[#allocation2 + $0x38] sm:$0xff]  ;;  %1585 = vmatpush.msrb.mxu0 %v1556_v49 }
0x1240   :  { %251 = vst.msk [vmem:[#allocation2 + $0x8] sm:$0x1] %vm249_vm14, %v228_v51  ;;  %2196 = vmatmul.msk.f32.gmra.mxu3 %vm73_vm0, %v1050_v53 }
0x1241   :  { %1649 = vmatpush.msra.mxu0 %v1561_v37 }
0x1243   :  { %1650 = vmatpush.msra.mxu0 %v1560_v44 }
0x1244   :  { %1416 = vrot.lane.b32.xlu2 %v1406_v15, %s2336_s6 }
0x1245   :  { %v1006_v54 = vpop.permute.xlu2 %1005  ;;  %v226_v56 = vpop.permute.xlu0 %225  ;;  %1651 = vmatpush.msra.mxu0 %v1559_v45 }
0x1246   :  { %1028 = vst.msk [vmem:[#allocation2 + $0xf] sm:$0x1] %vm249_vm14, %v1006_v54  ;;  %v562_v57 = vpop.permute.xlu1 %561 }
0x1247   :  { %250 = vst.msk [vmem:[#allocation2] sm:$0x1] %vm249_vm14, %v226_v56  ;;  %1652 = vmatpush.msra.mxu0 %v1558_v47 }
0x1248   :  { %584 = vst.msk [vmem:[#allocation2 + $0xb] sm:$0x1] %vm249_vm14, %v562_v57 }
0x1249   :  { %1653 = vmatpush.msra.mxu0 %v1557_v48 }
0x124b   :  { %1654 = vmatpush.msra.mxu0 %v1556_v49 }
0x124d   :  { %v782_v58 = vpop.permute.xlu2 %781  ;;  %v560_v59 = vpop.permute.xlu0 %559 }
0x124e   :  { %805 = vst.msk [vmem:[#allocation2 + $0x5] sm:$0x1] %vm249_vm14, %v782_v58  ;;  %v895_v60 = vpop.permute.xlu1 %894 }
0x124f   :  { %583 = vst.msk [vmem:[#allocation2 + $0x3] sm:$0x1] %vm249_vm14, %v560_v59 }
0x1250   :  { %917 = vst.msk [vmem:[#allocation2 + $0xe] sm:$0x1] %vm249_vm14, %v895_v60 }
0x1255   :  { %v893_v61 = vpop.permute.xlu0 %892  ;;  %v2923_v20 = vpop.permute.xlu2 %1412 }
0x1256   :  { %916 = vst.msk [vmem:[#allocation2 + $0x6] sm:$0x1] %vm249_vm14, %v893_v61  ;;  %v338_v62 = vpop.permute.xlu1 %337 }
0x1257   :  { %361 = vst.msk [vmem:[#allocation2 + $0x1] sm:$0x1] %vm249_vm14, %v338_v62  ;;  %v1044_v63 = vld [vmem:[#allocation2 + $0x8] sm:$0xff] }
0x1258   :  { %2199 = vmatpush.xpose.msk.msrb.mxu2 %vm73_vm0, %v1044_v63 }
0x125c   :  { %2203 = vmatpush.xpose.msk.msra.mxu2 %vm73_vm0, %v1044_v63 }
0x125d   :  { %v1437_v50 = vpop.permute.xlu0 %1436 }
0x125e   :  { %v671_v0 = vpop.permute.xlu1 %670 }
0x125f   :  { %694 = vst.msk [vmem:[#allocation2 + $0x4] sm:$0x1] %vm249_vm14, %v671_v0 }
0x1265   :  { %v1409_v53 = vpop.permute.xlu0 %1408 }
0x1266   :  { %v1004_v1 = vpop.permute.xlu1 %1003  ;;  %v1523_v59 = vsel %vm1522_vm4, %v2830_v16, %v1409_v53  ;;  %v1525_v16 = vsel %vm1522_vm4, %v2822_v52, %v2923_v20 }
0x1267   :  { %1027 = vst.msk [vmem:[#allocation2 + $0x7] sm:$0x1] %vm249_vm14, %v1004_v1 }
0x126d   :  { %v1433_v58 = vpop.permute.xlu0 %1432 }
0x126e   :  { %v1043_v2 = vld [vmem:[#allocation2] sm:$0xff]  ;;  %v1530_v61 = vsel %vm1529_vm5, %v1523_v59, %v1433_v58 }
0x126f   :  { %2197 = vmatpush.xpose.msk.msrb.mxu1 %vm73_vm0, %v1043_v2 }
0x1273   :  { %2201 = vmatpush.xpose.msk.msra.mxu1 %vm73_vm0, %v1043_v2 }
0x1286   :  { %v2925_v10 = vpop.permute.xlu2 %1410 }
0x1289   :  { %v1234_v42 = vpop.f32.mrf.mxu3 }
0x128a   :  { %2198 = vmatmul.msk.f32.vlgmr.msrb.gmra.mxu1 %vm73_vm0, %v1234_v42 }
0x128b   :  { %2205 = vmatpush.xpose.msk.msrb.mxu1 %vm73_vm0, %v1043_v2  ;;  %v1415_v2 = vpop.permute.xlu0 %1414 }
0x128e   :  { %v1419_v5 = vpop.permute.xlu2 %1418 }
0x128f   :  { %v1528_v21 = vsel %vm1522_vm4, %v1192_v8, %v1419_v5  ;;  %v1532_v8 = vsel %vm1529_vm5, %v1525_v16, %v1437_v50 }
0x1293   :  { %v1439_v3 = vpop.permute.xlu0 %1438 }
0x1296   :  { %v1443_v22 = vpop.permute.xlu2 %1442 }
0x1297   :  { %v2929_v23 = vsel %vm1529_vm5, %v1528_v21, %v1443_v22 }
0x129e   :  { %v1435_v51 = vpop.permute.xlu1 %1434  ;;  %v1417_v56 = vpop.permute.xlu2 %1416 }
0x12a3   :  { %v1237_v7 = vpop.f32.mrf.mxu3 }
0x12a4   :  { %2200 = vmatmul.msk.f32.vlgmr.msrb.gmra.mxu2 %vm73_vm0, %v1237_v7 }
0x12a5   :  { %2207 = vmatpush.xpose.msk.msrb.mxu2 %vm73_vm0, %v1044_v63 }
0x12a6   :  { %v1441_v54 = vpop.permute.xlu1 %1440 }
0x12ab   :  { %v1240_v17 = vpop.f32.mrf.mxu3 }
0x12ac   :  { %2202 = vmatmul.msk.f32.vlgmr.msra.gmra.mxu1 %vm73_vm0, %v1240_v17  ;;  %v1524_v17 = vsel %vm1522_vm4, %v2901_v40, %v2925_v10  ;;  %v1526_v40 = vsel %vm1522_vm4, %v2846_v18, %v1415_v2 }
0x12ad   :  { %1603 = vmatpush.msra.mxu1 %v1561_v37 }
0x12af   :  { %1604 = vmatpush.msra.mxu1 %v1560_v44 }
0x12b1   :  { %1605 = vmatpush.msra.mxu1 %v1559_v45 }
0x12b3   :  { %v1243_v55 = vpop.f32.mrf.mxu3  ;;  %1606 = vmatpush.msra.mxu1 %v1558_v47 }
0x12b4   :  { %2204 = vmatmul.msk.f32.vlgmr.msra.gmra.mxu2 %vm73_vm0, %v1243_v55 }
0x12b5   :  { %1626 = vmatpush.msra.mxu2 %v1561_v37  ;;  %1607 = vmatpush.msra.mxu1 %v1557_v48 }
0x12b7   :  { %1627 = vmatpush.msra.mxu2 %v1560_v44  ;;  %1608 = vmatpush.msra.mxu1 %v1556_v49 }
0x12b9   :  { %1628 = vmatpush.msra.mxu2 %v1559_v45 }
0x12bb   :  { %v1246_v19 = vpop.f32.mrf.mxu3  ;;  %1629 = vmatpush.msra.mxu2 %v1558_v47 }
0x12bc   :  { %2206 = vmatmul.msk.f32.vlgmr.msrb.gmra.mxu1 %vm73_vm0, %v1246_v19  ;;  %v1531_v19 = vsel %vm1529_vm5, %v1524_v17, %v1435_v51 }
0x12bd   :  { %1630 = vmatpush.msra.mxu2 %v1557_v48  ;;  %1672 = vmatpush.msrb.mxu1 %v1561_v37 }
0x12bf   :  { %1631 = vmatpush.msra.mxu2 %v1556_v49  ;;  %1673 = vmatpush.msrb.mxu1 %v1560_v44 }
0x12c1   :  { %1674 = vmatpush.msrb.mxu1 %v1559_v45 }
0x12c3   :  { %v1249_v46 = vpop.f32.mrf.mxu3  ;;  %1675 = vmatpush.msrb.mxu1 %v1558_v47 }
0x12c4   :  { %2208 = vmatmul.msk.f32.vlgmr.msrb.gmra.mxu2 %vm73_vm0, %v1249_v46 }
0x12c5   :  { %1695 = vmatpush.msrb.mxu2 %v1561_v37  ;;  %1676 = vmatpush.msrb.mxu1 %v1557_v48 }
0x12c7   :  { %1696 = vmatpush.msrb.mxu2 %v1560_v44  ;;  %1677 = vmatpush.msrb.mxu1 %v1556_v49 }
0x12c9   :  { %1697 = vmatpush.msrb.mxu2 %v1559_v45 }
0x12cb   :  { %1698 = vmatpush.msrb.mxu2 %v1558_v47 }
0x12cd   :  { %1699 = vmatpush.msrb.mxu2 %v1557_v48 }
0x12cf   :  { %1700 = vmatpush.msrb.mxu2 %v1556_v49 }
0x1307   :  { %v1275_v24 = vpop.f32.mrf.mxu1 }
0x1308   :  { %v1474_v25 = vrot.slane %v1275_v24, 1  ;;  %1456 = vrot.lane.b32.xlu2 %v1275_v24, %s2337_s29  ;;  %v1498_v26 = vrot.slane %v1275_v24, 2  ;;  %v1533_v24 = vsel %vm1529_vm5, %v1526_v40, %v1439_v3 }
0x130a   :  { %1480 = vrot.lane.b32.xlu1 %v1474_v25, %s2338_s20 }
0x1312   :  { %1504 = vrot.lane.b32.xlu1 %v1498_v26, %s2339_s21 }
0x1327   :  { %v1301_v27 = vpop.f32.mrf.mxu2 }
0x1328   :  { %1458 = vrot.lane.b32.xlu0 %v1301_v27, %s2337_s29  ;;  %v1475_v31 = vrot.slane %v1301_v27, 1  ;;  %v1499_v33 = vrot.slane %v1301_v27, 2 }
0x1329   :  { %v1324_v29 = vpop.f32.mrf.mxu1 }
0x132a   :  { %v1476_v30 = vrot.slane %v1324_v29, 1  ;;  %1460 = vrot.lane.b32.xlu1 %v1324_v29, %s2337_s29  ;;  %v1500_v32 = vrot.slane %v1324_v29, 2 }
0x132c   :  { %1484 = vrot.lane.b32.xlu2 %v1476_v30, %s2338_s20 }
0x1330   :  { %1482 = vrot.lane.b32.xlu0 %v1475_v31, %s2338_s20 }
0x1332   :  { %1508 = vrot.lane.b32.xlu1 %v1500_v32, %s2339_s21 }
0x1337   :  { %v1347_v34 = vpop.f32.mrf.mxu2 }
0x1338   :  { %v1477_v35 = vrot.slane %v1347_v34, 1  ;;  %1506 = vrot.lane.b32.xlu0 %v1499_v33, %s2339_s21  ;;  %1462 = vrot.lane.b32.xlu2 %v1347_v34, %s2337_s29  ;;  %v1501_v13 = vrot.slane %v1347_v34, 2  ;;  %v1527_v34 = vsel %vm1522_vm4, %v2907_v12, %v1417_v56  ;;  %v2233_v12 = vld [vmem:[%s3118_s8] ss:$0 sm:$0xff] }
0x1339   :  { %v1370_v36 = vpop.f32.mrf.mxu1 }
0x133a   :  { %1486 = vrot.lane.b32.xlu1 %v1477_v35, %s2338_s20  ;;  %v1478_v41 = vrot.slane %v1370_v36, 1  ;;  %v1502_v43 = vrot.slane %v1370_v36, 2 }
0x1340   :  { %1464 = vrot.lane.b32.xlu0 %v1370_v36, %s2337_s29  ;;  %v1534_v36 = vsel %vm1529_vm5, %v1527_v34, %v1441_v54 }
0x1347   :  { %v1393_v38 = vpop.f32.mrf.mxu2 }
0x1348   :  { %v1479_v28 = vrot.slane %v1393_v38, 1  ;;  %1466 = vrot.lane.b32.xlu1 %v1393_v38, %s2337_s29  ;;  %1510 = vrot.lane.b32.xlu0 %v1501_v13, %s2339_s21  ;;  %v1503_v39 = vrot.slane %v1393_v38, 2  ;;  %s2342_s29 = smov [#allocation3]  }
0x134a   :  { %1490 = vrot.lane.b32.xlu2 %v1479_v28, %s2338_s20 }
0x1350   :  { %1514 = vrot.lane.b32.xlu1 %v1503_v39, %s2339_s21 }
0x1352   :  { %1488 = vrot.lane.b32.xlu2 %v1478_v41, %s2338_s20 }
0x1358   :  { %1512 = vrot.lane.b32.xlu1 %v1502_v43, %s2339_s21 }
0x1362   :  { %v1457_v60 = vpop.permute.xlu2 %1456 }
0x1363   :  { %v1537_v62 = vsel %vm1536_vm6, %v1530_v61, %v1457_v60 }
0x137c   :  { %v1481_v57 = vpop.permute.xlu1 %1480 }
0x137d   :  { %v1543_v63 = vsel %vm73_vm0, %v1537_v62, %v1481_v57 }
0x1384   :  { %v1505_v0 = vpop.permute.xlu1 %1504 }
0x1385   :  { %v1550_v1 = vsel %vm1549_vm7, %v1543_v63, %v1505_v0 }
0x1386   :  { %2209 = vmatmul.msk.f32.vlgmr.msrb.gmra.mxu0 %vm1566_vm8, %v1550_v1  ;;  %v1485_v14 = vpop.permute.xlu2 %1484 }
0x1392   :  { %v1463_v10 = vpop.permute.xlu2 %1462 }
0x1393   :  { %v1540_v25 = vsel %vm1536_vm6, %v1533_v24, %v1463_v10  ;;  %v1852_v24 = vld [vmem:[%s3119_s9 + $0x18] sm:$0xff] }
0x1394   :  { %1872 = vmatpush.msrb.mxu3 %v1852_v24 }
0x139a   :  { %v1459_v4 = vpop.permute.xlu0 %1458 }
0x139b   :  { %v1538_v52 = vsel %vm1536_vm6, %v1531_v19, %v1459_v4 }
0x139c   :  { %v1461_v6 = vpop.permute.xlu1 %1460 }
0x139d   :  { %v1539_v11 = vsel %vm1536_vm6, %v1532_v8, %v1461_v6 }
0x139e   :  { %v1545_v15 = vsel %vm73_vm0, %v1539_v11, %v1485_v14 }
0x13a2   :  { %v1483_v42 = vpop.permute.xlu0 %1482 }
0x13a3   :  { %v1544_v46 = vsel %vm73_vm0, %v1538_v52, %v1483_v42 }
0x13a4   :  { %v1509_v7 = vpop.permute.xlu1 %1508  ;;  %v1491_v31 = vpop.permute.xlu2 %1490 }
0x13a5   :  { %v1552_v55 = vsel %vm1549_vm7, %v1545_v15, %v1509_v7 }
0x13a6   :  { %2211 = vmatmul.msk.f32.vlgmr.msra.gmra.mxu2 %vm1566_vm8, %v1552_v55 }
0x13aa   :  { %v1507_v20 = vpop.permute.xlu0 %1506 }
0x13ab   :  { %v1551_v5 = vsel %vm1549_vm7, %v1544_v46, %v1507_v20 }
0x13ac   :  { %2210 = vmatmul.msk.f32.vlgmr.msra.gmra.mxu1 %vm1566_vm8, %v1551_v5  ;;  %v1487_v21 = vpop.permute.xlu1 %1486  ;;  %v1489_v13 = vpop.permute.xlu2 %1488 }
0x13ad   :  { %v1546_v26 = vsel %vm73_vm0, %v1540_v25, %v1487_v21  ;;  %v1851_v25 = vld [vmem:[%s3119_s9 + $0x10] sm:$0xff] }
0x13ae   :  { %1873 = vmatpush.msrb.mxu3 %v1851_v25 }
0x13b2   :  { %v1465_v22 = vpop.permute.xlu0 %1464 }
0x13b3   :  { %v1541_v37 = vsel %vm1536_vm6, %v1534_v36, %v1465_v22 }
0x13b4   :  { %v1547_v38 = vsel %vm73_vm0, %v1541_v37, %v1489_v13 }
0x13ba   :  { %v1511_v27 = vpop.permute.xlu0 %1510  ;;  %v1467_v29 = vpop.permute.xlu1 %1466 }
0x13bb   :  { %v1553_v30 = vsel %vm1549_vm7, %v1546_v26, %v1511_v27  ;;  %v1542_v32 = vsel %vm1536_vm6, %v2929_v23, %v1467_v29 }
0x13bc   :  { %2212 = vmatmul.msk.f32.vlgmr.msra.gmra.mxu0 %vm1566_vm8, %v1553_v30  ;;  %v1548_v33 = vsel %vm73_vm0, %v1542_v32, %v1491_v31 }
0x13c2   :  { %v1515_v18 = vpop.permute.xlu1 %1514 }
0x13c3   :  { %v1555_v35 = vsel %vm1549_vm7, %v1548_v33, %v1515_v18 }
0x13c4   :  { %2214 = vmatmul.msk.f32.vlgmr.msrb.gmra.mxu2 %vm1566_vm8, %v1555_v35 }
0x13ca   :  { %v1513_v28 = vpop.permute.xlu1 %1512 }
0x13cb   :  { %v1554_v23 = vsel %vm1549_vm7, %v1547_v38, %v1513_v28 }
0x13cc   :  { %2213 = vmatmul.msk.f32.vlgmr.msrb.gmra.mxu1 %vm1566_vm8, %v1554_v23 }
0x1403   :  { %v1587_v39 = vpop.f32.mrf.mxu0 }
0x1404   :  { %v1588_v41 = vadd.f32 %v2233_v12, %v1587_v39 }
0x1406   :  { %v1705_v43 = vmax.f32 %v1588_v41, 0.0 }
0x1408   :  { %v1717_v44 = vrot.slane %v1705_v43, 1  ;;  %v1735_v47 = vrot.slane %v1705_v43, 2 }
0x140a   :  { %v1729_v45 = vmax.f32 %v1705_v43, %v1717_v44 }
0x140c   :  { %v3012_v48 = vmax.f32 %v1729_v45, %v1735_v47 }
0x140e   :  { %1783 = vrot.lane.b32.xlu2 %v3012_v48, %s2340_s19  ;;  %1759 = vrot.lane.b32.xlu0 %v3012_v48, %s2341_s1 }
0x1429   :  { %v1610_v49 = vpop.f32.mrf.mxu1  ;;  %v1633_v50 = vpop.f32.mrf.mxu2 }
0x142a   :  { %v1611_v51 = vadd.f32 %v2233_v12, %v1610_v49  ;;  %v1634_v53 = vadd.f32 %v2233_v12, %v1633_v50 }
0x142c   :  { %v1706_v54 = vmax.f32 %v1611_v51, 0.0  ;;  %v1707_v56 = vmax.f32 %v1634_v53, 0.0 }
0x142e   :  { %v1718_v57 = vrot.slane %v1706_v54, 1  ;;  %v1719_v58 = vrot.slane %v1707_v56, 1  ;;  %v1736_v60 = vrot.slane %v1706_v54, 2  ;;  %v1737_v62 = vrot.slane %v1707_v56, 2 }
0x1430   :  { %v1730_v59 = vmax.f32 %v1706_v54, %v1718_v57  ;;  %v1731_v61 = vmax.f32 %v1707_v56, %v1719_v58 }
0x1432   :  { %v1748_v63 = vmax.f32 %v1730_v59, %v1736_v60  ;;  %v1749_v0 = vmax.f32 %v1731_v61, %v1737_v62 }
0x1434   :  { %1761 = vrot.lane.b32.xlu2 %v1748_v63, %s2341_s1  ;;  %1785 = vrot.lane.b32.xlu0 %v1748_v63, %s2340_s19 }
0x1435   :  { %1763 = vrot.lane.b32.xlu1 %v1749_v0, %s2341_s1 }
0x1439   :  { %v1656_v1 = vpop.f32.mrf.mxu0 }
0x143a   :  { %v1657_v2 = vadd.f32 %v2233_v12, %v1656_v1 }
0x143c   :  { %v1708_v3 = vmax.f32 %v1657_v2, 0.0  ;;  %1787 = vrot.lane.b32.xlu0 %v1749_v0, %s2340_s19 }
0x143e   :  { %v1720_v4 = vrot.slane %v1708_v3, 1  ;;  %v1738_v16 = vrot.slane %v1708_v3, 2 }
0x1440   :  { %v1732_v6 = vmax.f32 %v1708_v3, %v1720_v4 }
0x1442   :  { %v1750_v8 = vmax.f32 %v1732_v6, %v1738_v16  ;;  %v1850_v6 = vld [vmem:[%s3119_s9 + $0x8] sm:$0xff]  ;;  %v1849_v16 = vld [vmem:[%s3119_s9] sm:$0xff] }
0x1443   :  { %1874 = vmatpush.msrb.mxu3 %v1850_v6 }
0x1444   :  { %1765 = vrot.lane.b32.xlu2 %v1750_v8, %s2341_s1 }
0x1445   :  { %1875 = vmatpush.msrb.mxu3 %v1849_v16 }
0x1447   :  { %v1702_v11 = vpop.f32.mrf.mxu2 }
0x1448   :  { %v1703_v14 = vadd.f32 %v2233_v12, %v1702_v11  ;;  %v1910_v11 = vld [vmem:[%s3122_s12] sm:$0xff] }
0x1449   :  { %v1679_v42 = vpop.f32.mrf.mxu1 }
0x144a   :  { %v1680_v15 = vadd.f32 %v2233_v12, %v1679_v42  ;;  %v1710_v17 = vmax.f32 %v1703_v14, 0.0 }
0x144c   :  { %v1709_v7 = vmax.f32 %v1680_v15, 0.0  ;;  %1789 = vrot.lane.b32.xlu2 %v1750_v8, %s2340_s19  ;;  %v1722_v46 = vrot.slane %v1710_v17, 1  ;;  %v1740_v21 = vrot.slane %v1710_v17, 2 }
0x144e   :  { %v1721_v55 = vrot.slane %v1709_v7, 1  ;;  %v1739_v52 = vrot.slane %v1709_v7, 2  ;;  %v1734_v5 = vmax.f32 %v1710_v17, %v1722_v46 }
0x1450   :  { %v1733_v19 = vmax.f32 %v1709_v7, %v1721_v55  ;;  %v1752_v22 = vmax.f32 %v1734_v5, %v1740_v21  ;;  %v1882_v55 = vld [vmem:[%s3121_s11 + $0x8] sm:$0xff] }
0x1451   :  { %1904 = vmatpush.msrb.mxu0 %v1882_v55 }
0x1452   :  { %v1751_v20 = vmax.f32 %v1733_v19, %v1739_v52  ;;  %v1881_v19 = vld [vmem:[%s3121_s11] sm:$0xff] }
0x1453   :  { %1905 = vmatpush.msrb.mxu0 %v1881_v19 }
0x1454   :  { %1791 = vrot.lane.b32.xlu0 %v1751_v20, %s2340_s19  ;;  %1767 = vrot.lane.b32.xlu1 %v1751_v20, %s2341_s1 }
0x145c   :  { %1769 = vrot.lane.b32.xlu1 %v1752_v22, %s2341_s1 }
0x1464   :  { %1793 = vrot.lane.b32.xlu1 %v1752_v22, %s2340_s19 }
0x1468   :  { %v1784_v40 = vpop.permute.xlu2 %1783 }
0x1480   :  { %v1760_v10 = vpop.permute.xlu0 %1759 }
0x1481   :  { %v1777_v33 = vmax.f32 %v3012_v48, %v1760_v10 }
0x1483   :  { %v1801_v38 = vmax.f32 %v1777_v33, %v1784_v40  ;;  %v2236_v40 = vld [vmem:[%s3123_s13] ss:$0 sm:$0xff] }
0x1485   :  { %v1832_v47 = vrot.slane %v1801_v38, 3 }
0x148e   :  { %v1762_v26 = vpop.permute.xlu2 %1761 }
0x148f   :  { %v1778_v18 = vmax.f32 %v1748_v63, %v1762_v26 }
0x149e   :  { %v1766_v30 = vpop.permute.xlu2 %1765 }
0x149f   :  { %v1780_v23 = vmax.f32 %v1750_v8, %v1766_v30  ;;  %v1911_v8 = vld [vmem:[%s3122_s12 + $0x8] sm:$0xff] }
0x14a0   :  { %1932 = vmatpush.msra.mxu1 %v1911_v8  ;;  %1996 = vmatpush.msra.mxu2 %v1911_v8 }
0x14a1   :  { %2065 = vmatpush.msra.mxu3 %v1911_v8 }
0x14a2   :  { %1933 = vmatpush.msra.mxu1 %v1910_v11  ;;  %1997 = vmatpush.msra.mxu2 %v1910_v11 }
0x14a3   :  { %1934 = vmatmul.f32.vlgmr.msra.gmra.mxu1 %v2332_v9  ;;  %2066 = vmatpush.msra.mxu3 %v1910_v11  ;;  %v3063_v9 = vld [vmem:[%s3124_s14] ss:$0 sm:$0xff] }
0x14a6   :  { %v1786_v29 = vpop.permute.xlu0 %1785  ;;  %v1790_v28 = vpop.permute.xlu2 %1789 }
0x14a7   :  { %v1764_v27 = vpop.permute.xlu1 %1763  ;;  %v1802_v35 = vmax.f32 %v1778_v18, %v1786_v29  ;;  %v1804_v49 = vmax.f32 %v1780_v23, %v1790_v28 }
0x14a8   :  { %v1779_v34 = vmax.f32 %v1749_v0, %v1764_v27 }
0x14a9   :  { %v1813_v12 = vrot.slane %v1802_v35, 7  ;;  %v1833_v39 = vrot.slane %v1802_v35, 2  ;;  %v1819_v59 = vrot.slane %v1804_v49, 5 }
0x14ab   :  { %v1815_v48 = vsel %vm1814_vm9, %v1813_v12, %v1801_v38  ;;  %v1834_v50 = vsel %vm1814_vm9, %v1833_v39, %v1832_v47 }
0x14ae   :  { %v1788_v32 = vpop.permute.xlu0 %1787 }
0x14af   :  { %v1803_v36 = vmax.f32 %v1779_v34, %v1788_v32 }
0x14b1   :  { %v1816_v43 = vrot.slane %v1803_v36, 6  ;;  %v1835_v44 = vrot.slane %v1803_v36, 1 }
0x14b3   :  { %v1818_v53 = vsel %vm1817_vm10, %v1816_v43, %v1815_v48  ;;  %v1836_v54 = vsel %vm1817_vm10, %v1835_v44, %v1834_v50 }
0x14b4   :  { %v1837_v63 = vsel %vm1820_vm11, %v1804_v49, %v1836_v54  ;;  %v1821_v0 = vsel %vm1820_vm11, %v1819_v59, %v1818_v53  ;;  %vm2146_vm11 = vcmask 9216  }
0x14c6   :  { %v1768_v31 = vpop.permute.xlu1 %1767  ;;  %v1792_v41 = vpop.permute.xlu0 %1791 }
0x14c7   :  { %v1781_v37 = vmax.f32 %v1751_v20, %v1768_v31  ;;  %v2234_v20 = vld [vmem:[%s3120_s10] ss:$0 sm:$0xff] }
0x14c9   :  { %v1805_v45 = vmax.f32 %v1781_v37, %v1792_v41 }
0x14cb   :  { %v1822_v56 = vrot.slane %v1805_v45, 4  ;;  %v1838_v57 = vrot.slane %v1805_v45, 7 }
0x14cd   :  { %v1839_v1 = vsel %vm1823_vm12, %v1838_v57, %v1837_v63  ;;  %v1824_v2 = vsel %vm1823_vm12, %v1822_v56, %v1821_v0 }
0x14ce   :  { %v1770_v13 = vpop.permute.xlu1 %1769 }
0x14cf   :  { %v1782_v51 = vmax.f32 %v1752_v22, %v1770_v13 }
0x14d6   :  { %v1794_v58 = vpop.permute.xlu1 %1793 }
0x14d7   :  { %v1806_v60 = vmax.f32 %v1782_v51, %v1794_v58 }
0x14d9   :  { %v1825_v61 = vrot.slane %v1806_v60, 3  ;;  %v1840_v62 = vrot.slane %v1806_v60, 6 }
0x14db   :  { %v1841_v3 = vsel %vm1826_vm13, %v1840_v62, %v1839_v1  ;;  %v1827_v4 = vsel %vm1826_vm13, %v1825_v61, %v1824_v2 }
0x14dc   :  { %1842 = vrot.lane.b32.xlu0 %v1841_v3, %s2335_s28  ;;  %1829 = vrot.lane.b32.xlu2 %v1827_v4, %s2340_s19 }
0x1520   :  { %v1935_v52 = vpop.f32.mrf.mxu1 }
0x1521   :  { %v1936_v46 = vadd.f32 %v3063_v9, %v1935_v52 }
0x1523   :  { %1959 = vrot.lane.b32.xlu1 %v1936_v46, %s2334_s4 }
0x1536   :  { %v1830_v42 = vpop.permute.xlu2 %1829 }
0x1537   :  { %v1846_v14 = vsel %vm1522_vm4, %v1827_v4, %v1830_v42 }
0x154e   :  { %v1843_v15 = vpop.permute.xlu0 %1842 }
0x154f   :  { %v1847_v7 = vsel %vm1529_vm5, %v1846_v14, %v1843_v15 }
0x1550   :  { %v1848_v17 = vsel %vm1536_vm6, %v1847_v7, %v1841_v3 }
0x1551   :  { %2215 = vmatmul.msk.f32.vlgmr.msrb.gmra.mxu3 %vm73_vm0, %v1848_v17 }
0x1595   :  { %v1960_v13 = vpop.permute.xlu1 %1959 }
0x15d4   :  { %v1877_v5 = vpop.f32.mrf.mxu3 }
0x15d5   :  { %v1878_v21 = vadd.f32 %v2234_v20, %v1877_v5 }
0x15d7   :  { %2286 = vtanh.f32 %v1878_v21 }
0x15dd   :  { %v2287_v22 = vpop.eup %2286 }
0x15de   :  { %2216 = vmatmul.msk.f32.vlgmr.msrb.gmra.mxu0 %vm1529_vm5, %v2287_v22 }
0x165b   :  { %v1907_v10 = vpop.f32.mrf.mxu0 }
0x165c   :  { %v3074_v24 = vadd.f32 %v2236_v40, %v1907_v10 }
0x165e   :  { %v1938_v25 = vadd.f32 %v1936_v46, %v3074_v24 }
0x1660   :  { %v1939_v26 = vsub.f32 0.0, %v1938_v25 }
0x1662   :  { %v1940_v27 = vmul.f32 1.442695, %v1939_v26 }
0x1664   :  { %2288 = vpow2.f32 %v1940_v27 }
0x166a   :  { %v2289_v29 = vpop.eup %2288 }
0x166b   :  { %v1942_v30 = vadd.f32 1.0, %v2289_v29 }
0x166d   :  { %2290 = vrcp.f32 %v1942_v30  ;;  %v1954_v18 = vand.u32 2147483648, %v1942_v30  ;;  %v1952_v35 = vand.u32 2147483647, %v1942_v30  ;;  %vm1948_vm14 = vweird.f32 %v1942_v30 }
0x166f   :  { %v1955_v37 = vor.u32 1.1754944e-38, %v1954_v18  ;;  %vm1953_vm1 = vcmp.eq.f32.partialorder %v1952_v35, 8.507059e+37 }
0x1673   :  { %v2291_v31 = vpop.eup %2290 }
0x1674   :  { %v1944_v32 = vmul.f32 %v2291_v31, %v1942_v30  ;;  %vm1949_vm0 = vweird.f32 %v2291_v31 }
0x1675   :  { %vm1950_vm15 = vmor %vm1948_vm14, %vm1949_vm0 }
0x1676   :  { %v1945_v33 = vsub.f32 1.0, %v1944_v32 }
0x1678   :  { %v1946_v34 = vmul.f32 %v2291_v31, %v1945_v33 }
0x167a   :  { %v1947_v36 = vadd.f32 %v2291_v31, %v1946_v34 }
0x167c   :  { %v1951_v38 = vsel %vm1950_vm15, %v2291_v31, %v1947_v36 }
0x167d   :  { %v1956_v28 = vsel %vm1953_vm1, %v1955_v37, %v1951_v38 }
0x167e   :  { %v1962_v23 = vmul.f32 %v1960_v13, %v1956_v28  ;;  %v1969_v43 = vsub.f32 1.0, %v1956_v28  ;;  %v1975_v45 = vmul.f32 0.0, %v1956_v28 }
0x1680   :  { %1964 = vrot.lane.b32.xlu2 %v1962_v23, %s2338_s20 }
0x16da   :  { %v1965_v12 = vpop.permute.xlu2 %1964 }
0x16db   :  { %v1967_v39 = vadd.f32 %v1965_v12, %v3074_v24  ;;  %v2115_v12 = vld [vmem:[%s3125_s15 + $0x8] sm:$0xff] }
0x16dc   :  { %2140 = vmatpush.msra.mxu0 %v2115_v12 }
0x16dd   :  { %2292 = vtanh.f32 %v1967_v39  ;;  %v2114_v39 = vld [vmem:[%s3125_s15] sm:$0xff]  ;;  %s2153_s15 = sshll.u32 %s2342_s29, 4  ;;  %s2154_s15 = int_to_ptr.vmem [resolvable:$true] %s2153_s15 }
0x16de   :  { %2141 = vmatpush.msra.mxu0 %v2114_v39 }
0x16e3   :  { %v2293_v41 = vpop.eup %2292 }
0x16e4   :  { %1971 = vrot.lane.b32.xlu0 %v2293_v41, %s2340_s19 }
0x1756   :  { %v1972_v44 = vpop.permute.xlu0 %1971 }
0x1757   :  { %v1974_v47 = vmul.f32 %v1972_v44, %v1969_v43 }
0x1759   :  { %v1976_v49 = vadd.f32 %v1975_v45, %v1974_v47 }
0x175b   :  { %1978 = vrot.lane.b32.xlu1 %v1976_v49, %s2340_s19  ;;  %v2041_v4 = vrot.slane %v1976_v49, 6 }
0x17cd   :  { %v1979_v48 = vpop.permute.xlu1 %1978 }
0x17ce   :  { %2217 = vmatmul.msk.f32.vlgmr.msra.gmra.mxu2 %vm1529_vm5, %v1979_v48 }
0x1851   :  { %v1999_v50 = vpop.f32.mrf.mxu2 }
0x1852   :  { %v2000_v51 = vadd.f32 %v3063_v9, %v1999_v50  ;;  %v2237_v50 = vld [vmem:[%s3126_s16] ss:$0 sm:$0xff] }
0x1854   :  { %v2003_v53 = vrot.slane %v2000_v51, 6 }
0x1856   :  { %v2005_v54 = vadd.f32 %v2003_v53, %v3074_v24  ;;  %2025 = vrot.lane.b32.xlu2 %v2003_v53, %s2334_s4 }
0x1858   :  { %v2006_v56 = vsub.f32 0.0, %v2005_v54 }
0x185a   :  { %v2007_v57 = vmul.f32 1.442695, %v2006_v56 }
0x185c   :  { %2294 = vpow2.f32 %v2007_v57 }
0x1862   :  { %v2295_v58 = vpop.eup %2294 }
0x1863   :  { %v2009_v59 = vadd.f32 1.0, %v2295_v58 }
0x1865   :  { %2296 = vrcp.f32 %v2009_v59  ;;  %v2021_v63 = vand.u32 2147483648, %v2009_v59  ;;  %v2019_v1 = vand.u32 2147483647, %v2009_v59  ;;  %vm2015_vm3 = vweird.f32 %v2009_v59 }
0x1867   :  { %v2022_v3 = vor.u32 1.1754944e-38, %v2021_v63  ;;  %vm2020_vm6 = vcmp.eq.f32.partialorder %v2019_v1, 8.507059e+37 }
0x186b   :  { %v2297_v60 = vpop.eup %2296 }
0x186c   :  { %v2011_v61 = vmul.f32 %v2297_v60, %v2009_v59  ;;  %vm2016_vm2 = vweird.f32 %v2297_v60 }
0x186d   :  { %vm2017_vm4 = vmor %vm2015_vm3, %vm2016_vm2 }
0x186e   :  { %v2012_v62 = vsub.f32 1.0, %v2011_v61 }
0x1870   :  { %v2013_v0 = vmul.f32 %v2297_v60, %v2012_v62 }
0x1872   :  { %v2014_v2 = vadd.f32 %v2297_v60, %v2013_v0 }
0x1874   :  { %v2018_v6 = vsel %vm2017_vm4, %v2297_v60, %v2014_v2 }
0x1875   :  { %v2023_v16 = vsel %vm2020_vm6, %v2022_v3, %v2018_v6 }
0x1876   :  { %v2043_v8 = vmul.f32 %v2041_v4, %v2023_v16  ;;  %v2035_v17 = vsub.f32 1.0, %v2023_v16 }
0x18b0   :  { %v2026_v11 = vpop.permute.xlu2 %2025 }
0x18b1   :  { %v2028_v42 = vmul.f32 %v2026_v11, %v2023_v16 }
0x18b3   :  { %2030 = vrot.lane.b32.xlu0 %v2028_v42, %s2338_s20 }
0x1925   :  { %v2031_v14 = vpop.permute.xlu0 %2030 }
0x1926   :  { %v2033_v15 = vadd.f32 %v2031_v14, %v3074_v24 }
0x1928   :  { %2298 = vtanh.f32 %v2033_v15 }
0x192e   :  { %v2299_v7 = vpop.eup %2298 }
0x192f   :  { %2037 = vrot.lane.b32.xlu1 %v2299_v7, %s2340_s19 }
0x19a1   :  { %v2038_v55 = vpop.permute.xlu1 %2037 }
0x19a2   :  { %v2040_v19 = vmul.f32 %v2038_v55, %v2035_v17 }
0x19a4   :  { %v2044_v52 = vadd.f32 %v2043_v8, %v2040_v19 }
0x19a6   :  { %v2046_v46 = vrot.slane %v2044_v52, 2  ;;  %v2110_v41 = vrot.slane %v2044_v52, 6 }
0x19a8   :  { %2047 = vrot.lane.b32.xlu2 %v2046_v46, %s2340_s19 }
0x1a02   :  { %v2048_v20 = vpop.permute.xlu2 %2047 }
0x1a03   :  { %2218 = vmatmul.msk.f32.vlgmr.msra.gmra.mxu3 %vm1529_vm5, %v2048_v20 }
0x1a86   :  { %v2068_v5 = vpop.f32.mrf.mxu3 }
0x1a87   :  { %v2069_v21 = vadd.f32 %v3063_v9, %v2068_v5 }
0x1a89   :  { %v2072_v22 = vrot.slane %v2069_v21, 4 }
0x1a8b   :  { %2094 = vrot.lane.b32.xlu0 %v2072_v22, %s2334_s4  ;;  %v2074_v40 = vadd.f32 %v2072_v22, %v3074_v24 }
0x1a8d   :  { %v2075_v10 = vsub.f32 0.0, %v2074_v40 }
0x1a8f   :  { %v2076_v25 = vmul.f32 1.442695, %v2075_v10 }
0x1a91   :  { %2300 = vpow2.f32 %v2076_v25 }
0x1a97   :  { %v2301_v26 = vpop.eup %2300 }
0x1a98   :  { %v2078_v27 = vadd.f32 1.0, %v2301_v26 }
0x1a9a   :  { %2302 = vrcp.f32 %v2078_v27  ;;  %v2090_v18 = vand.u32 2147483648, %v2078_v27  ;;  %vm2084_vm8 = vweird.f32 %v2078_v27  ;;  %v2088_v9 = vand.u32 2147483647, %v2078_v27 }
0x1a9c   :  { %v2091_v35 = vor.u32 1.1754944e-38, %v2090_v18  ;;  %vm2089_vm10 = vcmp.eq.f32.partialorder %v2088_v9, 8.507059e+37 }
0x1aa0   :  { %v2303_v29 = vpop.eup %2302 }
0x1aa1   :  { %v2080_v30 = vmul.f32 %v2303_v29, %v2078_v27  ;;  %vm2085_vm7 = vweird.f32 %v2303_v29 }
0x1aa2   :  { %vm2086_vm9 = vmor %vm2084_vm8, %vm2085_vm7 }
0x1aa3   :  { %v2081_v31 = vsub.f32 1.0, %v2080_v30 }
0x1aa5   :  { %v2082_v32 = vmul.f32 %v2303_v29, %v2081_v31 }
0x1aa7   :  { %v2083_v33 = vadd.f32 %v2303_v29, %v2082_v32 }
0x1aa9   :  { %v2087_v34 = vsel %vm2086_vm9, %v2303_v29, %v2083_v33 }
0x1aaa   :  { %v2092_v37 = vsel %vm2089_vm10, %v2091_v35, %v2087_v34 }
0x1aab   :  { %v2104_v43 = vsub.f32 1.0, %v2092_v37  ;;  %v2112_v45 = vmul.f32 %v2110_v41, %v2092_v37 }
0x1afd   :  { %v2095_v36 = vpop.permute.xlu0 %2094 }
0x1afe   :  { %v2097_v13 = vmul.f32 %v2095_v36, %v2092_v37 }
0x1b00   :  { %2099 = vrot.lane.b32.xlu1 %v2097_v13, %s2338_s20 }
0x1b72   :  { %v2100_v38 = vpop.permute.xlu1 %2099 }
0x1b73   :  { %v2102_v28 = vadd.f32 %v2100_v38, %v3074_v24 }
0x1b75   :  { %2304 = vtanh.f32 %v2102_v28 }
0x1b7b   :  { %v2305_v23 = vpop.eup %2304 }
0x1b7c   :  { %2106 = vrot.lane.b32.xlu2 %v2305_v23, %s2340_s19 }
0x1bd6   :  { %v2107_v44 = vpop.permute.xlu2 %2106 }
0x1bd7   :  { %v2109_v47 = vmul.f32 %v2107_v44, %v2104_v43 }
0x1bd9   :  { %v2113_v24 = vadd.f32 %v2112_v45, %v2109_v47 }
0x1bdb   :  { %v2121_v49 = vrot.slane %v2113_v24, 4 }
0x1bdd   :  { %2122 = vrot.lane.b32.xlu0 %v2121_v49, %s2340_s19 }
0x1c4f   :  { %v2123_v48 = vpop.permute.xlu0 %2122 }
0x1c50   :  { %2219 = vmatmul.msk.f32.vlgmr.msra.gmra.mxu0 %vm1529_vm5, %v2123_v48 }
0x1ccd   :  { %v2143_v51 = vpop.f32.mrf.mxu0 }
0x1cce   :  { %v2144_v53 = vadd.f32 %v2237_v50, %v2143_v51 }
0x1cd0   :  { %2147 = vst.msk [vmem:[#allocation3] sm:$0x3] %vm2146_vm11, %v2144_v53 }
0x1cd1   :  { %2158 = dma.vmem_to_hbm [thread:$0]  %s2154_s15, 32, %s2156_s23, [#allocation4]  }
0x1cd2   :  { %2330 = dma.done.wait [#allocation4], 32  }
0x1cd3   :  { %2331 = vsyncadd [#allocation4], 4294967264 }
0x1cd4   :  { %2163 = vsyncpa [#allocation4], 1 }

</bundles_post_ra>
